<compile_context>
chip_gen: v7x
topology: tpu7x:2x2x1
jax: 0.10.0
libtpu: 0.0.40
codegen_flags: <defaults>
</compile_context>

<pallas_src>
import jax
import jax.numpy as jnp
from jax import lax
from jax.experimental import pallas as pl
from jax.experimental.pallas import tpu as pltpu

LANE = 128


def _silu(x):
    # exp -> EUP; approximate reciprocal -> EUP; only the multiply hits the VALU.
    return x * pl.reciprocal(1.0 + jnp.exp(-x), approx=True)


def _sppf_kernel(x_ref, w1_ref, b1_ref, w2a_ref, w2b_ref, w2c_ref, w2d_ref,
                 b2_ref, o_ref, pad_ref):
    # x_ref:   (1, H, W, C1)          one batch element (channels lane-padded)
    # w1_ref:  (C1, Cmid), b1_ref: (1, Cmid)       folded cv1 (conv+BN)
    # w2*_ref: (Cmid, C2),  b2_ref: (1, C2)        folded cv2, split into the
    #                                              4 concat row blocks
    # o_ref:   (1, H, W, C2)
    # pad_ref: VMEM scratch (H+4, W+4, Cmid), -inf-padded pooling buffer
    _, H, W, C1 = x_ref.shape
    Cmid = w1_ref.shape[1]
    C2 = o_ref.shape[3]

    # cv1: 1x1 conv (+ folded BN) + SiLU == channel matmul on the MXU.
    x2d = x_ref[0].reshape(H * W, C1)
    t2d = _silu(jnp.dot(x2d, w1_ref[...], preferred_element_type=jnp.float32)
                + b1_ref[...])                                   # (H*W, Cmid)

    # -inf border written ONCE; pool calls only overwrite the interior.
    pad_ref[...] = jnp.full(pad_ref.shape, -jnp.inf, dtype=jnp.float32)

    def pool5(a_hwc):
        # 5x5 max pool, stride 1, pad 2 (padding acts like -inf, matching
        # nn.MaxPool2d), done separably.
        pad_ref[2:H + 2, 2:W + 2, :] = a_hwc
        # H pass: leading-dim shifts, sublane-aligned full-width reads.
        hm = pad_ref[0:H, :, :]                    # first tap = accumulator init
        for dy in range(1, 5):
            hm = jnp.maximum(hm, pad_ref[dy:dy + H, :, :])
        # W pass: 4 shifted slices on the value (the only misaligned accesses).
        wm = hm[:, 0:W, :]
        for dx in range(1, 5):
            wm = jnp.maximum(wm, hm[:, dx:dx + W, :])
        return wm                                   # (H, W, Cmid)

    # cv2 accumulated per branch (no (H, W, 4*Cmid) concat ever materialized).
    acc = jnp.dot(t2d, w2a_ref[...], preferred_element_type=jnp.float32)
    y1 = pool5(t2d.reshape(H, W, Cmid))
    acc = acc + jnp.dot(y1.reshape(H * W, Cmid), w2b_ref[...],
                        preferred_element_type=jnp.float32)
    y2 = pool5(y1)
    acc = acc + jnp.dot(y2.reshape(H * W, Cmid), w2c_ref[...],
                        preferred_element_type=jnp.float32)
    y3 = pool5(y2)
    acc = acc + jnp.dot(y3.reshape(H * W, Cmid), w2d_ref[...],
                        preferred_element_type=jnp.float32)

    o = _silu(acc + b2_ref[...])
    o_ref[0] = o.reshape(H, W, C2).astype(o_ref.dtype)


def _round_up(n, m):
    return ((n + m - 1) // m) * m


def _pad_axis(a, axis, target):
    pad = target - a.shape[axis]
    if pad <= 0:
        return a
    widths = [(0, 0)] * a.ndim
    widths[axis] = (0, pad)
    return jnp.pad(a, widths)


def sppf_forward(x_nhwc, w1, b1, w2, b2):
    N, H, W, C1 = x_nhwc.shape
    Cmid = w1.shape[1]
    C2 = w2.shape[1]
    C1p = _round_up(C1, LANE)
    Cmidp = _round_up(Cmid, LANE)
    C2p = _round_up(C2, LANE)

    # Lane-pad everything with zeros (provably inert through conv/pool/conv).
    xp = _pad_axis(x_nhwc, 3, C1p)
    w1p = _pad_axis(_pad_axis(w1, 0, C1p), 1, Cmidp)
    b1p = _pad_axis(b1, 1, Cmidp)
    w2_blocks = [
        _pad_axis(_pad_axis(w2[i * Cmid:(i + 1) * Cmid], 0, Cmidp), 1, C2p)
        for i in range(4)
    ]
    b2p = _pad_axis(b2, 1, C2p)

    out = pl.pallas_call(
        _sppf_kernel,
        out_shape=jax.ShapeDtypeStruct((N, H, W, C2p), jnp.float32),
        grid=(N,),
        in_specs=[
            pl.BlockSpec((1, H, W, C1p), lambda n: (n, 0, 0, 0)),
            pl.BlockSpec((C1p, Cmidp), lambda n: (0, 0)),
            pl.BlockSpec((1, Cmidp), lambda n: (0, 0)),
            pl.BlockSpec((Cmidp, C2p), lambda n: (0, 0)),
            pl.BlockSpec((Cmidp, C2p), lambda n: (0, 0)),
            pl.BlockSpec((Cmidp, C2p), lambda n: (0, 0)),
            pl.BlockSpec((Cmidp, C2p), lambda n: (0, 0)),
            pl.BlockSpec((1, C2p), lambda n: (0, 0)),
        ],
        out_specs=pl.BlockSpec((1, H, W, C2p), lambda n: (n, 0, 0, 0)),
        scratch_shapes=[pltpu.VMEM((H + 4, W + 4, Cmidp), jnp.float32)],
        compiler_params=pltpu.CompilerParams(
            # Batch elements are fully independent -> shard across both
            # TensorCores on v7x (no-op on single-TC v5e/v6e).
            dimension_semantics=("parallel",),
        ),
    )(xp, w1p, b1p, *w2_blocks, b2p)
    return out[..., :C2]


def sppf_reference(x_nhwc, w1, b1, w2, b2):
    """Pure-JAX NHWC reference (matches PyTorch SPPF with folded BN)."""
    t = jax.nn.silu(jnp.einsum("nhwc,cd->nhwd", x_nhwc, w1) + b1[0])

    def pool(a):
        return lax.reduce_window(a, -jnp.inf, lax.max,
                                 (1, 5, 5, 1), (1, 1, 1, 1),
                                 [(0, 0), (2, 2), (2, 2), (0, 0)])

    y1 = pool(t)
    y2 = pool(y1)
    y3 = pool(y2)
    cat = jnp.concatenate([t, y1, y2, y3], axis=-1)
    return jax.nn.silu(jnp.einsum("nhwc,cd->nhwd", cat, w2) + b2[0])


def _fold_bn(conv_w_oc_ic, gamma, beta, mean, var, eps=1e-5):
    """Fold BN into a 1x1 conv.  conv_w_oc_ic: (out_c, in_c).  Returns (W, b)
    laid out for x @ W + b with channels-last x."""
    scale = gamma / jnp.sqrt(var + eps)
    w = (conv_w_oc_ic * scale[:, None]).T          # (in_c, out_c)
    b = (beta - mean * scale)[None, :]             # (1, out_c)
    return w, b


if __name__ == "__main__":
    key = jax.random.PRNGKey(0)
    N, C1, H, W = 2, 8, 16, 16
    C2 = 8
    Cmid = C1 // 2
    ks = jax.random.split(key, 11)

    # Input as PyTorch would see it (NCHW), then transpose to kernel layout.
    x_nchw = jax.random.normal(ks[0], (N, C1, H, W), dtype=jnp.float32)
    x_nhwc = jnp.transpose(x_nchw, (0, 2, 3, 1))

    # cv1: Conv2d(C1, Cmid, 1, bias=False) + BatchNorm2d(Cmid)
    w1_conv = 0.2 * jax.random.normal(ks[1], (Cmid, C1), dtype=jnp.float32)
    g1 = 1.0 + 0.1 * jax.random.normal(ks[2], (Cmid,), dtype=jnp.float32)
    beta1 = 0.1 * jax.random.normal(ks[3], (Cmid,), dtype=jnp.float32)
    m1 = 0.1 * jax.random.normal(ks[4], (Cmid,), dtype=jnp.float32)
    v1 = jnp.abs(jax.random.normal(ks[5], (Cmid,), dtype=jnp.float32)) + 0.5
    w1, b1 = _fold_bn(w1_conv, g1, beta1, m1, v1)

    # cv2: Conv2d(4*Cmid, C2, 1, bias=False) + BatchNorm2d(C2)
    w2_conv = 0.2 * jax.random.normal(ks[6], (C2, 4 * Cmid), dtype=jnp.float32)
    g2 = 1.0 + 0.1 * jax.random.normal(ks[7], (C2,), dtype=jnp.float32)
    beta2 = 0.1 * jax.random.normal(ks[8], (C2,), dtype=jnp.float32)
    m2 = 0.1 * jax.random.normal(ks[9], (C2,), dtype=jnp.float32)
    v2 = jnp.abs(jax.random.normal(ks[10], (C2,), dtype=jnp.float32)) + 0.5
    w2, b2 = _fold_bn(w2_conv, g2, beta2, m2, v2)

    out = sppf_forward(x_nhwc, w1, b1, w2, b2)
    out = jax.block_until_ready(out)

    ref = sppf_reference(x_nhwc, w1, b1, w2, b2)
    assert out.shape == (N, H, W, C2)
    # Tolerance accounts for the EUP approximate reciprocal used inside SiLU.
    assert jnp.allclose(out, ref, rtol=1e-2, atol=1e-2), "mismatch vs JAX reference"

    # Back to NCHW to mirror the PyTorch output layout (shape check only).
    out_nchw = jnp.transpose(out, (0, 3, 1, 2))
    assert out_nchw.shape == (N, C2, H, W)

    print("KERNEL_OK")
</pallas_src>

<mosaic_0001>
module attributes {stable_mosaic.version = 11 : i64} {
  func.func @_sppf_kernel(%arg0: i32, %arg1: memref<1x16x16x128xf32, #tpu.memory_space<vmem>>, %arg2: memref<128x128xf32, #tpu.memory_space<vmem>>, %arg3: memref<1x128xf32, #tpu.memory_space<vmem>>, %arg4: memref<128x128xf32, #tpu.memory_space<vmem>>, %arg5: memref<128x128xf32, #tpu.memory_space<vmem>>, %arg6: memref<128x128xf32, #tpu.memory_space<vmem>>, %arg7: memref<128x128xf32, #tpu.memory_space<vmem>>, %arg8: memref<1x128xf32, #tpu.memory_space<vmem>>, %arg9: memref<1x16x16x128xf32, #tpu.memory_space<vmem>>, %arg10: memref<20x20x128xf32, #tpu.memory_space<vmem>>) attributes {dimension_semantics = [#tpu.dimension_semantics<parallel>], iteration_bounds = array<i64: 2>, scalar_prefetch = 0 : i64, scratch_operands = 1 : i64, tpu.core_type = #tpu.core_type<tc>, window_params = [{transform_indices = @transform_0, window_bounds = array<i64: 1, 16, 16, 128>}, {pipeline_mode = #tpu.pipeline_mode<synchronous>, transform_indices = @transform_1, window_bounds = array<i64: 128, 128>}, {pipeline_mode = #tpu.pipeline_mode<synchronous>, transform_indices = @transform_2, window_bounds = array<i64: 1, 128>}, {pipeline_mode = #tpu.pipeline_mode<synchronous>, transform_indices = @transform_3, window_bounds = array<i64: 128, 128>}, {pipeline_mode = #tpu.pipeline_mode<synchronous>, transform_indices = @transform_4, window_bounds = array<i64: 128, 128>}, {pipeline_mode = #tpu.pipeline_mode<synchronous>, transform_indices = @transform_5, window_bounds = array<i64: 128, 128>}, {pipeline_mode = #tpu.pipeline_mode<synchronous>, transform_indices = @transform_6, window_bounds = array<i64: 128, 128>}, {pipeline_mode = #tpu.pipeline_mode<synchronous>, transform_indices = @transform_7, window_bounds = array<i64: 1, 128>}, {transform_indices = @transform_8, window_bounds = array<i64: 1, 16, 16, 128>}]} {
    %c0 = arith.constant 0 : index
    %c0_0 = arith.constant 0 : index
    %c0_1 = arith.constant 0 : index
    %c0_2 = arith.constant 0 : index
    %0 = vector.load %arg1[%c0, %c0_0, %c0_1, %c0_2] : memref<1x16x16x128xf32, #tpu.memory_space<vmem>>, vector<1x16x16x128xf32>
    %1 = vector.shape_cast %0 : vector<1x16x16x128xf32> to vector<16x16x128xf32>
    %2 = vector.shape_cast %1 : vector<16x16x128xf32> to vector<256x128xf32>
    %c0_3 = arith.constant 0 : index
    %c0_4 = arith.constant 0 : index
    %3 = vector.load %arg2[%c0_3, %c0_4] : memref<128x128xf32, #tpu.memory_space<vmem>>, vector<128x128xf32>
    %cst = arith.constant dense<0.000000e+00> : vector<256x128xf32>
    %4 = tpu.matmul %2, %3, %cst {dimension_numbers = #tpu.dot_dimension_numbers<[1], [0], [0], [1], [0, 0, 1, 1], [], []>} : vector<256x128xf32>, vector<128x128xf32>, vector<256x128xf32> -> vector<256x128xf32>
    %c0_5 = arith.constant 0 : index
    %c0_6 = arith.constant 0 : index
    %5 = vector.load %arg3[%c0_5, %c0_6] : memref<1x128xf32, #tpu.memory_space<vmem>>, vector<1x128xf32>
    %6 = vector.broadcast %5 : vector<1x128xf32> to vector<256x128xf32>
    %7 = arith.addf %4, %6 : vector<256x128xf32>
    %cst_7 = arith.constant 0.000000e+00 : f32
    %8 = vector.broadcast %cst_7 : f32 to vector<256x128xf32>
    %9 = arith.subf %8, %7 : vector<256x128xf32>
    %10 = math.exp %9 : vector<256x128xf32>
    %cst_8 = arith.constant 1.000000e+00 : f32
    %11 = vector.broadcast %cst_8 : f32 to vector<256x128xf32>
    %12 = arith.addf %11, %10 : vector<256x128xf32>
    %13 = tpu.reciprocal %12 {approx = true} : vector<256x128xf32> -> vector<256x128xf32>
    %14 = arith.mulf %7, %13 : vector<256x128xf32>
    %cst_9 = arith.constant 0xFF800000 : f32
    %15 = vector.broadcast %cst_9 : f32 to vector<20x20x128xf32>
    %c0_10 = arith.constant 0 : index
    %c0_11 = arith.constant 0 : index
    %c0_12 = arith.constant 0 : index
    %16 = vector.load %arg10[%c0_10, %c0_11, %c0_12] : memref<20x20x128xf32, #tpu.memory_space<vmem>>, vector<20x20x128xf32>
    tpu.vector_store %arg10[%c0_10, %c0_11, %c0_12], %15 {strides = array<i32>} : memref<20x20x128xf32, #tpu.memory_space<vmem>>, vector<20x20x128xf32>,
    %c0_13 = arith.constant 0 : index
    %c0_14 = arith.constant 0 : index
    %17 = vector.load %arg4[%c0_13, %c0_14] : memref<128x128xf32, #tpu.memory_space<vmem>>, vector<128x128xf32>
    %cst_15 = arith.constant dense<0.000000e+00> : vector<256x128xf32>
    %18 = tpu.matmul %14, %17, %cst_15 {dimension_numbers = #tpu.dot_dimension_numbers<[1], [0], [0], [1], [0, 0, 1, 1], [], []>} : vector<256x128xf32>, vector<128x128xf32>, vector<256x128xf32> -> vector<256x128xf32>
    %19 = vector.shape_cast %14 : vector<256x128xf32> to vector<16x16x128xf32>
    %c2 = arith.constant 2 : index
    %c2_16 = arith.constant 2 : index
    %c0_17 = arith.constant 0 : index
    %20 = vector.load %arg10[%c2, %c2_16, %c0_17] : memref<20x20x128xf32, #tpu.memory_space<vmem>>, vector<16x16x128xf32>
    tpu.vector_store %arg10[%c2, %c2_16, %c0_17], %19 {strides = array<i32>} : memref<20x20x128xf32, #tpu.memory_space<vmem>>, vector<16x16x128xf32>,
    %c0_18 = arith.constant 0 : index
    %c0_19 = arith.constant 0 : index
    %c0_20 = arith.constant 0 : index
    %21 = vector.load %arg10[%c0_18, %c0_19, %c0_20] : memref<20x20x128xf32, #tpu.memory_space<vmem>>, vector<16x20x128xf32>
    %c1 = arith.constant 1 : index
    %c0_21 = arith.constant 0 : index
    %c0_22 = arith.constant 0 : index
    %22 = vector.load %arg10[%c1, %c0_21, %c0_22] : memref<20x20x128xf32, #tpu.memory_space<vmem>>, vector<16x20x128xf32>
    %23 = arith.maximumf %21, %22 : vector<16x20x128xf32>
    %c2_23 = arith.constant 2 : index
    %c0_24 = arith.constant 0 : index
    %c0_25 = arith.constant 0 : index
    %24 = vector.load %arg10[%c2_23, %c0_24, %c0_25] : memref<20x20x128xf32, #tpu.memory_space<vmem>>, vector<16x20x128xf32>
    %25 = arith.maximumf %23, %24 : vector<16x20x128xf32>
    %c3 = arith.constant 3 : index
    %c0_26 = arith.constant 0 : index
    %c0_27 = arith.constant 0 : index
    %26 = vector.load %arg10[%c3, %c0_26, %c0_27] : memref<20x20x128xf32, #tpu.memory_space<vmem>>, vector<16x20x128xf32>
    %27 = arith.maximumf %25, %26 : vector<16x20x128xf32>
    %c4 = arith.constant 4 : index
    %c0_28 = arith.constant 0 : index
    %c0_29 = arith.constant 0 : index
    %28 = vector.load %arg10[%c4, %c0_28, %c0_29] : memref<20x20x128xf32, #tpu.memory_space<vmem>>, vector<16x20x128xf32>
    %29 = arith.maximumf %27, %28 : vector<16x20x128xf32>
    %30 = vector.extract_strided_slice %29 {offsets = [0, 0, 0], sizes = [16, 16, 128], strides = [1, 1, 1]} : vector<16x20x128xf32> to vector<16x16x128xf32>
    %31 = vector.extract_strided_slice %29 {offsets = [0, 1, 0], sizes = [16, 16, 128], strides = [1, 1, 1]} : vector<16x20x128xf32> to vector<16x16x128xf32>
    %32 = arith.maximumf %30, %31 : vector<16x16x128xf32>
    %33 = vector.extract_strided_slice %29 {offsets = [0, 2, 0], sizes = [16, 16, 128], strides = [1, 1, 1]} : vector<16x20x128xf32> to vector<16x16x128xf32>
    %34 = arith.maximumf %32, %33 : vector<16x16x128xf32>
    %35 = vector.extract_strided_slice %29 {offsets = [0, 3, 0], sizes = [16, 16, 128], strides = [1, 1, 1]} : vector<16x20x128xf32> to vector<16x16x128xf32>
    %36 = arith.maximumf %34, %35 : vector<16x16x128xf32>
    %37 = vector.extract_strided_slice %29 {offsets = [0, 4, 0], sizes = [16, 16, 128], strides = [1, 1, 1]} : vector<16x20x128xf32> to vector<16x16x128xf32>
    %38 = arith.maximumf %36, %37 : vector<16x16x128xf32>
    %39 = vector.shape_cast %38 : vector<16x16x128xf32> to vector<256x128xf32>
    %c0_30 = arith.constant 0 : index
    %c0_31 = arith.constant 0 : index
    %40 = vector.load %arg5[%c0_30, %c0_31] : memref<128x128xf32, #tpu.memory_space<vmem>>, vector<128x128xf32>
    %cst_32 = arith.constant dense<0.000000e+00> : vector<256x128xf32>
    %41 = tpu.matmul %39, %40, %cst_32 {dimension_numbers = #tpu.dot_dimension_numbers<[1], [0], [0], [1], [0, 0, 1, 1], [], []>} : vector<256x128xf32>, vector<128x128xf32>, vector<256x128xf32> -> vector<256x128xf32>
    %42 = arith.addf %18, %41 : vector<256x128xf32>
    %c2_33 = arith.constant 2 : index
    %c2_34 = arith.constant 2 : index
    %c0_35 = arith.constant 0 : index
    %43 = vector.load %arg10[%c2_33, %c2_34, %c0_35] : memref<20x20x128xf32, #tpu.memory_space<vmem>>, vector<16x16x128xf32>
    tpu.vector_store %arg10[%c2_33, %c2_34, %c0_35], %38 {strides = array<i32>} : memref<20x20x128xf32, #tpu.memory_space<vmem>>, vector<16x16x128xf32>,
    %c0_36 = arith.constant 0 : index
    %c0_37 = arith.constant 0 : index
    %c0_38 = arith.constant 0 : index
    %44 = vector.load %arg10[%c0_36, %c0_37, %c0_38] : memref<20x20x128xf32, #tpu.memory_space<vmem>>, vector<16x20x128xf32>
    %c1_39 = arith.constant 1 : index
    %c0_40 = arith.constant 0 : index
    %c0_41 = arith.constant 0 : index
    %45 = vector.load %arg10[%c1_39, %c0_40, %c0_41] : memref<20x20x128xf32, #tpu.memory_space<vmem>>, vector<16x20x128xf32>
    %46 = arith.maximumf %44, %45 : vector<16x20x128xf32>
    %c2_42 = arith.constant 2 : index
    %c0_43 = arith.constant 0 : index
    %c0_44 = arith.constant 0 : index
    %47 = vector.load %arg10[%c2_42, %c0_43, %c0_44] : memref<20x20x128xf32, #tpu.memory_space<vmem>>, vector<16x20x128xf32>
    %48 = arith.maximumf %46, %47 : vector<16x20x128xf32>
    %c3_45 = arith.constant 3 : index
    %c0_46 = arith.constant 0 : index
    %c0_47 = arith.constant 0 : index
    %49 = vector.load %arg10[%c3_45, %c0_46, %c0_47] : memref<20x20x128xf32, #tpu.memory_space<vmem>>, vector<16x20x128xf32>
    %50 = arith.maximumf %48, %49 : vector<16x20x128xf32>
    %c4_48 = arith.constant 4 : index
    %c0_49 = arith.constant 0 : index
    %c0_50 = arith.constant 0 : index
    %51 = vector.load %arg10[%c4_48, %c0_49, %c0_50] : memref<20x20x128xf32, #tpu.memory_space<vmem>>, vector<16x20x128xf32>
    %52 = arith.maximumf %50, %51 : vector<16x20x128xf32>
    %53 = vector.extract_strided_slice %52 {offsets = [0, 0, 0], sizes = [16, 16, 128], strides = [1, 1, 1]} : vector<16x20x128xf32> to vector<16x16x128xf32>
    %54 = vector.extract_strided_slice %52 {offsets = [0, 1, 0], sizes = [16, 16, 128], strides = [1, 1, 1]} : vector<16x20x128xf32> to vector<16x16x128xf32>
    %55 = arith.maximumf %53, %54 : vector<16x16x128xf32>
    %56 = vector.extract_strided_slice %52 {offsets = [0, 2, 0], sizes = [16, 16, 128], strides = [1, 1, 1]} : vector<16x20x128xf32> to vector<16x16x128xf32>
    %57 = arith.maximumf %55, %56 : vector<16x16x128xf32>
    %58 = vector.extract_strided_slice %52 {offsets = [0, 3, 0], sizes = [16, 16, 128], strides = [1, 1, 1]} : vector<16x20x128xf32> to vector<16x16x128xf32>
    %59 = arith.maximumf %57, %58 : vector<16x16x128xf32>
    %60 = vector.extract_strided_slice %52 {offsets = [0, 4, 0], sizes = [16, 16, 128], strides = [1, 1, 1]} : vector<16x20x128xf32> to vector<16x16x128xf32>
    %61 = arith.maximumf %59, %60 : vector<16x16x128xf32>
    %62 = vector.shape_cast %61 : vector<16x16x128xf32> to vector<256x128xf32>
    %c0_51 = arith.constant 0 : index
    %c0_52 = arith.constant 0 : index
    %63 = vector.load %arg6[%c0_51, %c0_52] : memref<128x128xf32, #tpu.memory_space<vmem>>, vector<128x128xf32>
    %cst_53 = arith.constant dense<0.000000e+00> : vector<256x128xf32>
    %64 = tpu.matmul %62, %63, %cst_53 {dimension_numbers = #tpu.dot_dimension_numbers<[1], [0], [0], [1], [0, 0, 1, 1], [], []>} : vector<256x128xf32>, vector<128x128xf32>, vector<256x128xf32> -> vector<256x128xf32>
    %65 = arith.addf %42, %64 : vector<256x128xf32>
    %c2_54 = arith.constant 2 : index
    %c2_55 = arith.constant 2 : index
    %c0_56 = arith.constant 0 : index
    %66 = vector.load %arg10[%c2_54, %c2_55, %c0_56] : memref<20x20x128xf32, #tpu.memory_space<vmem>>, vector<16x16x128xf32>
    tpu.vector_store %arg10[%c2_54, %c2_55, %c0_56], %61 {strides = array<i32>} : memref<20x20x128xf32, #tpu.memory_space<vmem>>, vector<16x16x128xf32>,
    %c0_57 = arith.constant 0 : index
    %c0_58 = arith.constant 0 : index
    %c0_59 = arith.constant 0 : index
    %67 = vector.load %arg10[%c0_57, %c0_58, %c0_59] : memref<20x20x128xf32, #tpu.memory_space<vmem>>, vector<16x20x128xf32>
    %c1_60 = arith.constant 1 : index
    %c0_61 = arith.constant 0 : index
    %c0_62 = arith.constant 0 : index
    %68 = vector.load %arg10[%c1_60, %c0_61, %c0_62] : memref<20x20x128xf32, #tpu.memory_space<vmem>>, vector<16x20x128xf32>
    %69 = arith.maximumf %67, %68 : vector<16x20x128xf32>
    %c2_63 = arith.constant 2 : index
    %c0_64 = arith.constant 0 : index
    %c0_65 = arith.constant 0 : index
    %70 = vector.load %arg10[%c2_63, %c0_64, %c0_65] : memref<20x20x128xf32, #tpu.memory_space<vmem>>, vector<16x20x128xf32>
    %71 = arith.maximumf %69, %70 : vector<16x20x128xf32>
    %c3_66 = arith.constant 3 : index
    %c0_67 = arith.constant 0 : index
    %c0_68 = arith.constant 0 : index
    %72 = vector.load %arg10[%c3_66, %c0_67, %c0_68] : memref<20x20x128xf32, #tpu.memory_space<vmem>>, vector<16x20x128xf32>
    %73 = arith.maximumf %71, %72 : vector<16x20x128xf32>
    %c4_69 = arith.constant 4 : index
    %c0_70 = arith.constant 0 : index
    %c0_71 = arith.constant 0 : index
    %74 = vector.load %arg10[%c4_69, %c0_70, %c0_71] : memref<20x20x128xf32, #tpu.memory_space<vmem>>, vector<16x20x128xf32>
    %75 = arith.maximumf %73, %74 : vector<16x20x128xf32>
    %76 = vector.extract_strided_slice %75 {offsets = [0, 0, 0], sizes = [16, 16, 128], strides = [1, 1, 1]} : vector<16x20x128xf32> to vector<16x16x128xf32>
    %77 = vector.extract_strided_slice %75 {offsets = [0, 1, 0], sizes = [16, 16, 128], strides = [1, 1, 1]} : vector<16x20x128xf32> to vector<16x16x128xf32>
    %78 = arith.maximumf %76, %77 : vector<16x16x128xf32>
    %79 = vector.extract_strided_slice %75 {offsets = [0, 2, 0], sizes = [16, 16, 128], strides = [1, 1, 1]} : vector<16x20x128xf32> to vector<16x16x128xf32>
    %80 = arith.maximumf %78, %79 : vector<16x16x128xf32>
    %81 = vector.extract_strided_slice %75 {offsets = [0, 3, 0], sizes = [16, 16, 128], strides = [1, 1, 1]} : vector<16x20x128xf32> to vector<16x16x128xf32>
    %82 = arith.maximumf %80, %81 : vector<16x16x128xf32>
    %83 = vector.extract_strided_slice %75 {offsets = [0, 4, 0], sizes = [16, 16, 128], strides = [1, 1, 1]} : vector<16x20x128xf32> to vector<16x16x128xf32>
    %84 = arith.maximumf %82, %83 : vector<16x16x128xf32>
    %85 = vector.shape_cast %84 : vector<16x16x128xf32> to vector<256x128xf32>
    %c0_72 = arith.constant 0 : index
    %c0_73 = arith.constant 0 : index
    %86 = vector.load %arg7[%c0_72, %c0_73] : memref<128x128xf32, #tpu.memory_space<vmem>>, vector<128x128xf32>
    %cst_74 = arith.constant dense<0.000000e+00> : vector<256x128xf32>
    %87 = tpu.matmul %85, %86, %cst_74 {dimension_numbers = #tpu.dot_dimension_numbers<[1], [0], [0], [1], [0, 0, 1, 1], [], []>} : vector<256x128xf32>, vector<128x128xf32>, vector<256x128xf32> -> vector<256x128xf32>
    %88 = arith.addf %65, %87 : vector<256x128xf32>
    %c0_75 = arith.constant 0 : index
    %c0_76 = arith.constant 0 : index
    %89 = vector.load %arg8[%c0_75, %c0_76] : memref<1x128xf32, #tpu.memory_space<vmem>>, vector<1x128xf32>
    %90 = vector.broadcast %89 : vector<1x128xf32> to vector<256x128xf32>
    %91 = arith.addf %88, %90 : vector<256x128xf32>
    %cst_77 = arith.constant 0.000000e+00 : f32
    %92 = vector.broadcast %cst_77 : f32 to vector<256x128xf32>
    %93 = arith.subf %92, %91 : vector<256x128xf32>
    %94 = math.exp %93 : vector<256x128xf32>
    %cst_78 = arith.constant 1.000000e+00 : f32
    %95 = vector.broadcast %cst_78 : f32 to vector<256x128xf32>
    %96 = arith.addf %95, %94 : vector<256x128xf32>
    %97 = tpu.reciprocal %96 {approx = true} : vector<256x128xf32> -> vector<256x128xf32>
    %98 = arith.mulf %91, %97 : vector<256x128xf32>
    %99 = vector.shape_cast %98 : vector<256x128xf32> to vector<16x16x128xf32>
    %c0_79 = arith.constant 0 : index
    %c0_80 = arith.constant 0 : index
    %c0_81 = arith.constant 0 : index
    %c0_82 = arith.constant 0 : index
    %100 = vector.load %arg9[%c0_79, %c0_80, %c0_81, %c0_82] : memref<1x16x16x128xf32, #tpu.memory_space<vmem>>, vector<1x16x16x128xf32>
    %101 = vector.shape_cast %100 : vector<1x16x16x128xf32> to vector<16x16x128xf32>
    %102 = vector.shape_cast %99 : vector<16x16x128xf32> to vector<1x16x16x128xf32>
    tpu.vector_store %arg9[%c0_79, %c0_80, %c0_81, %c0_82], %102 {strides = array<i32>} : memref<1x16x16x128xf32, #tpu.memory_space<vmem>>, vector<1x16x16x128xf32>,
    return
  }
  func.func @transform_0(%arg0: i32) -> (i32, i32, i32, i32) {
    %c0_i32 = arith.constant 0 : i32
    %c0_i32_0 = arith.constant 0 : i32
    %c0_i32_1 = arith.constant 0 : i32
    %c0_i32_2 = arith.constant 0 : i32
    return %arg0, %c0_i32, %c0_i32_0, %c0_i32_1 : i32, i32, i32, i32
  }
  func.func @transform_1(%arg0: i32) -> (i32, i32) {
    %c0_i32 = arith.constant 0 : i32
    %c0_i32_0 = arith.constant 0 : i32
    %c0_i32_1 = arith.constant 0 : i32
    return %c0_i32, %c0_i32_0 : i32, i32
  }
  func.func @transform_2(%arg0: i32) -> (i32, i32) {
    %c0_i32 = arith.constant 0 : i32
    %c0_i32_0 = arith.constant 0 : i32
    %c0_i32_1 = arith.constant 0 : i32
    return %c0_i32, %c0_i32_0 : i32, i32
  }
  func.func @transform_3(%arg0: i32) -> (i32, i32) {
    %c0_i32 = arith.constant 0 : i32
    %c0_i32_0 = arith.constant 0 : i32
    %c0_i32_1 = arith.constant 0 : i32
    return %c0_i32, %c0_i32_0 : i32, i32
  }
  func.func @transform_4(%arg0: i32) -> (i32, i32) {
    %c0_i32 = arith.constant 0 : i32
    %c0_i32_0 = arith.constant 0 : i32
    %c0_i32_1 = arith.constant 0 : i32
    return %c0_i32, %c0_i32_0 : i32, i32
  }
  func.func @transform_5(%arg0: i32) -> (i32, i32) {
    %c0_i32 = arith.constant 0 : i32
    %c0_i32_0 = arith.constant 0 : i32
    %c0_i32_1 = arith.constant 0 : i32
    return %c0_i32, %c0_i32_0 : i32, i32
  }
  func.func @transform_6(%arg0: i32) -> (i32, i32) {
    %c0_i32 = arith.constant 0 : i32
    %c0_i32_0 = arith.constant 0 : i32
    %c0_i32_1 = arith.constant 0 : i32
    return %c0_i32, %c0_i32_0 : i32, i32
  }
  func.func @transform_7(%arg0: i32) -> (i32, i32) {
    %c0_i32 = arith.constant 0 : i32
    %c0_i32_0 = arith.constant 0 : i32
    %c0_i32_1 = arith.constant 0 : i32
    return %c0_i32, %c0_i32_0 : i32, i32
  }
  func.func @transform_8(%arg0: i32) -> (i32, i32, i32, i32) {
    %c0_i32 = arith.constant 0 : i32
    %c0_i32_0 = arith.constant 0 : i32
    %c0_i32_1 = arith.constant 0 : i32
    %c0_i32_2 = arith.constant 0 : i32
    return %arg0, %c0_i32, %c0_i32_0, %c0_i32_1 : i32, i32, i32, i32
  }
}

</mosaic_0001>

<bundles_post_ra>
// kernel: tpu_custom_call.1
= control target key start
LH: loop header
LB: loop body
LE: loop exit
PB: predicated region body
PF: predicated region fallthrough
CT: control target
= control target key end

     0   :  { %s9672_s0 = inlined_call_operand.hbm [shape: f32[2,16,16,128], index: 0, kind: input, shape index: {}]   ;;  %s9673_s1 = inlined_call_operand.hbm [shape: f32[128,128], index: 1, kind: input, shape index: {}]   ;;  %s9674_s2 = inlined_call_operand.vmem [shape: f32[1,128], index: 2, kind: input, shape index: {}]   ;;  %s9675_s3 = inlined_call_operand.hbm [shape: f32[128,128], index: 3, kind: input, shape index: {}]   ;;  %s9676_s4 = inlined_call_operand.hbm [shape: f32[128,128], index: 4, kind: input, shape index: {}]   ;;  %s9677_s5 = inlined_call_operand.hbm [shape: f32[128,128], index: 5, kind: input, shape index: {}]   ;;  %s9678_s6 = inlined_call_operand.hbm [shape: f32[128,128], index: 6, kind: input, shape index: {}]   ;;  %s9679_s7 = inlined_call_operand.vmem [shape: f32[1,128], index: 7, kind: input, shape index: {}]   ;;  %s9680_s8 = inlined_call_operand.hbm [shape: f32[2,16,16,128], index: 8, kind: output, shape index: {}]  }
   0x1   :  { %9708 = sst [smem:[#allocation40_spill]] %s9673_s1 }
   0x2   :  { %13 = vsyncpa [#allocation4], 0 }
   0x3   :  { %15 = vsyncpa [#allocation4 + $0x1], 0 }
   0x4   :  { %16 = vsyncpa [#allocation7], 0 }
   0x5   :  { %17 = vsyncpa [#allocation10], 0 }
   0x6   :  { %18 = vsyncpa [#allocation13], 0 }
   0x7   :  { %19 = vsyncpa [#allocation5], 0 }
   0x8   :  { %21 = vsyncpa [#allocation5 + $0x1], 0  ;;  %s7237_s27 = smov 0   ;;  %s7239_s28 = smov 0  }
   0x9   :  { %s7241_s29 = smov 0   ;;  %s7243_s30 = smov 0  }
   0xa LB: > { %s7180_s9 = smov [#allocation6]   ;;  %s7258_s11 = sadd.s32 4294967295, %s7178_s30   ;;  %s7178_s30 = sphi %s7243_s30, %s9776_s30   ;;  %s7174_s29 = sphi %s7241_s29, %s9775_s29   ;;  %s7170_s28 = sphi %s7239_s28, %s9774_s28   ;;  %s7166_s27 = sphi %s7237_s27, %s9773_s27  }
   0xb   : > { %s243_s10 = sshll.u32 %s7180_s9, 4  ;;  %p5628_p0 = scmp.ge.s32.totalorder %s7178_s30, 1  ;;  %s7263_s10 = int_to_ptr.vmem [resolvable:$true] %s243_s10 }
   0xc   : > { %p9681_p1 = scmp.eq.s32.totalorder %s7258_s11, 0  ;;  %p231_p2 = scmp.lt.s32.totalorder %s7178_s30, 3 }
   0xd   : > { %s7181_s13 = smov [#allocation9]   ;;  %s7182_s16 = smov [#allocation8]  }
   0xe   : > { %p7265_p3 = pnand %p5628_p0, %p231_p2  ;;  %s272_s14 = sshll.u32 %s7181_s13, 4  ;;  %s7278_s14 = int_to_ptr.vmem [resolvable:$true] %s272_s14 }
   0xf   : > { %s259_s17 = sshll.u32 %s7182_s16, 4  ;;  %s9711_s1 = sld [smem:[#allocation40_spill]]  ;;  %s7280_s17 = int_to_ptr.vmem [resolvable:$true] %s259_s17 }
  0x10   : > { %s9709_s12 = scalar_select %p7265_p3, 1, 0 }
  0x11   : > { %p6591_p5 = pneg %p7265_p3 }
  0x13   : > { %p7274_p6 = pnand %p6591_p5, %p9681_p1 }
  0x15   : > { %s6930_s20 = scalar_lea.hbm %s9711_s1, 2048  ;;  %p7290_p8 = pneg %p7274_p6 }
  0x16   : > { %p6931_p7 = scmp.ne.s32.totalorder %s9711_s1, %s6930_s20  ;;  %p6937_p11 = scmp.lt.u32.totalorder %s6930_s20, %s9711_s1 }
  0x18   : > { %p6933_p9 = pnand %p7290_p8, %p6931_p7 }
  0x1a   : > { %p6934_p10 = pneg %p6933_p9 }
  0x1c   : > { %p6939_p12 = pnand %p6937_p11, %p6934_p10 }
  0x1e   : > { %6942 = shalt.err (!%p6939_p12)
}
  0x1f   : > { %s6943_s26 = scalar_lea.vmem %s7263_s10, 2048  ;;  %p6951_p5 = scmp.lt.s32.totalorder %s7263_s10, %s7263_s10 }
  0x20   : > { %p6944_p13 = scmp.ne.s32.totalorder %s7263_s10, %s6943_s26  ;;  %p6952_p4 = scmp.lt.s32.totalorder %s6943_s26, %s6943_s26 }
  0x22   : > { %p6946_p0 = pnand %p6944_p13, %p7290_p8  ;;  %p6953_p7 = por %p6952_p4, %p6951_p5 }
  0x24   : > { %p6947_p2 = pneg %p6946_p0 }
  0x26   : > { %p6954_p9 = pnand %p6953_p7, %p6947_p2 }
  0x28   : > { %6957 = shalt.err (!%p6954_p9)
}
  0x29   : > { %s9683_s9 = smov 128   ;;  %s7184_s13 = smov 8  }
  0x2a   : > { %6594 = dma.hbm_to_vmem [thread:$0]  (!%p7274_p6), %s9711_s1, 2048, %s7263_s10, [#allocation7], %s9683_s9, %s9683_s9, %s7184_s13  }
  0x2b   : > { %s6958_s21 = scalar_lea.hbm %s9676_s4, 2048 }
  0x2c   : > { %p6959_p4 = scmp.ne.s32.totalorder %s9676_s4, %s6958_s21  ;;  %p6965_p12 = scmp.lt.u32.totalorder %s6958_s21, %s9676_s4 }
  0x2e   : > { %p6961_p10 = pnand %p6959_p4, %p7290_p8 }
  0x30   : > { %p6962_p11 = pneg %p6961_p10 }
  0x32   : > { %p6967_p13 = pnand %p6965_p12, %p6962_p11 }
  0x34   : > { %6970 = shalt.err (!%p6967_p13)
}
  0x35   : > { %s6971_s10 = scalar_lea.vmem %s7278_s14, 2048  ;;  %p6979_p7 = scmp.lt.s32.totalorder %s7278_s14, %s7278_s14 }
  0x36   : > { %p6972_p0 = scmp.ne.s32.totalorder %s7278_s14, %s6971_s10  ;;  %p6980_p9 = scmp.lt.s32.totalorder %s6971_s10, %s6971_s10 }
  0x38   : > { %p6974_p2 = pnand %p6972_p0, %p7290_p8  ;;  %p6981_p4 = por %p6980_p9, %p6979_p7 }
  0x3a   : > { %p6975_p5 = pneg %p6974_p2 }
  0x3c   : > { %p6982_p10 = pnand %p6981_p4, %p6975_p5 }
  0x3e   : > { %6985 = shalt.err (!%p6982_p10)
}
  0x3f   : > { %6600 = dma.hbm_to_vmem [thread:$0]  (!%p7274_p6), %s9676_s4, 2048, %s7278_s14, [#allocation10], %s9683_s9, %s9683_s9, %s7184_s13  }
  0x40   : > { %s6986_s21 = scalar_lea.hbm %s9675_s3, 2048 }
  0x41   : > { %p6987_p11 = scmp.ne.s32.totalorder %s9675_s3, %s6986_s21  ;;  %p6993_p0 = scmp.lt.u32.totalorder %s6986_s21, %s9675_s3 }
  0x43   : > { %p6989_p12 = pnand %p6987_p11, %p7290_p8 }
  0x45   : > { %p6990_p13 = pneg %p6989_p12 }
  0x47   : > { %p6995_p2 = pnand %p6993_p0, %p6990_p13 }
  0x49   : > { %6998 = shalt.err (!%p6995_p2)
}
  0x4a   : > { %s6999_s14 = scalar_lea.vmem %s7280_s17, 2048  ;;  %p7007_p4 = scmp.lt.s32.totalorder %s7280_s17, %s7280_s17 }
  0x4b   : > { %p7000_p5 = scmp.ne.s32.totalorder %s7280_s17, %s6999_s14  ;;  %p7008_p10 = scmp.lt.s32.totalorder %s6999_s14, %s6999_s14 }
  0x4d   : > { %p7002_p7 = pnand %p7000_p5, %p7290_p8  ;;  %p7009_p11 = por %p7008_p10, %p7007_p4 }
  0x4f   : > { %p7003_p9 = pneg %p7002_p7 }
  0x51   : > { %p7010_p12 = pnand %p7009_p11, %p7003_p9 }
  0x53   : > { %7013 = shalt.err (!%p7010_p12)
}
  0x54   : > { %6597 = dma.hbm_to_vmem [thread:$0]  (!%p7274_p6), %s9675_s3, 2048, %s7280_s17, [#allocation7], %s9683_s9, %s9683_s9, %s7184_s13  }
  0x55   : > { %s7185_s18 = smov [#allocation11]   ;;  %s7186_s20 = smov [#allocation12]  }
  0x56   : > { %s285_s19 = sshll.u32 %s7185_s18, 4  ;;  %s298_s21 = sshll.u32 %s7186_s20, 4  ;;  %s286_s19 = int_to_ptr.vmem [resolvable:$true] %s285_s19  ;;  %s299_s21 = int_to_ptr.vmem [resolvable:$true] %s298_s21 }
  0x57   : > { %s7014_s25 = scalar_lea.hbm %s9677_s5, 2048 }
  0x58   : > { %p7015_p13 = scmp.ne.s32.totalorder %s9677_s5, %s7014_s25  ;;  %p7021_p5 = scmp.lt.u32.totalorder %s7014_s25, %s9677_s5 }
  0x5a   : > { %p7017_p0 = pnand %p7015_p13, %p7290_p8 }
  0x5c   : > { %p7018_p2 = pneg %p7017_p0 }
  0x5e   : > { %p7023_p7 = pnand %p7021_p5, %p7018_p2 }
  0x60   : > { %7026 = shalt.err (!%p7023_p7)
}
  0x61   : > { %s7027_s17 = scalar_lea.vmem %s286_s19, 2048  ;;  %p7035_p11 = scmp.lt.s32.totalorder %s286_s19, %s286_s19 }
  0x62   : > { %p7028_p9 = scmp.ne.s32.totalorder %s286_s19, %s7027_s17  ;;  %p7036_p12 = scmp.lt.s32.totalorder %s7027_s17, %s7027_s17 }
  0x64   : > { %p7030_p4 = pnand %p7028_p9, %p7290_p8  ;;  %p7037_p1 = por %p7036_p12, %p7035_p11 }
  0x66   : > { %p7031_p10 = pneg %p7030_p4 }
  0x68   : > { %p7038_p3 = pnand %p7037_p1, %p7031_p10 }
  0x6a   : > { %7041 = shalt.err (!%p7038_p3)
}
  0x6b   : > { %6603 = dma.hbm_to_vmem [thread:$0]  (!%p7274_p6), %s9677_s5, 2048, %s286_s19, [#allocation10], %s9683_s9, %s9683_s9, %s7184_s13  }
  0x6c   : > { %s7042_s22 = scalar_lea.hbm %s9678_s6, 2048 }
  0x6d   : > { %p7043_p1 = scmp.ne.s32.totalorder %s9678_s6, %s7042_s22  ;;  %p7049_p0 = scmp.lt.u32.totalorder %s7042_s22, %s9678_s6 }
  0x6f   : > { %p7045_p3 = pnand %p7043_p1, %p7290_p8 }
  0x71   : > { %p7046_p13 = pneg %p7045_p3 }
  0x73   : > { %p7051_p2 = pnand %p7049_p0, %p7046_p13 }
  0x75   : > { %7054 = shalt.err (!%p7051_p2)
}
  0x76   : > { %s7055_s10 = scalar_lea.vmem %s299_s21, 2048  ;;  %p7063_p4 = scmp.lt.s32.totalorder %s299_s21, %s299_s21 }
  0x77   : > { %p7056_p5 = scmp.ne.s32.totalorder %s299_s21, %s7055_s10  ;;  %p7064_p10 = scmp.lt.s32.totalorder %s7055_s10, %s7055_s10 }
  0x79   : > { %p7058_p7 = pnand %p7056_p5, %p7290_p8  ;;  %p7065_p11 = por %p7064_p10, %p7063_p4 }
  0x7b   : > { %p7059_p9 = pneg %p7058_p7 }
  0x7d   : > { %p7066_p12 = pnand %p7065_p11, %p7059_p9 }
  0x7f   : > { %7069 = shalt.err (!%p7066_p12)
}
  0x80   : > { %6606 = dma.hbm_to_vmem [thread:$0]  (!%p7274_p6), %s9678_s6, 2048, %s299_s21, [#allocation13], %s9683_s9, %s9683_s9, %s7184_s13  }
  0x81   : > { %s5627_s15 = sadd.s32 4294967294, %s7178_s30   ;;  %s7410_s23 = sadd.s32 1, %s7178_s30  }
  0x82   : > { %s34_s1 = sadd.s32 1, %s7174_s29  ;;  %s31_s16 = ssub.s32 %s7178_s30, %s7410_s23 }
  0x83   : > { %p41_p8 = scmp.ne.s32.totalorder %s7174_s29, %s7170_s28  ;;  %p32_p1 = scmp.eq.s32.totalorder %s31_s16, 0 }
  0x84   : > { %p42_p3 = scmp.eq.s32.totalorder %s7178_s30, 0  ;;  %p47_p13 = scmp.ne.s32.totalorder %s7170_s28, %s7166_s27 }
  0x85   : > { %p218_p0 = scmp.eq.s32.totalorder %s7258_s11, 1  ;;  %p9713_p5 = scmp.eq.s32.totalorder %s7258_s11, 0 }
  0x86   : > { %s7422_s18 = scalar_select %p32_p1, %s7174_s29, %s34_s1  }
  0x87   : > { %p43_p2 = por %p42_p3, %p41_p8  ;;  %p7426_p7 = por %p9713_p5, %p47_p13 }
  0x88   : > { %p7430_p6 = por %p218_p0, %p41_p8  ;;  %p224_p9 = scmp.eq.s32.totalorder %s5627_s15, 1 }
  0x89   : > { %p6620_p4 = scmp.lt.s32.totalorder %s7178_s30, 2  ;;  %s315_s22 = sand.u32 1, %s7174_s29  }
  0x8a   : > { %s9715_s21 = scalar_select %p7430_p6, 1, 0 }
  0x8b   : > { %p7436_p10 = por %p224_p9, %p47_p13  ;;  %s5635_s25 = sshll.u32 %s315_s22, 8 }
  0x8c   : > { %s5653_s26 = sshll.u32 %s7178_s30, 12  ;;  %s319_s17 = scalar_lea.vmem [#allocation3], %s5635_s25 }
  0x8d   : > { %s9716_s24 = scalar_select %p7436_p10, 1, 0 }
  0x8e   : > { %s7444_s19 = scalar_lea.hbm %s9672_s0, %s5653_s26  ;;  %s326_s1 = sshll.u32 %s319_s17, 4  ;;  %s7450_s1 = int_to_ptr.vmem [resolvable:$true] %s326_s1 }
  0x8f   : > { %p7446_p11 = pnand %p6620_p4, %p43_p2  ;;  %s7452_s16 = scalar_lea.sflag [#allocation4], %s315_s22 }
  0x90   : > { %s7070_s9 = scalar_lea.hbm %s7444_s19, 4096  ;;  %s7075_s14 = scalar_lea.hbm %s9672_s0, 8192 }
  0x91   : > { %p7071_p12 = scmp.ne.s32.totalorder %s7444_s19, %s7070_s9  ;;  %p7072_p8 = pneg %p7446_p11 }
  0x92   : > { %p7076_p13 = scmp.lt.u32.totalorder %s7444_s19, %s9672_s0  ;;  %p7077_p0 = scmp.lt.u32.totalorder %s7075_s14, %s7070_s9 }
  0x93   : > { %p7073_p1 = pnand %p7072_p8, %p7071_p12  ;;  %p7079_p5 = scmp.lt.u32.totalorder %s7070_s9, %s7444_s19 }
  0x94   : > { %p7078_p2 = por %p7077_p0, %p7076_p13 }
  0x95   : > { %p7074_p3 = pneg %p7073_p1 }
  0x96   : > { %p7080_p9 = por %p7079_p5, %p7078_p2 }
  0x98   : > { %p7081_p4 = pnand %p7080_p9, %p7074_p3 }
  0x9a   : > { %7084 = shalt.err (!%p7081_p4)
}
  0x9b   : > { %s7085_s22 = scalar_lea.vmem %s7450_s1, 4096  ;;  %s7187_s25 = smov [#allocation3]  }
  0x9c   : > { %p7086_p12 = scmp.ne.s32.totalorder %s7450_s1, %s7085_s22  ;;  %s7090_s26 = sshll.u32 %s7187_s25, 4  ;;  %s7091_s26 = int_to_ptr.vmem [resolvable:$false] %s7090_s26 }
  0x9d   : > { %s7092_s10 = scalar_lea.vmem %s7091_s26, 8192  ;;  %p7093_p6 = scmp.lt.s32.totalorder %s7450_s1, %s7091_s26 }
  0x9e   : > { %p7088_p1 = pnand %p7086_p12, %p7072_p8  ;;  %p7094_p13 = scmp.lt.s32.totalorder %s7092_s10, %s7085_s22 }
  0xa0   : > { %p7089_p10 = pneg %p7088_p1  ;;  %p7095_p0 = por %p7094_p13, %p7093_p6 }
  0xa2   : > { %p7096_p2 = pnand %p7095_p0, %p7089_p10 }
  0xa4   : > { %7099 = shalt.err (!%p7096_p2)
}
  0xa5   : > { %s9718_s9 = smov 128   ;;  %p9719_p8 = scmp.ne.s32.totalorder %s9709_s12, 0 }
  0xa6   : > { %6610 = dma.hbm_to_vmem [thread:$0]  (!%p7446_p11), %s7444_s19, 4096, %s7450_s1, %s7452_s16, %s9718_s9, %s9718_s9, %s7184_s13  }
  0xa7   : > { %338 = sbr.rel (%p9719_p8) target bundleno = 1260 (0x4ec), region = 52 }
  0xae   : > { %s7486_s14 = sand.u32 1, %s7170_s28  }
  0xaf   : > { %s5639_s17 = sshll.u32 %s7486_s14, 8  ;;  %s341_s22 = scalar_lea.sflag [#allocation4], %s7486_s14 }
  0xb0   : > { %s7492_s15 = scalar_lea.vmem [#allocation3], %s5639_s17 }
  0xb1   : > { %7145 = dma.done.wait (%p7426_p7), %s341_s22, 4096  }
  0xb2   : > { %7147 = vsyncadd (%p7426_p7), %s341_s22, 4294963200  ;;  %p9720_p6 = scmp.eq.s32.totalorder %s7258_s11, 0 }
  0xb4   : > { %7149 = dma.done.wait (%p9720_p6), [#allocation7], 4096   ;;  %p9721_p10 = pmov %p9720_p6 }
  0xb5   : > { %p9722_p11 = pmov %p9720_p6 }
  0xb6   : > { %7151 = vsyncadd (%p9721_p10), [#allocation7], 4294963200 }
  0xb7   : > { %7153 = dma.done.wait (%p9722_p11), [#allocation10], 4096   ;;  %p9723_p3 = pmov %p9720_p6 }
  0xb9   : > { %7155 = vsyncadd (%p9723_p3), [#allocation10], 4294963200  ;;  %p9724_p5 = pmov %p9723_p3 }
  0xba   : > { %p9725_p9 = pmov %p9723_p3 }
  0xbb   : > { %7157 = dma.done.wait (%p9724_p5), [#allocation13], 2048  }
  0xbc   : > { %7159 = vsyncadd (%p9725_p9), [#allocation13], 4294965248  ;;  %v429_v0 = vld [vmem:[#allocation6] sm:$0xff]  ;;  %v430_v1 = vld [vmem:[#allocation6 + $0x8] sm:$0xff]  ;;  %v7188_v56 = vmov -inf   ;;  %vm1461_vm0 = vcmask 1046528  }
  0xbd   : > { %v431_v2 = vld [vmem:[#allocation6 + $0x10] sm:$0xff]  ;;  %v6295_v3 = vpack.c.bf16 %v430_v1, %v429_v0  ;;  %v432_v4 = vld [vmem:[#allocation6 + $0x18] sm:$0xff]  ;;  %v433_v6 = vld [vmem:[#allocation6 + $0x20] sm:$0xff]  ;;  %876 = vst [vmem:[#allocation2 + $0x38] sm:$0xff] %v7188_v56  ;;  %vm1606_vm1 = vcmask 1045504   ;;  %vm1751_vm2 = vcmask 1044480  }
  0xbe   : > { %v6299_v5 = vpack.c.bf16 %v432_v4, %v431_v2  ;;  %v434_v7 = vld [vmem:[#allocation6 + $0x28] sm:$0xff]  ;;  %v397_v9 = vld [vmem:[%s7492_s15] sm:$0xff]  ;;  %v435_v10 = vld [vmem:[#allocation6 + $0x30] sm:$0xff]  ;;  %877 = vst [vmem:[#allocation2 + $0x40] sm:$0xf] %v7188_v56  ;;  %vm1896_vm3 = vcmask 1043456  }
  0xbf   : > { %6296 = vmatprep.subr.bf16.mxu0 %v6295_v3  ;;  %v6303_v8 = vpack.c.bf16 %v434_v7, %v433_v6  ;;  %v436_v11 = vld [vmem:[#allocation6 + $0x38] sm:$0xff]  ;;  %5927 = vmatprep.mubr.f32.mxu0 %v397_v9  ;;  %v437_v13 = vld [vmem:[#allocation6 + $0x40] sm:$0xff]  ;;  %v438_v14 = vld [vmem:[#allocation6 + $0x48] sm:$0xff]  ;;  %869 = vst [vmem:[#allocation2] sm:$0xff] %v7188_v56  ;;  %s9452_s1 = scalar_lea.vmem [#allocation14], %s5639_s17  ;;  %s5654_s16 = sshll.u32 %s7258_s11, 12 }
  0xc0   : > { %6298 = vmatpush3.bf16.msra.mxu0 %v6295_v3  ;;  %v6307_v12 = vpack.c.bf16 %v436_v11, %v435_v10  ;;  %v6311_v15 = vpack.c.bf16 %v438_v14, %v437_v13  ;;  %v439_v16 = vld [vmem:[#allocation6 + $0x50] sm:$0xff]  ;;  %v440_v17 = vld [vmem:[#allocation6 + $0x58] sm:$0xff]  ;;  %v441_v19 = vld [vmem:[#allocation6 + $0x60] sm:$0xff]  ;;  %871 = vst [vmem:[#allocation2 + $0x10] sm:$0xf] %v7188_v56  ;;  %s5506_s25 = sshll.u32 %s9452_s1, 4  ;;  %s9624_s9 = scalar_lea.hbm %s9680_s8, %s5654_s16  ;;  %s9626_s25 = int_to_ptr.vmem [resolvable:$true] %s5506_s25 }
  0xc1   : > { %6300 = vmatprep.subr.bf16.mxu0 %v6299_v5  ;;  %v6315_v18 = vpack.c.bf16 %v440_v17, %v439_v16  ;;  %v442_v20 = vld [vmem:[#allocation6 + $0x68] sm:$0xff]  ;;  %v443_v22 = vld [vmem:[#allocation6 + $0x70] sm:$0xff]  ;;  %v444_v23 = vld [vmem:[#allocation6 + $0x78] sm:$0xff]  ;;  %874 = vst [vmem:[#allocation2 + $0x28] sm:$0xf] %v7188_v56  ;;  %s5493_s17 = scalar_lea.sflag [#allocation5], %s7486_s14 }
  0xc2   : > { %v6319_v21 = vpack.c.bf16 %v442_v20, %v441_v19  ;;  %v6323_v24 = vpack.c.bf16 %v444_v23, %v443_v22  ;;  %v398_v25 = vld [vmem:[%s7492_s15 + $0x8] sm:$0xff]  ;;  %v399_v26 = vld [vmem:[%s7492_s15 + $0x10] sm:$0xff]  ;;  %v400_v27 = vld [vmem:[%s7492_s15 + $0x18] sm:$0xff]  ;;  %875 = vst [vmem:[#allocation2 + $0x30] sm:$0xff] %v7188_v56  ;;  %s7100_s22 = scalar_lea.vmem %s9626_s25, 4096  ;;  %p9770_p4 = scmp.ne.s32.totalorder %s9715_s21, 0 }
  0xc3   : > { %v401_v28 = vld [vmem:[%s7492_s15 + $0x20] sm:$0xff]  ;;  %v402_v29 = vld [vmem:[%s7492_s15 + $0x28] sm:$0xff]  ;;  %v403_v30 = vld [vmem:[%s7492_s15 + $0x30] sm:$0xff]  ;;  %878 = vst [vmem:[#allocation2 + $0x48] sm:$0xff] %v7188_v56  ;;  %p7101_p7 = scmp.ne.s32.totalorder %s9626_s25, %s7100_s22  ;;  %s7189_s11 = smov [#allocation14]  }
  0xc4   : > { %6302 = vmatpush3.bf16.msra.mxu0 %v6299_v5  ;;  %v404_v31 = vld [vmem:[%s7492_s15 + $0x38] sm:$0xff]  ;;  %v405_v32 = vld [vmem:[%s7492_s15 + $0x40] sm:$0xff]  ;;  %v406_v33 = vld [vmem:[%s7492_s15 + $0x48] sm:$0xff]  ;;  %879 = vst [vmem:[#allocation2 + $0x50] sm:$0xff] %v7188_v56 }
  0xc5   : > { %6304 = vmatprep.subr.bf16.mxu0 %v6303_v8  ;;  %v407_v34 = vld [vmem:[%s7492_s15 + $0x50] sm:$0xff]  ;;  %v408_v35 = vld [vmem:[%s7492_s15 + $0x58] sm:$0xff]  ;;  %v409_v36 = vld [vmem:[%s7492_s15 + $0x60] sm:$0xff]  ;;  %880 = vst [vmem:[#allocation2 + $0x58] sm:$0xf] %v7188_v56  ;;  %p7102_p12 = pnand %p7101_p7, %p9770_p4 }
  0xc6   : > { %v410_v37 = vld [vmem:[%s7492_s15 + $0x68] sm:$0xff]  ;;  %v411_v38 = vld [vmem:[%s7492_s15 + $0x70] sm:$0xff]  ;;  %v412_v39 = vld [vmem:[%s7492_s15 + $0x78] sm:$0xff]  ;;  %881 = vst [vmem:[#allocation2 + $0x60] sm:$0xff] %v7188_v56 }
  0xc7   : > { %v413_v40 = vld [vmem:[%s7492_s15 + $0x80] sm:$0xff]  ;;  %v414_v41 = vld [vmem:[%s7492_s15 + $0x88] sm:$0xff]  ;;  %v415_v42 = vld [vmem:[%s7492_s15 + $0x90] sm:$0xff]  ;;  %882 = vst [vmem:[#allocation2 + $0x68] sm:$0xff] %v7188_v56  ;;  %p7103_p1 = pneg %p7102_p12 }
  0xc8   : > { %6306 = vmatpush3.bf16.msra.mxu0 %v6303_v8  ;;  %v416_v43 = vld [vmem:[%s7492_s15 + $0x98] sm:$0xff]  ;;  %v417_v44 = vld [vmem:[%s7492_s15 + $0xa0] sm:$0xff]  ;;  %v418_v45 = vld [vmem:[%s7492_s15 + $0xa8] sm:$0xff]  ;;  %883 = vst [vmem:[#allocation2 + $0x70] sm:$0xf] %v7188_v56 }
  0xc9   : > { %6308 = vmatprep.subr.bf16.mxu0 %v6307_v12  ;;  %v419_v46 = vld [vmem:[%s7492_s15 + $0xb0] sm:$0xff]  ;;  %v420_v47 = vld [vmem:[%s7492_s15 + $0xb8] sm:$0xff]  ;;  %v421_v48 = vld [vmem:[%s7492_s15 + $0xc0] sm:$0xff]  ;;  %884 = vst [vmem:[#allocation2 + $0x78] sm:$0xff] %v7188_v56 }
  0xca   : > { %v422_v49 = vld [vmem:[%s7492_s15 + $0xc8] sm:$0xff]  ;;  %v423_v50 = vld [vmem:[%s7492_s15 + $0xd0] sm:$0xff]  ;;  %v424_v51 = vld [vmem:[%s7492_s15 + $0xd8] sm:$0xff]  ;;  %885 = vst [vmem:[#allocation2 + $0x80] sm:$0xff] %v7188_v56 }
  0xcb   : > { %v425_v52 = vld [vmem:[%s7492_s15 + $0xe0] sm:$0xff]  ;;  %v426_v53 = vld [vmem:[%s7492_s15 + $0xe8] sm:$0xff]  ;;  %v427_v54 = vld [vmem:[%s7492_s15 + $0xf0] sm:$0xff]  ;;  %886 = vst [vmem:[#allocation2 + $0x88] sm:$0xf] %v7188_v56 }
  0xcc   : > { %6310 = vmatpush3.bf16.msra.mxu0 %v6307_v12  ;;  %v428_v55 = vld [vmem:[%s7492_s15 + $0xf8] sm:$0xff]  ;;  %887 = vst [vmem:[#allocation2 + $0x90] sm:$0xff] %v7188_v56  ;;  %888 = vst [vmem:[#allocation2 + $0x98] sm:$0xff] %v7188_v56  ;;  %v2041_v57 = vld [vmem:[#allocation9] sm:$0xff]  ;;  %s7104_s15 = sshll.u32 %s7189_s11, 4  ;;  %s7105_s15 = int_to_ptr.vmem [resolvable:$false] %s7104_s15 }
  0xcd   : > { %6312 = vmatprep.subr.bf16.mxu0 %v6311_v15  ;;  %889 = vst [vmem:[#allocation2 + $0xa0] sm:$0xf] %v7188_v56  ;;  %890 = vst [vmem:[#allocation2 + $0xa8] sm:$0xff] %v7188_v56  ;;  %v2042_v58 = vld [vmem:[#allocation9 + $0x8] sm:$0xff]  ;;  %v929_v60 = vld [vmem:[#allocation8] sm:$0xff]  ;;  %s7106_s12 = scalar_lea.vmem %s7105_s15, 8192  ;;  %p7107_p13 = scmp.lt.s32.totalorder %s9626_s25, %s7105_s15 }
  0xce   : > { %891 = vst [vmem:[#allocation2 + $0xb0] sm:$0xff] %v7188_v56  ;;  %892 = vst [vmem:[#allocation2 + $0xb8] sm:$0xf] %v7188_v56  ;;  %v6327_v59 = vpack.c.bf16 %v2042_v58, %v2041_v57  ;;  %v930_v61 = vld [vmem:[#allocation8 + $0x8] sm:$0xff]  ;;  %v2043_v63 = vld [vmem:[#allocation9 + $0x10] sm:$0xff]  ;;  %p7108_p0 = scmp.lt.s32.totalorder %s7106_s12, %s7100_s22 }
  0xcf   : > { %893 = vst [vmem:[#allocation2 + $0xc0] sm:$0xff] %v7188_v56  ;;  %894 = vst [vmem:[#allocation2 + $0xc8] sm:$0xff] %v7188_v56  ;;  %v7542_v62 = vpack.c.bf16 %v930_v61, %v929_v60  ;;  %v2044_v0 = vld [vmem:[#allocation9 + $0x18] sm:$0xff]  ;;  %v931_v2 = vld [vmem:[#allocation8 + $0x10] sm:$0xff] }
  0xd0   : > { %6314 = vmatpush3.bf16.msra.mxu0 %v6311_v15  ;;  %895 = vst [vmem:[#allocation2 + $0xd0] sm:$0xf] %v7188_v56  ;;  %896 = vst [vmem:[#allocation2 + $0xd8] sm:$0xff] %v7188_v56  ;;  %v6331_v1 = vpack.c.bf16 %v2044_v0, %v2043_v63  ;;  %v932_v3 = vld [vmem:[#allocation8 + $0x18] sm:$0xff]  ;;  %v2045_v5 = vld [vmem:[#allocation9 + $0x20] sm:$0xff]  ;;  %p7109_p2 = por %p7108_p0, %p7107_p13 }
  0xd1   : > { %6316 = vmatprep.subr.bf16.mxu0 %v6315_v18  ;;  %897 = vst [vmem:[#allocation2 + $0xe0] sm:$0xff] %v7188_v56  ;;  %898 = vst [vmem:[#allocation2 + $0xe8] sm:$0xf] %v7188_v56  ;;  %6455 = vmatprep.subr.bf16.mxu1 %v7542_v62  ;;  %v7546_v4 = vpack.c.bf16 %v932_v3, %v931_v2  ;;  %v2046_v6 = vld [vmem:[#allocation9 + $0x28] sm:$0xff]  ;;  %v933_v8 = vld [vmem:[#allocation8 + $0x20] sm:$0xff] }
  0xd2   : > { %899 = vst [vmem:[#allocation2 + $0xf0] sm:$0xff] %v7188_v56  ;;  %900 = vst [vmem:[#allocation2 + $0xf8] sm:$0xff] %v7188_v56  ;;  %6463 = vmatpush3.bf16.msra.mxu1 %v7542_v62  ;;  %v6335_v7 = vpack.c.bf16 %v2046_v6, %v2045_v5  ;;  %v934_v9 = vld [vmem:[#allocation8 + $0x28] sm:$0xff]  ;;  %v2047_v11 = vld [vmem:[#allocation9 + $0x30] sm:$0xff]  ;;  %p7110_p8 = pnand %p7109_p2, %p7103_p1 }
  0xd3   : > { %901 = vst [vmem:[#allocation2 + $0x100] sm:$0xf] %v7188_v56  ;;  %902 = vst [vmem:[#allocation2 + $0x108] sm:$0xff] %v7188_v56  ;;  %6456 = vmatprep.subr.bf16.mxu1 %v7546_v4  ;;  %v7550_v10 = vpack.c.bf16 %v934_v9, %v933_v8  ;;  %v2048_v12 = vld [vmem:[#allocation9 + $0x38] sm:$0xff]  ;;  %v935_v14 = vld [vmem:[#allocation8 + $0x30] sm:$0xff] }
  0xd4   : > { %6318 = vmatpush3.bf16.msra.mxu0 %v6315_v18  ;;  %903 = vst [vmem:[#allocation2 + $0x110] sm:$0xff] %v7188_v56  ;;  %904 = vst [vmem:[#allocation2 + $0x118] sm:$0xf] %v7188_v56  ;;  %v6339_v13 = vpack.c.bf16 %v2048_v12, %v2047_v11  ;;  %v936_v15 = vld [vmem:[#allocation8 + $0x38] sm:$0xff]  ;;  %v2049_v17 = vld [vmem:[#allocation9 + $0x40] sm:$0xff] }
  0xd5   : > { %6320 = vmatprep.subr.bf16.mxu0 %v6319_v21  ;;  %905 = vst [vmem:[#allocation2 + $0x120] sm:$0xff] %v7188_v56  ;;  %906 = vst [vmem:[#allocation2 + $0x128] sm:$0xff] %v7188_v56  ;;  %v7554_v16 = vpack.c.bf16 %v936_v15, %v935_v14  ;;  %v2050_v18 = vld [vmem:[#allocation9 + $0x48] sm:$0xff]  ;;  %v937_v20 = vld [vmem:[#allocation8 + $0x40] sm:$0xff] }
  0xd6   : > { %907 = vst [vmem:[#allocation2 + $0x130] sm:$0xf] %v7188_v56  ;;  %908 = vst [vmem:[#allocation2 + $0x138] sm:$0xff] %v7188_v56  ;;  %6464 = vmatpush3.bf16.msra.mxu1 %v7546_v4  ;;  %v6343_v19 = vpack.c.bf16 %v2050_v18, %v2049_v17  ;;  %v2051_v23 = vld [vmem:[#allocation9 + $0x50] sm:$0xff] }
  0xd7   : > { %909 = vst [vmem:[#allocation2 + $0x140] sm:$0xff] %v7188_v56  ;;  %910 = vst [vmem:[#allocation2 + $0x148] sm:$0xf] %v7188_v56  ;;  %6457 = vmatprep.subr.bf16.mxu1 %v7550_v10 }
  0xd8   : > { %6322 = vmatpush3.bf16.msra.mxu0 %v6319_v21  ;;  %911 = vst [vmem:[#allocation2 + $0x150] sm:$0xff] %v7188_v56  ;;  %912 = vst [vmem:[#allocation2 + $0x158] sm:$0xff] %v7188_v56  ;;  %v938_v21 = vld [vmem:[#allocation8 + $0x48] sm:$0xff] }
  0xd9   : > { %6324 = vmatprep.subr.bf16.mxu0 %v6323_v24  ;;  %913 = vst [vmem:[#allocation2 + $0x160] sm:$0xf] %v7188_v56  ;;  %914 = vst [vmem:[#allocation2 + $0x168] sm:$0xff] %v7188_v56  ;;  %v7558_v22 = vpack.c.bf16 %v938_v21, %v937_v20 }
  0xda   : > { %915 = vst [vmem:[#allocation2 + $0x170] sm:$0xff] %v7188_v56  ;;  %916 = vst [vmem:[#allocation2 + $0x178] sm:$0xf] %v7188_v56  ;;  %6465 = vmatpush3.bf16.msra.mxu1 %v7550_v10 }
  0xdb   : > { %917 = vst [vmem:[#allocation2 + $0x180] sm:$0xff] %v7188_v56  ;;  %918 = vst [vmem:[#allocation2 + $0x188] sm:$0xff] %v7188_v56  ;;  %6458 = vmatprep.subr.bf16.mxu1 %v7554_v16 }
  0xdc   : > { %6326 = vmatpush3.bf16.msra.mxu0 %v6323_v24  ;;  %919 = vst [vmem:[#allocation2 + $0x190] sm:$0xf] %v7188_v56  ;;  %920 = vst [vmem:[#allocation2 + $0x198] sm:$0xff] %v7188_v56  ;;  %v2052_v24 = vld [vmem:[#allocation9 + $0x58] sm:$0xff] }
  0xdd   : > { %921 = vst [vmem:[#allocation2 + $0x1a0] sm:$0xff] %v7188_v56  ;;  %922 = vst [vmem:[#allocation2 + $0x1a8] sm:$0xf] %v7188_v56  ;;  %6328 = vmatprep.subr.bf16.mxu0 %v6327_v59 }
  0xde   : > { %925 = vst [vmem:[#allocation2 + $0x1c0] sm:$0xf] %v7188_v56  ;;  %928 = vst [vmem:[#allocation2 + $0x1d8] sm:$0xf] %v7188_v56  ;;  %6466 = vmatpush3.bf16.msra.mxu1 %v7554_v16 }
  0xdf   : > { %5928 = vmatmul.mubr.f32.vlgmr.msra.gmra.mrb[0].mxu0 %v398_v25  ;;  %v6347_v25 = vpack.c.bf16 %v2052_v24, %v2051_v23  ;;  %6459 = vmatprep.subr.bf16.mxu1 %v7558_v22 }
  0xe0   : > { %5930 = vmatprep.mubr.f32.mxu0 %v399_v26  ;;  %6330 = vmatpush3.bf16.msra.mxu0 %v6327_v59  ;;  %v939_v26 = vld [vmem:[#allocation8 + $0x50] sm:$0xff] }
  0xe1   : > { %6332 = vmatprep.subr.bf16.mxu0 %v6331_v1 }
  0xe2   : > { %6467 = vmatpush3.bf16.msra.mxu1 %v7558_v22 }
  0xe3   : > { %5931 = vmatmul.mubr.f32.gmra.mrb[2].mxu0 %v400_v27  ;;  %v940_v27 = vld [vmem:[#allocation8 + $0x58] sm:$0xff] }
  0xe4   : > { %5933 = vmatprep.mubr.f32.mxu0 %v401_v28  ;;  %6334 = vmatpush3.bf16.msra.mxu0 %v6331_v1  ;;  %v7562_v28 = vpack.c.bf16 %v940_v27, %v939_v26 }
  0xe5   : > { %6336 = vmatprep.subr.bf16.mxu0 %v6335_v7 }
  0xe6   : > { %6460 = vmatprep.subr.bf16.mxu1 %v7562_v28 }
  0xe7   : > { %5934 = vmatmul.mubr.f32.gmra.mrb[4].mxu0 %v402_v29  ;;  %v2053_v29 = vld [vmem:[#allocation9 + $0x60] sm:$0xff]  ;;  %6468 = vmatpush3.bf16.msra.mxu1 %v7562_v28 }
  0xe8   : > { %5936 = vmatprep.mubr.f32.mxu0 %v403_v30  ;;  %6338 = vmatpush3.bf16.msra.mxu0 %v6335_v7  ;;  %v2054_v30 = vld [vmem:[#allocation9 + $0x68] sm:$0xff] }
  0xe9   : > { %6340 = vmatprep.subr.bf16.mxu0 %v6339_v13 }
  0xeb   : > { %5937 = vmatmul.mubr.f32.gmra.mrb[6].mxu0 %v404_v31  ;;  %v6351_v31 = vpack.c.bf16 %v2054_v30, %v2053_v29 }
  0xec   : > { %5939 = vmatprep.mubr.f32.mxu0 %v405_v32  ;;  %6342 = vmatpush3.bf16.msra.mxu0 %v6339_v13  ;;  %v941_v32 = vld [vmem:[#allocation8 + $0x60] sm:$0xff] }
  0xed   : > { %6344 = vmatprep.subr.bf16.mxu0 %v6343_v19 }
  0xef   : > { %5940 = vmatmul.mubr.f32.gmra.mrb[8].mxu0 %v406_v33  ;;  %v942_v33 = vld [vmem:[#allocation8 + $0x68] sm:$0xff] }
  0xf0   : > { %5942 = vmatprep.mubr.f32.mxu0 %v407_v34  ;;  %6346 = vmatpush3.bf16.msra.mxu0 %v6343_v19  ;;  %v7566_v34 = vpack.c.bf16 %v942_v33, %v941_v32 }
  0xf1   : > { %6348 = vmatprep.subr.bf16.mxu0 %v6347_v25 }
  0xf2   : > { %9726 = vst [vmem:[#allocation20_spill] sm:$0xff] %v7566_v34  ;;  %6461 = vmatprep.subr.bf16.mxu1 %v7566_v34 }
  0xf3   : > { %5943 = vmatmul.mubr.f32.gmra.mrb[10].mxu0 %v408_v35  ;;  %v2055_v35 = vld [vmem:[#allocation9 + $0x70] sm:$0xff]  ;;  %6469 = vmatpush3.bf16.msra.mxu1 %v7566_v34 }
  0xf4   : > { %5945 = vmatprep.mubr.f32.mxu0 %v409_v36  ;;  %6350 = vmatpush3.bf16.msra.mxu0 %v6347_v25  ;;  %v2056_v36 = vld [vmem:[#allocation9 + $0x78] sm:$0xff] }
  0xf5   : > { %6352 = vmatprep.subr.bf16.mxu0 %v6351_v31 }
  0xf7   : > { %5946 = vmatmul.mubr.f32.gmra.mrb[12].mxu0 %v410_v37  ;;  %v6355_v37 = vpack.c.bf16 %v2056_v36, %v2055_v35 }
  0xf8   : > { %5948 = vmatprep.mubr.f32.mxu0 %v411_v38  ;;  %6354 = vmatpush3.bf16.msra.mxu0 %v6351_v31  ;;  %v943_v38 = vld [vmem:[#allocation8 + $0x70] sm:$0xff] }
  0xf9   : > { %6356 = vmatprep.subr.bf16.mxu0 %v6355_v37 }
  0xfb   : > { %5949 = vmatmul.mubr.f32.gmra.mrb[14].mxu0 %v412_v39  ;;  %v944_v39 = vld [vmem:[#allocation8 + $0x78] sm:$0xff] }
  0xfc   : > { %5951 = vmatprep.mubr.f32.mxu0 %v413_v40  ;;  %6358 = vmatpush3.bf16.msra.mxu0 %v6355_v37  ;;  %v7570_v40 = vpack.c.bf16 %v944_v39, %v943_v38 }
  0xfd   : > { %6360 = vmatprep.subr.bf16.mxu0 %v7542_v62 }
  0xfe   : > { %9727 = vst [vmem:[#allocation21_spill] sm:$0xff] %v7570_v40  ;;  %6462 = vmatprep.subr.bf16.mxu1 %v7570_v40 }
  0xff   : > { %5952 = vmatmul.mubr.f32.gmra.mrb[16].mxu0 %v414_v41  ;;  %6470 = vmatpush3.bf16.msra.mxu1 %v7570_v40  ;;  %v3595_v41 = vld [vmem:[#allocation11] sm:$0xff] }
 0x100   : > { %5954 = vmatprep.mubr.f32.mxu0 %v415_v42  ;;  %v3596_v42 = vld [vmem:[#allocation11 + $0x8] sm:$0xff] }
 0x103   : > { %5955 = vmatmul.mubr.f32.gmra.mrb[18].mxu0 %v416_v43  ;;  %v7575_v43 = vpack.c.bf16 %v3596_v42, %v3595_v41 }
 0x104   : > { %5957 = vmatprep.mubr.f32.mxu0 %v417_v44  ;;  %v7581_v44 = vld [vmem:[%s9674_s2] ss:$0 sm:$0xff] }
 0x105   : > { %6392 = vmatprep.subr.bf16.mxu1 %v7575_v43 }
 0x107   : > { %5958 = vmatmul.mubr.f32.gmra.mrb[20].mxu0 %v418_v45 }
 0x108   : > { %5960 = vmatprep.mubr.f32.mxu0 %v419_v46 }
 0x10b   : > { %5961 = vmatmul.mubr.f32.gmra.mrb[22].mxu0 %v420_v47 }
 0x10c   : > { %5963 = vmatprep.mubr.f32.mxu0 %v421_v48 }
 0x10f   : > { %5964 = vmatmul.mubr.f32.gmra.mrb[24].mxu0 %v422_v49 }
 0x110   : > { %5966 = vmatprep.mubr.f32.mxu0 %v423_v50 }
 0x113   : > { %5967 = vmatmul.mubr.f32.gmra.mrb[26].mxu0 %v424_v51 }
 0x114   : > { %5969 = vmatprep.mubr.f32.mxu0 %v425_v52 }
 0x117   : > { %5970 = vmatmul.mubr.f32.gmra.mrb[28].mxu0 %v426_v53 }
 0x118   : > { %5972 = vmatprep.mubr.f32.mxu0 %v427_v54 }
 0x11b   : > { %5973 = vmatmul.mubr.f32.gmra.mrb[30].mxu0 %v428_v55 }
 0x1b2   : > { %v5929_v45 = vpop.f32.mrb[0].mxu0 }
 0x1b3   : > { %v7584_v46 = vadd.f32 %v5929_v45, %v7581_v44  ;;  %v518_v47 = vpop.f32.mrb[1].mxu0 }
 0x1b4   : > { %v7587_v48 = vadd.f32 %v7581_v44, %v518_v47  ;;  %v7631_v47 = vld [vmem:[#allocation2 + $0x10] sm:$0xf] }
 0x1b5   : > { %v678_v49 = vsub.f32 0.0, %v7584_v46 }
 0x1b6   : > { %v677_v50 = vsub.f32 0.0, %v7587_v48  ;;  %v5932_v51 = vpop.f32.mrb[2].mxu0 }
 0x1b7   : > { %v711_v52 = vmul.f32 1.442695, %v678_v49  ;;  %v7592_v53 = vadd.f32 %v5932_v51, %v7581_v44  ;;  %v528_v54 = vpop.f32.mrb[3].mxu0  ;;  %v7633_v49 = vld [vmem:[#allocation2 + $0x28] sm:$0xf] }
 0x1b8   : > { %v709_v55 = vmul.f32 1.442695, %v677_v50  ;;  %v7595_v56 = vadd.f32 %v7581_v44, %v528_v54 }
 0x1b9   : > { %6669 = vpow2.f32 %v711_v52  ;;  %v680_v57 = vsub.f32 0.0, %v7592_v53 }
 0x1ba   : > { %6671 = vpow2.f32 %v709_v55  ;;  %v679_v58 = vsub.f32 0.0, %v7595_v56  ;;  %v5935_v59 = vpop.f32.mrb[4].mxu0  ;;  %v3597_v55 = vld [vmem:[#allocation11 + $0x10] sm:$0xff] }
 0x1bb   : > { %v715_v60 = vmul.f32 1.442695, %v680_v57  ;;  %v7600_v61 = vadd.f32 %v5935_v59, %v7581_v44  ;;  %v538_v63 = vpop.f32.mrb[5].mxu0  ;;  %v3598_v57 = vld [vmem:[#allocation11 + $0x18] sm:$0xff] }
 0x1bc   : > { %v713_v0 = vmul.f32 1.442695, %v679_v58  ;;  %v7603_v1 = vadd.f32 %v7581_v44, %v538_v63 }
 0x1bd   : > { %6673 = vpow2.f32 %v715_v60  ;;  %v682_v2 = vsub.f32 0.0, %v7600_v61 }
 0x1be   : > { %6675 = vpow2.f32 %v713_v0  ;;  %v681_v3 = vsub.f32 0.0, %v7603_v1  ;;  %v5938_v5 = vpop.f32.mrb[6].mxu0  ;;  %v3599_v0 = vld [vmem:[#allocation11 + $0x20] sm:$0xff] }
 0x1bf   : > { %v719_v6 = vmul.f32 1.442695, %v682_v2  ;;  %v7608_v7 = vadd.f32 %v5938_v5, %v7581_v44  ;;  %v548_v8 = vpop.f32.mrb[7].mxu0  ;;  %v3600_v2 = vld [vmem:[#allocation11 + $0x28] sm:$0xff] }
 0x1c0   : > { %v717_v9 = vmul.f32 1.442695, %v681_v3  ;;  %v7611_v11 = vadd.f32 %v7581_v44, %v548_v8 }
 0x1c1   : > { %6677 = vpow2.f32 %v719_v6  ;;  %v684_v12 = vsub.f32 0.0, %v7608_v7 }
 0x1c2   : > { %6679 = vpow2.f32 %v717_v9  ;;  %v683_v13 = vsub.f32 0.0, %v7611_v11  ;;  %v5941_v14 = vpop.f32.mrb[8].mxu0  ;;  %v1077_v9 = vmax.f32 %v7631_v47, %v7633_v49 }
 0x1c3   : > { %v6670_v15 = vpop.eup %6669  ;;  %v723_v17 = vmul.f32 1.442695, %v684_v12  ;;  %v7616_v18 = vadd.f32 %v5941_v14, %v7581_v44  ;;  %v558_v19 = vpop.f32.mrb[9].mxu0  ;;  %v7645_v12 = vpack.c.bf16 %v3598_v57, %v3597_v55  ;;  %v3602_v14 = vld [vmem:[#allocation11 + $0x38] sm:$0xff] }
 0x1c4   : > { %v6672_v20 = vpop.eup %6671  ;;  %v774_v21 = vadd.f32 1.0, %v6670_v15  ;;  %v721_v23 = vmul.f32 1.442695, %v683_v13  ;;  %v7619_v24 = vadd.f32 %v7581_v44, %v558_v19  ;;  %v3601_v13 = vld [vmem:[#allocation11 + $0x30] sm:$0xff] }
 0x1c5   : > { %v773_v25 = vadd.f32 1.0, %v6672_v20  ;;  %6681 = vpow2.f32 %v723_v17  ;;  %v686_v26 = vsub.f32 0.0, %v7616_v18 }
 0x1c6   : > { %6683 = vrcp.f32 %v774_v21  ;;  %v685_v27 = vsub.f32 0.0, %v7619_v24  ;;  %v5944_v29 = vpop.f32.mrb[10].mxu0  ;;  %v7650_v21 = vpack.c.bf16 %v3600_v2, %v3599_v0 }
 0x1c7   : > { %v6674_v30 = vpop.eup %6673  ;;  %6685 = vrcp.f32 %v773_v25  ;;  %v727_v31 = vmul.f32 1.442695, %v686_v26  ;;  %v7624_v32 = vadd.f32 %v5944_v29, %v7581_v44  ;;  %v568_v33 = vpop.f32.mrb[11].mxu0  ;;  %v3604_v25 = vld [vmem:[#allocation11 + $0x48] sm:$0xff] }
 0x1c8   : > { %v6676_v35 = vpop.eup %6675  ;;  %v776_v36 = vadd.f32 1.0, %v6674_v30  ;;  %6687 = vpow2.f32 %v721_v23  ;;  %v725_v37 = vmul.f32 1.442695, %v685_v27  ;;  %v7627_v38 = vadd.f32 %v7581_v44, %v568_v33  ;;  %v3603_v23 = vld [vmem:[#allocation11 + $0x40] sm:$0xff] }
 0x1c9   : > { %v775_v39 = vadd.f32 1.0, %v6676_v35  ;;  %6689 = vpow2.f32 %v727_v31  ;;  %v688_v41 = vsub.f32 0.0, %v7624_v32 }
 0x1ca   : > { %6691 = vrcp.f32 %v776_v36  ;;  %v687_v42 = vsub.f32 0.0, %v7627_v38  ;;  %v5947_v45 = vpop.f32.mrb[12].mxu0  ;;  %v7659_v36 = vpack.c.bf16 %v3602_v14, %v3601_v13 }
 0x1cb   : > { %v6678_v50 = vpop.eup %6677  ;;  %6693 = vrcp.f32 %v775_v39  ;;  %v731_v51 = vmul.f32 1.442695, %v688_v41  ;;  %v7636_v52 = vadd.f32 %v5947_v45, %v7581_v44  ;;  %v578_v54 = vpop.f32.mrb[13].mxu0  ;;  %v3606_v39 = vld [vmem:[#allocation11 + $0x58] sm:$0xff] }
 0x1cc   : > { %v6680_v58 = vpop.eup %6679  ;;  %v778_v59 = vadd.f32 1.0, %v6678_v50  ;;  %6695 = vpow2.f32 %v725_v37  ;;  %v729_v60 = vmul.f32 1.442695, %v687_v42  ;;  %v7639_v63 = vadd.f32 %v7581_v44, %v578_v54  ;;  %v3605_v37 = vld [vmem:[#allocation11 + $0x50] sm:$0xff] }
 0x1cd   : > { %v777_v3 = vadd.f32 1.0, %v6680_v58  ;;  %6697 = vpow2.f32 %v731_v51  ;;  %v690_v5 = vsub.f32 0.0, %v7636_v52  ;;  %v7665_v51 = vpack.c.bf16 %v3604_v25, %v3603_v23  ;;  %v7687_v25 = vld [vmem:[#allocation2 + $0x10] sm:$0xf] }
 0x1ce   : > { %6699 = vrcp.f32 %v778_v59  ;;  %v689_v6 = vsub.f32 0.0, %v7639_v63  ;;  %v5950_v8 = vpop.f32.mrb[14].mxu0  ;;  %v3607_v59 = vld [vmem:[#allocation11 + $0x60] sm:$0xff]  ;;  %9732 = vst [vmem:[#allocation26_spill] sm:$0xff] %v7687_v25 }
 0x1cf   : > { %v6682_v15 = vpop.eup %6681  ;;  %6701 = vrcp.f32 %v777_v3  ;;  %v735_v17 = vmul.f32 1.442695, %v690_v5  ;;  %v7648_v19 = vadd.f32 %v5950_v8, %v7581_v44  ;;  %v588_v20 = vpop.f32.mrb[15].mxu0  ;;  %v7675_v5 = vpack.c.bf16 %v3606_v39, %v3605_v37  ;;  %v3610_v37 = vld [vmem:[#allocation11 + $0x78] sm:$0xff] }
 0x1d0   : > { %v6684_v26 = vpop.eup %6683  ;;  %v780_v27 = vadd.f32 1.0, %v6682_v15  ;;  %6703 = vpow2.f32 %v729_v60  ;;  %v733_v29 = vmul.f32 1.442695, %v689_v6  ;;  %v7653_v30 = vadd.f32 %v7581_v44, %v588_v20  ;;  %v3608_v60 = vld [vmem:[#allocation11 + $0x68] sm:$0xff] }
 0x1d1   : > { %v6686_v31 = vpop.eup %6685  ;;  %v7656_v33 = vmul.f32 %v6684_v26, %v7584_v46  ;;  %6705 = vpow2.f32 %v735_v17  ;;  %v692_v35 = vsub.f32 0.0, %v7648_v19  ;;  %v7685_v23 = vpack.c.bf16 %v3608_v60, %v3607_v59  ;;  %v7689_v26 = vld [vmem:[#allocation2 + $0x28] sm:$0xf] }
 0x1d2   : > { %v6688_v41 = vpop.eup %6687  ;;  %v7662_v42 = vmul.f32 %v6686_v31, %v7587_v48  ;;  %6707 = vrcp.f32 %v780_v27  ;;  %v691_v45 = vsub.f32 0.0, %v7653_v30  ;;  %v5953_v50 = vpop.f32.mrb[16].mxu0  ;;  %9733 = vst [vmem:[#allocation27_spill] sm:$0xff] %v7689_v26 }
 0x1d3   : > { %9728 = vst [vmem:[#allocation22_spill] sm:$0xff] %v7656_v33  ;;  %v6690_v54 = vpop.eup %6689  ;;  %947 = vst [vmem:[#allocation2 + $0x3a] sm:$0xff] %v7656_v33  ;;  %v779_v46 = vadd.f32 1.0, %v6688_v41  ;;  %6709 = vpow2.f32 %v733_v29  ;;  %v739_v55 = vmul.f32 1.442695, %v692_v35  ;;  %v7669_v57 = vadd.f32 %v5953_v50, %v7581_v44  ;;  %v598_v58 = vpop.f32.mrb[17].mxu0 }
 0x1d4   : > { %9729 = vst [vmem:[#allocation23_spill] sm:$0xff] %v7662_v42  ;;  %v6692_v48 = vpop.eup %6691  ;;  %946 = vst [vmem:[#allocation2 + $0x32] sm:$0xff] %v7662_v42  ;;  %v782_v0 = vadd.f32 1.0, %v6690_v54  ;;  %v737_v2 = vmul.f32 1.442695, %v691_v45  ;;  %v7673_v3 = vadd.f32 %v7581_v44, %v598_v58  ;;  %v3609_v35 = vld [vmem:[#allocation11 + $0x70] sm:$0xff] }
 0x1d5   : > { %v6694_v6 = vpop.eup %6693  ;;  %v7678_v8 = vmul.f32 %v6692_v48, %v7592_v53  ;;  %6711 = vrcp.f32 %v779_v46  ;;  %v694_v13 = vsub.f32 0.0, %v7669_v57 }
 0x1d6   : > { %v6696_v14 = vpop.eup %6695  ;;  %v7682_v15 = vmul.f32 %v6694_v6, %v7595_v56  ;;  %6713 = vrcp.f32 %v782_v0  ;;  %v693_v17 = vsub.f32 0.0, %v7673_v3  ;;  %v5956_v20 = vpop.f32.mrb[18].mxu0 }
 0x1d7   : > { %9730 = vst [vmem:[#allocation24_spill] sm:$0xff] %v7678_v8  ;;  %v6698_v27 = vpop.eup %6697  ;;  %949 = vst [vmem:[#allocation2 + $0x52] sm:$0xff] %v7678_v8  ;;  %v781_v53 = vadd.f32 1.0, %v6696_v14  ;;  %6715 = vpow2.f32 %v739_v55  ;;  %v743_v29 = vmul.f32 1.442695, %v694_v13  ;;  %v7693_v31 = vadd.f32 %v5956_v20, %v7581_v44  ;;  %v608_v56 = vpop.f32.mrb[19].mxu0 }
 0x1d8   : > { %9731 = vst [vmem:[#allocation25_spill] sm:$0xff] %v7682_v15  ;;  %v6700_v39 = vpop.eup %6699  ;;  %948 = vst [vmem:[#allocation2 + $0x4a] sm:$0xff] %v7682_v15  ;;  %v784_v41 = vadd.f32 1.0, %v6698_v27  ;;  %6717 = vpow2.f32 %v737_v2  ;;  %v741_v45 = vmul.f32 1.442695, %v693_v17  ;;  %v7697_v50 = vadd.f32 %v7581_v44, %v608_v56 }
 0x1d9   : > { %v6702_v54 = vpop.eup %6701  ;;  %v7700_v46 = vmul.f32 %v6700_v39, %v7600_v61  ;;  %6719 = vrcp.f32 %v781_v53  ;;  %v696_v55 = vsub.f32 0.0, %v7693_v31  ;;  %v7709_v2 = vpack.c.bf16 %v3610_v37, %v3609_v35 }
 0x1da   : > { %v6704_v59 = vpop.eup %6703  ;;  %v7706_v60 = vmul.f32 %v6702_v54, %v7603_v1  ;;  %6721 = vrcp.f32 %v784_v41  ;;  %v695_v48 = vsub.f32 0.0, %v7697_v50  ;;  %v5959_v0 = vpop.f32.mrb[20].mxu0  ;;  %v1125_v37 = vld [vmem:[#allocation2 + $0x40] sm:$0xf] }
 0x1db   : > { %9734 = vst [vmem:[#allocation28_spill] sm:$0xff] %v7700_v46  ;;  %v6706_v6 = vpop.eup %6705  ;;  %951 = vst [vmem:[#allocation2 + $0x6a] sm:$0xff] %v7700_v46  ;;  %v783_v61 = vadd.f32 1.0, %v6704_v59  ;;  %6723 = vpow2.f32 %v743_v29  ;;  %v747_v13 = vmul.f32 1.442695, %v696_v55  ;;  %v7713_v14 = vadd.f32 %v5959_v0, %v7581_v44  ;;  %v618_v17 = vpop.f32.mrb[21].mxu0 }
 0x1dc   : > { %9735 = vst [vmem:[#allocation29_spill] sm:$0xff] %v7706_v60  ;;  %v7715_v20 = vld [vmem:[#allocation2 + $0x30] sm:$0xff]  ;;  %v7717_v1 = vld [vmem:[#allocation2 + $0x38] sm:$0xff]  ;;  %v6708_v27 = vpop.eup %6707  ;;  %950 = vst [vmem:[#allocation2 + $0x62] sm:$0xff] %v7706_v60  ;;  %v786_v53 = vadd.f32 1.0, %v6706_v6  ;;  %6725 = vpow2.f32 %v741_v45  ;;  %v7721_v35 = vadd.f32 %v7581_v44, %v618_v17 }
 0x1dd   : > { %v745_v56 = vmul.f32 1.442695, %v695_v48  ;;  %v6710_v29 = vpop.eup %6709  ;;  %v7724_v39 = vmul.f32 %v6708_v27, %v7608_v7  ;;  %6727 = vrcp.f32 %v783_v61  ;;  %v698_v41 = vsub.f32 0.0, %v7713_v14 }
 0x1de   : > { %6729 = vrcp.f32 %v786_v53  ;;  %v785_v54 = vadd.f32 1.0, %v6710_v29  ;;  %v697_v55 = vsub.f32 0.0, %v7721_v35  ;;  %v5962_v59 = vpop.f32.mrb[22].mxu0  ;;  %v7739_v61 = vmax.f32 %v1077_v9, %v1125_v37 }
 0x1df   : > { %9736 = vst [vmem:[#allocation30_spill] sm:$0xff] %v7724_v39  ;;  %v6712_v0 = vpop.eup %6711  ;;  %953 = vst [vmem:[#allocation2 + $0x82] sm:$0xff] %v7724_v39  ;;  %6731 = vpow2.f32 %v747_v13  ;;  %v751_v45 = vmul.f32 1.442695, %v698_v41  ;;  %v7730_v48 = vadd.f32 %v5962_v59, %v7581_v44  ;;  %v628_v6 = vpop.f32.mrb[23].mxu0  ;;  %v7732_v17 = vld [vmem:[#allocation2 + $0x48] sm:$0xff] }
 0x1e0   : > { %v7734_v7 = vld [vmem:[#allocation2 + $0x50] sm:$0xff]  ;;  %v6714_v27 = vpop.eup %6713  ;;  %v7742_v53 = vmul.f32 %v6712_v0, %v7611_v11  ;;  %6733 = vrcp.f32 %v785_v54  ;;  %v749_v13 = vmul.f32 1.442695, %v697_v55  ;;  %v7745_v29 = vadd.f32 %v7581_v44, %v628_v6 }
 0x1e1   : > { %v6716_v41 = vpop.eup %6715  ;;  %v7748_v59 = vmul.f32 %v6714_v27, %v7616_v18  ;;  %6735 = vpow2.f32 %v745_v56  ;;  %v700_v58 = vsub.f32 0.0, %v7730_v48  ;;  %v1268_v47 = vmax.f32 %v7715_v20, %v7732_v17 }
 0x1e2   : > { %9737 = vst [vmem:[#allocation31_spill] sm:$0xff] %v7742_v53  ;;  %v6718_v49 = vpop.eup %6717  ;;  %952 = vst [vmem:[#allocation2 + $0x7a] sm:$0xff] %v7742_v53  ;;  %v788_v11 = vadd.f32 1.0, %v6716_v41  ;;  %6737 = vpow2.f32 %v751_v45  ;;  %v699_v9 = vsub.f32 0.0, %v7745_v29  ;;  %v5965_v37 = vpop.f32.mrb[24].mxu0  ;;  %v1269_v54 = vmax.f32 %v7717_v1, %v7734_v7 }
 0x1e3   : > { %9738 = vst [vmem:[#allocation32_spill] sm:$0xff] %v7748_v59  ;;  %v6720_v18 = vpop.eup %6719  ;;  %955 = vst [vmem:[#allocation2 + $0x9a] sm:$0xff] %v7748_v59  ;;  %v787_v56 = vadd.f32 1.0, %v6718_v49  ;;  %6739 = vpow2.f32 %v749_v13  ;;  %v755_v55 = vmul.f32 1.442695, %v700_v58  ;;  %v7759_v0 = vadd.f32 %v5965_v37, %v7581_v44  ;;  %v638_v6 = vpop.f32.mrb[25].mxu0 }
 0x1e4   : > { %v7761_v27 = vld [vmem:[#allocation2 + $0x60] sm:$0xff]  ;;  %v7763_v45 = vld [vmem:[#allocation2 + $0x68] sm:$0xff]  ;;  %v6722_v41 = vpop.eup %6721  ;;  %v7766_v39 = vmul.f32 %v6720_v18, %v7619_v24  ;;  %6741 = vrcp.f32 %v788_v11  ;;  %v753_v53 = vmul.f32 1.442695, %v699_v9  ;;  %v7769_v46 = vadd.f32 %v7581_v44, %v638_v6 }
 0x1e5   : > { %v6724_v49 = vpop.eup %6723  ;;  %v7772_v58 = vmul.f32 %v6722_v41, %v7624_v32  ;;  %6743 = vrcp.f32 %v787_v56  ;;  %v702_v13 = vsub.f32 0.0, %v7759_v0  ;;  %v7776_v37 = vmax.f32 %v1268_v47, %v7761_v27 }
 0x1e6   : > { %9739 = vst [vmem:[#allocation33_spill] sm:$0xff] %v7766_v39  ;;  %v6726_v59 = vpop.eup %6725  ;;  %954 = vst [vmem:[#allocation2 + $0x92] sm:$0xff] %v7766_v39  ;;  %v790_v24 = vadd.f32 1.0, %v6724_v49  ;;  %6745 = vpow2.f32 %v755_v55  ;;  %v701_v11 = vsub.f32 0.0, %v7769_v46  ;;  %v5968_v9 = vpop.f32.mrb[26].mxu0  ;;  %v7781_v18 = vmax.f32 %v1269_v54, %v7763_v45 }
 0x1e7   : > { %9740 = vst [vmem:[#allocation34_spill] sm:$0xff] %v7772_v58  ;;  %v6728_v6 = vpop.eup %6727  ;;  %957 = vst [vmem:[#allocation2 + $0xb2] sm:$0xff] %v7772_v58  ;;  %v789_v32 = vadd.f32 1.0, %v6726_v59  ;;  %6747 = vpow2.f32 %v753_v53  ;;  %v759_v56 = vmul.f32 1.442695, %v702_v13  ;;  %v7785_v47 = vadd.f32 %v5968_v9, %v7581_v44  ;;  %v648_v41 = vpop.f32.mrb[27].mxu0 }
 0x1e8   : > { %v6730_v60 = vpop.eup %6729  ;;  %v7788_v49 = vmul.f32 %v6728_v6, %v7627_v38  ;;  %6749 = vrcp.f32 %v790_v24  ;;  %v757_v55 = vmul.f32 1.442695, %v701_v11  ;;  %v7791_v39 = vadd.f32 %v7581_v44, %v648_v41 }
 0x1e9   : > { %v6732_v54 = vpop.eup %6731  ;;  %v7794_v8 = vmul.f32 %v6730_v60, %v7636_v52  ;;  %6751 = vrcp.f32 %v789_v32  ;;  %v704_v53 = vsub.f32 0.0, %v7785_v47  ;;  %v1462_v59 = vrot.slane %v7776_v37, 1 }
 0x1ea   : > { %9741 = vst [vmem:[#allocation35_spill] sm:$0xff] %v7788_v49  ;;  %v6734_v13 = vpop.eup %6733  ;;  %956 = vst [vmem:[#allocation2 + $0xaa] sm:$0xff] %v7788_v49  ;;  %v792_v38 = vadd.f32 1.0, %v6732_v54  ;;  %6753 = vpow2.f32 %v759_v56  ;;  %v703_v24 = vsub.f32 0.0, %v7791_v39  ;;  %v5971_v11 = vpop.f32.mrb[28].mxu0 }
 0x1eb   : > { %9742 = vst [vmem:[#allocation36_spill] sm:$0xff] %v7794_v8  ;;  %v6736_v6 = vpop.eup %6735  ;;  %959 = vst [vmem:[#allocation2 + $0xca] sm:$0xff] %v7794_v8  ;;  %v7803_v52 = vmul.f32 %v6734_v13, %v7639_v63  ;;  %6755 = vpow2.f32 %v757_v55  ;;  %v763_v60 = vmul.f32 1.442695, %v704_v53  ;;  %v7806_v32 = vadd.f32 %v5971_v11, %v7581_v44  ;;  %v658_v41 = vpop.f32.mrb[29].mxu0 }
 0x1ec   : > { %v6738_v54 = vpop.eup %6737  ;;  %6757 = vrcp.f32 %v792_v38  ;;  %v791_v56 = vadd.f32 1.0, %v6736_v6  ;;  %v761_v58 = vmul.f32 1.442695, %v703_v24  ;;  %v7809_v49 = vadd.f32 %v7581_v44, %v658_v41 }
 0x1ed   : > { %9743 = vst [vmem:[#allocation37_spill] sm:$0xff] %v7803_v52  ;;  %v6740_v9 = vpop.eup %6739  ;;  %958 = vst [vmem:[#allocation2 + $0xc2] sm:$0xff] %v7803_v52  ;;  %v794_v8 = vadd.f32 1.0, %v6738_v54  ;;  %6759 = vpow2.f32 %v763_v60  ;;  %v706_v63 = vsub.f32 0.0, %v7806_v32  ;;  %v9744_v55 = vrot.slane %v7781_v18, 1 }
 0x1ee   : > { %v6742_v13 = vpop.eup %6741  ;;  %6761 = vrcp.f32 %v791_v56  ;;  %v793_v38 = vadd.f32 1.0, %v6740_v9  ;;  %v705_v24 = vsub.f32 0.0, %v7809_v49  ;;  %v5974_v11 = vpop.f32.mrb[30].mxu0 }
 0x1ef   : > { %v1464_v53 = vsel %vm1461_vm0, %v1462_v59, %v9744_v55  ;;  %v6744_v41 = vpop.eup %6743  ;;  %v7819_v52 = vmul.f32 %v6742_v13, %v7648_v19  ;;  %6763 = vrcp.f32 %v794_v8  ;;  %v767_v60 = vmul.f32 1.442695, %v706_v63  ;;  %v668_v15 = vpop.f32.mrb[31].mxu0 }
 0x1f0   : > { %v1574_v6 = vmax.f32 %v7776_v37, %v1464_v53  ;;  %v7822_v54 = vadd.f32 %v5974_v11, %v7581_v44  ;;  %v6746_v59 = vpop.eup %6745  ;;  %v7825_v55 = vmul.f32 %v6744_v41, %v7653_v30  ;;  %6765 = vrcp.f32 %v793_v38 }
 0x1f1   : > { %9745 = vst [vmem:[#allocation38_spill] sm:$0xff] %v7819_v52  ;;  %v765_v9 = vmul.f32 1.442695, %v705_v24  ;;  %v7828_v56 = vadd.f32 %v7581_v44, %v668_v15  ;;  %v6748_v53 = vpop.eup %6747  ;;  %961 = vst [vmem:[#allocation2 + $0xe2] sm:$0xff] %v7819_v52  ;;  %v796_v19 = vadd.f32 1.0, %v6746_v59  ;;  %6767 = vpow2.f32 %v761_v58 }
 0x1f2   : > { %9746 = vst [vmem:[#allocation39_spill] sm:$0xff] %v7825_v55  ;;  %v708_v8 = vsub.f32 0.0, %v7822_v54  ;;  %v1607_v63 = vrot.slane %v7776_v37, 2  ;;  %v6750_v13 = vpop.eup %6749  ;;  %960 = vst [vmem:[#allocation2 + $0xda] sm:$0xff] %v7825_v55  ;;  %v795_v11 = vadd.f32 1.0, %v6748_v53  ;;  %6769 = vpow2.f32 %v767_v60 }
 0x1f3   : > { %v707_v30 = vsub.f32 0.0, %v7828_v56  ;;  %v9702_v38 = vrot.slane %v7781_v18, 2  ;;  %v6752_v44 = vpop.eup %6751  ;;  %v854_v15 = vmul.f32 %v6750_v13, %v7669_v57  ;;  %6771 = vrcp.f32 %v796_v19  ;;  %v1222_v53 = vld [vmem:[#allocation2 + $0x58] sm:$0xf] }
 0x1f4   : > { %v771_v24 = vmul.f32 1.442695, %v708_v8  ;;  %v1752_v58 = vrot.slane %v7776_v37, 3  ;;  %v6754_v41 = vpop.eup %6753  ;;  %6773 = vrcp.f32 %v795_v11  ;;  %v1753_v60 = vrot.slane %v7781_v18, 3 }
 0x1f5   : > { %v769_v59 = vmul.f32 1.442695, %v707_v30  ;;  %v1609_v52 = vsel %vm1606_vm1, %v1607_v63, %v9702_v38  ;;  %v6756_v55 = vpop.eup %6755  ;;  %963 = vst [vmem:[#allocation2 + $0xfa] sm:$0xff] %v854_v15  ;;  %v798_v33 = vadd.f32 1.0, %v6754_v41  ;;  %6775 = vpow2.f32 %v765_v9  ;;  %v1319_v30 = vld [vmem:[#allocation2 + $0x70] sm:$0xf] }
 0x1f6   : > { %v1719_v42 = vmax.f32 %v1574_v6, %v1609_v52  ;;  %v1897_v57 = vrot.slane %v7776_v37, 4  ;;  %v6758_v19 = vpop.eup %6757  ;;  %v797_v8 = vadd.f32 1.0, %v6756_v55  ;;  %6777 = vpow2.f32 %v771_v24 }
 0x1f7   : > { %v1754_v13 = vsel %vm1751_vm2, %v1752_v58, %v1753_v60  ;;  %v1898_v11 = vrot.slane %v7781_v18, 4  ;;  %v6760_v26 = vpop.eup %6759  ;;  %v856_v63 = vmul.f32 %v6758_v19, %v7693_v31  ;;  %6779 = vrcp.f32 %v798_v33 }
 0x1f8   : > { %v1864_v38 = vmax.f32 %v1719_v42, %v1754_v13  ;;  %v1270_v25 = vmax.f32 %v7739_v61, %v1222_v53  ;;  %v6762_v41 = vpop.eup %6761  ;;  %6781 = vrcp.f32 %v797_v8  ;;  %v800_v52 = vadd.f32 1.0, %v6760_v26  ;;  %v6925_v42 = vld [vmem:[#allocation2] sm:$0xff]  ;;  %v983_v8 = vld [vmem:[#allocation2 + $0x28] sm:$0xf] }
 0x1f9   : > { %v1899_v6 = vsel %vm1896_vm3, %v1897_v57, %v1898_v11  ;;  %v853_v55 = vmul.f32 %v6752_v44, %v7673_v3  ;;  %v6764_v9 = vpop.eup %6763  ;;  %965 = vst [vmem:[#allocation2 + $0x112] sm:$0xff] %v856_v63  ;;  %v855_v24 = vmul.f32 %v6762_v41, %v7697_v50  ;;  %6783 = vpow2.f32 %v769_v59  ;;  %v1032_v13 = vld [vmem:[#allocation2 + $0x40] sm:$0xf] }
 0x1fa   : > { %v2009_v58 = vmax.f32 %v1864_v38, %v1899_v6  ;;  %v1367_v40 = vmax.f32 %v1270_v25, %v1319_v30  ;;  %v6766_v34 = vpop.eup %6765  ;;  %v7851_v33 = vmul.f32 %v6764_v9, %v7713_v14  ;;  %6785 = vrcp.f32 %v800_v52  ;;  %v7873_v6 = vld [vmem:[#allocation2 + $0x78] sm:$0xff] }
 0x1fb   : > { %962 = vst [vmem:[#allocation2 + $0xf2] sm:$0xff] %v853_v55  ;;  %6111 = vmatprep.mubr.f32.mxu1 %v853_v55  ;;  %v1078_v26 = vmax.f32 %v6925_v42, %v7715_v20  ;;  %v1079_v31 = vmax.f32 %v6925_v42, %v7717_v1  ;;  %v6768_v3 = vpop.eup %6767  ;;  %964 = vst [vmem:[#allocation2 + $0x10a] sm:$0xff] %v855_v24  ;;  %v857_v61 = vmul.f32 %v6766_v34, %v7721_v35  ;;  %v7875_v55 = vld [vmem:[#allocation2 + $0x80] sm:$0xff]  ;;  %v1128_v42 = vld [vmem:[#allocation2 + $0x58] sm:$0xf] }
 0x1fc   : > { %6007 = vmatprep.mubr.f32.mxu0 %v2009_v58  ;;  %v1465_v50 = vrot.slane %v1367_v40, 1  ;;  %v1610_v38 = vrot.slane %v1367_v40, 2  ;;  %v1755_v25 = vrot.slane %v1367_v40, 3  ;;  %6112 = vmatmul.mubr.f32.vlgmr.msra.gmra.mrb[0].mxu1 %v854_v15  ;;  %2507 = vst [vmem:[#allocation2 + $0x32] sm:$0xff] %v2009_v58  ;;  %v6770_v14 = vpop.eup %6769  ;;  %967 = vst [vmem:[#allocation2 + $0x12a] sm:$0xff] %v7851_v33  ;;  %v799_v44 = vadd.f32 1.0, %v6768_v3 }
 0x1fd   : > { %v1900_v59 = vrot.slane %v1367_v40, 4  ;;  %v1174_v53 = vmax.f32 %v1078_v26, %v7732_v17  ;;  %v1175_v20 = vmax.f32 %v1079_v31, %v7734_v7  ;;  %6394 = vmatpush3.bf16.msra.mxu1 %v7575_v43  ;;  %6114 = vmatprep.mubr.f32.mxu1 %v855_v24  ;;  %v6772_v1 = vpop.eup %6771  ;;  %966 = vst [vmem:[#allocation2 + $0x122] sm:$0xff] %v857_v61  ;;  %v802_v34 = vadd.f32 1.0, %v6770_v14 }
 0x1fe   : > { %v9747_v35 = vrot.slane %v7781_v18, 1  ;;  %v9748_v57 = vrot.slane %v7781_v18, 2  ;;  %v1756_v40 = vsel %vm1751_vm2, %v1753_v60, %v1755_v25  ;;  %6396 = vmatprep.subr.bf16.mxu1 %v7645_v12  ;;  %v6774_v30 = vpop.eup %6773  ;;  %v7869_v43 = vmul.f32 %v6772_v1, %v7730_v48 }
 0x1ff   : > { %6787 = vrcp.f32 %v799_v44  ;;  %v1901_v52 = vsel %vm1896_vm3, %v1898_v11, %v1900_v59  ;;  %v6776_v9 = vpop.eup %6775  ;;  %v859_v60 = vmul.f32 %v6774_v30, %v7745_v29  ;;  %v1271_v24 = vmax.f32 %v1174_v53, %v7761_v27  ;;  %v1322_v30 = vld [vmem:[#allocation2 + $0x88] sm:$0xf] }
 0x200   : > { %v1466_v15 = vsel %vm1461_vm0, %v9747_v35, %v1465_v50  ;;  %v1611_v19 = vsel %vm1606_vm1, %v9748_v57, %v1610_v38  ;;  %6789 = vrcp.f32 %v802_v34  ;;  %v1272_v58 = vmax.f32 %v1175_v20, %v7763_v45  ;;  %6115 = vmatmul.mubr.f32.gmra.mrb[2].mxu1 %v856_v63  ;;  %v6778_v48 = vpop.eup %6777  ;;  %969 = vst [vmem:[#allocation2 + $0x142] sm:$0xff] %v7869_v43 }
 0x201   : > { %v1575_v41 = vmax.f32 %v7781_v18, %v1466_v15  ;;  %v801_v26 = vadd.f32 1.0, %v6776_v9  ;;  %v1080_v11 = vmax.f32 %v983_v8, %v1032_v13  ;;  %6398 = vmatpush3.bf16.msra.mxu1 %v7645_v12  ;;  %6117 = vmatprep.mubr.f32.mxu1 %v857_v61  ;;  %v6780_v3 = vpop.eup %6779  ;;  %968 = vst [vmem:[#allocation2 + $0x13a] sm:$0xff] %v859_v60  ;;  %v804_v50 = vadd.f32 1.0, %v6778_v48  ;;  %v1225_v15 = vld [vmem:[#allocation2 + $0x70] sm:$0xf] }
 0x202   : > { %v1368_v29 = vmax.f32 %v1271_v24, %v7873_v6  ;;  %v7884_v38 = vmax.f32 %v1272_v58, %v7875_v55  ;;  %6400 = vmatprep.subr.bf16.mxu1 %v7650_v21  ;;  %v6782_v63 = vpop.eup %6781  ;;  %v7888_v25 = vmul.f32 %v6780_v3, %v7759_v0  ;;  %v1035_v8 = vld [vmem:[#allocation2 + $0x58] sm:$0xf]  ;;  %v1084_v48 = vmax.f32 %v7732_v17, %v7761_v27 }
 0x203   : > { %v1720_v31 = vmax.f32 %v1575_v41, %v1611_v19  ;;  %6791 = vrcp.f32 %v801_v26  ;;  %v1176_v44 = vmax.f32 %v1080_v11, %v1128_v42  ;;  %v6784_v59 = vpop.eup %6783  ;;  %v861_v12 = vmul.f32 %v6782_v63, %v7769_v46 }
 0x204   : > { %6793 = vrcp.f32 %v804_v50  ;;  %v1467_v61 = vrot.slane %v1368_v29, 1  ;;  %v1468_v53 = vrot.slane %v7884_v38, 1  ;;  %6118 = vmatmul.mubr.f32.gmra.mrb[4].mxu1 %v7851_v33  ;;  %v6786_v20 = vpop.eup %6785  ;;  %971 = vst [vmem:[#allocation2 + $0x15a] sm:$0xff] %v7888_v25  ;;  %v803_v1 = vadd.f32 1.0, %v6784_v59 }
 0x205   : > { %v1865_v14 = vmax.f32 %v1720_v31, %v1756_v40  ;;  %v1612_v35 = vrot.slane %v1368_v29, 2  ;;  %v1613_v0 = vrot.slane %v7884_v38, 2  ;;  %6402 = vmatpush3.bf16.msra.mxu1 %v7650_v21  ;;  %6120 = vmatprep.mubr.f32.mxu1 %v859_v60  ;;  %970 = vst [vmem:[#allocation2 + $0x152] sm:$0xff] %v861_v12  ;;  %v7897_v46 = vmul.f32 %v6786_v20, %v7785_v47  ;;  %v986_v40 = vld [vmem:[#allocation2 + $0x40] sm:$0xf] }
 0x206   : > { %v1469_v33 = vsel %vm1461_vm0, %v1467_v61, %v1468_v53  ;;  %v1757_v57 = vrot.slane %v1368_v29, 3  ;;  %v1758_v19 = vrot.slane %v7884_v38, 3  ;;  %6404 = vmatprep.subr.bf16.mxu1 %v7659_v36  ;;  %6795 = vrcp.f32 %v803_v1  ;;  %v1131_v60 = vld [vmem:[#allocation2 + $0x70] sm:$0xf] }
 0x207   : > { %v2010_v34 = vmax.f32 %v1865_v14, %v1901_v52  ;;  %v1576_v13 = vmax.f32 %v1368_v29, %v1469_v33  ;;  %v1614_v21 = vsel %vm1606_vm1, %v1612_v35, %v1613_v0  ;;  %v1902_v47 = vrot.slane %v1368_v29, 4  ;;  %973 = vst [vmem:[#allocation2 + $0x172] sm:$0xff] %v7897_v46  ;;  %v1228_v29 = vld [vmem:[#allocation2 + $0x88] sm:$0xf] }
 0x208   : > { %v1759_v41 = vsel %vm1751_vm2, %v1757_v57, %v1758_v19  ;;  %v1903_v52 = vrot.slane %v7884_v38, 4  ;;  %v1273_v9 = vmax.f32 %v1176_v44, %v1225_v15  ;;  %6121 = vmatmul.mubr.f32.gmra.mrb[6].mxu1 %v7869_v43  ;;  %v1083_v42 = vmax.f32 %v986_v40, %v1035_v8  ;;  %v7919_v43 = vld [vmem:[#allocation2 + $0x90] sm:$0xff]  ;;  %v1325_v8 = vld [vmem:[#allocation2 + $0xa0] sm:$0xf] }
 0x209   : > { %6008 = vmatmul.mubr.f32.vlgmr.msra.gmra.mrb[32].mxu0 %v2010_v34  ;;  %2508 = vst [vmem:[#allocation2 + $0x3a] sm:$0xff] %v2010_v34  ;;  %v6788_v24 = vpop.eup %6787  ;;  %v1721_v58 = vmax.f32 %v1576_v13, %v1614_v21  ;;  %6406 = vmatpush3.bf16.msra.mxu1 %v7659_v36  ;;  %v1274_v50 = vmax.f32 %v7776_v37, %v7873_v6 }
 0x20a   : > { %6362 = vmatpush3.bf16.msra.mxu0 %v7542_v62  ;;  %v6790_v26 = vpop.eup %6789  ;;  %v863_v31 = vmul.f32 %v6788_v24, %v7791_v39  ;;  %v1904_v11 = vsel %vm1896_vm3, %v1902_v47, %v1903_v52  ;;  %v1370_v3 = vmax.f32 %v1273_v9, %v1322_v30  ;;  %v7921_v62 = vld [vmem:[#allocation2 + $0x98] sm:$0xff]  ;;  %6123 = vmatprep.mubr.f32.mxu1 %v861_v12 }
 0x20b   : > { %v866_v63 = vmul.f32 %v6790_v26, %v7806_v32  ;;  %v1866_v14 = vmax.f32 %v1721_v58, %v1759_v41  ;;  %v1275_v36 = vmax.f32 %v7781_v18, %v7875_v55  ;;  %v1179_v44 = vmax.f32 %v1083_v42, %v1131_v60  ;;  %6408 = vmatprep.subr.bf16.mxu1 %v7665_v51 }
 0x20c   : > { %972 = vst [vmem:[#allocation2 + $0x16a] sm:$0xff] %v863_v31  ;;  %v1470_v39 = vrot.slane %v1370_v3, 1  ;;  %v1615_v59 = vrot.slane %v1370_v3, 2  ;;  %v1760_v61 = vrot.slane %v1370_v3, 3  ;;  %v1905_v37 = vrot.slane %v1370_v3, 4  ;;  %6124 = vmatmul.mubr.f32.gmra.mrb[8].mxu1 %v7888_v25  ;;  %6364 = vmatprep.subr.bf16.mxu0 %v7546_v4 }
 0x20d   : > { %v6792_v20 = vpop.eup %6791  ;;  %975 = vst [vmem:[#allocation2 + $0x18a] sm:$0xff] %v866_v63  ;;  %v2011_v12 = vmax.f32 %v1866_v14, %v1904_v11  ;;  %v1371_v32 = vmax.f32 %v1274_v50, %v7919_v43  ;;  %v7931_v1 = vmax.f32 %v1275_v36, %v7921_v62  ;;  %v1276_v18 = vmax.f32 %v1179_v44, %v1228_v29  ;;  %v1038_v29 = vld [vmem:[#allocation2 + $0x70] sm:$0xf]  ;;  %v1041_v14 = vld [vmem:[#allocation2 + $0x88] sm:$0xf] }
 0x20e   : > { %6410 = vmatpush3.bf16.msra.mxu1 %v7665_v51  ;;  %v6794_v34 = vpop.eup %6793  ;;  %v865_v35 = vmul.f32 %v6792_v20, %v7809_v49  ;;  %v1471_v25 = vsel %vm1461_vm0, %v1468_v53, %v1470_v39  ;;  %v1616_v15 = vsel %vm1606_vm1, %v1613_v0, %v1615_v59  ;;  %v1761_v33 = vsel %vm1751_vm2, %v1758_v19, %v1760_v61  ;;  %v7975_v39 = vld [vmem:[#allocation2 + $0xa8] sm:$0xff]  ;;  %v1137_v20 = vld [vmem:[#allocation2 + $0xa0] sm:$0xf] }
 0x20f   : > { %6126 = vmatprep.mubr.f32.mxu1 %v863_v31  ;;  %v7943_v57 = vmul.f32 %v6794_v34, %v7822_v54  ;;  %6010 = vmatprep.mubr.f32.mxu0 %v2011_v12  ;;  %v1577_v51 = vmax.f32 %v7884_v38, %v1471_v25  ;;  %v1906_v40 = vsel %vm1896_vm3, %v1903_v52, %v1905_v37  ;;  %v1472_v49 = vrot.slane %v1371_v32, 1  ;;  %v1134_v61 = vld [vmem:[#allocation2 + $0x88] sm:$0xf]  ;;  %v992_v37 = vld [vmem:[#allocation2 + $0x70] sm:$0xf] }
 0x210   : > { %2509 = vst [vmem:[#allocation2 + $0x4a] sm:$0xff] %v2011_v12  ;;  %6412 = vmatprep.subr.bf16.mxu1 %v7675_v5  ;;  %974 = vst [vmem:[#allocation2 + $0x182] sm:$0xff] %v865_v35  ;;  %v1473_v53 = vrot.slane %v7931_v1, 1  ;;  %v1617_v0 = vrot.slane %v1371_v32, 2  ;;  %v1618_v19 = vrot.slane %v7931_v1, 2  ;;  %v1762_v13 = vrot.slane %v1371_v32, 3  ;;  %6127 = vmatmul.mubr.f32.gmra.mrb[10].mxu1 %v7897_v46  ;;  %v6796_v54 = vpop.eup %6795 }
 0x211   : > { %6366 = vmatpush3.bf16.msra.mxu0 %v7546_v4  ;;  %977 = vst [vmem:[#allocation2 + $0x1a2] sm:$0xff] %v7943_v57  ;;  %v1722_v38 = vmax.f32 %v1577_v51, %v1616_v15  ;;  %v1763_v21 = vrot.slane %v7931_v1, 3  ;;  %v1907_v47 = vrot.slane %v1371_v32, 4  ;;  %v1908_v30 = vrot.slane %v7931_v1, 4  ;;  %6129 = vmatprep.mubr.f32.mxu1 %v865_v35  ;;  %v7980_v12 = vld [vmem:[#allocation2 + $0xb0] sm:$0xff] }
 0x212   : > { %6414 = vmatpush3.bf16.msra.mxu1 %v7675_v5  ;;  %v867_v41 = vmul.f32 %v6796_v54, %v7828_v56  ;;  %v1474_v52 = vsel %vm1461_vm0, %v1472_v49, %v1473_v53  ;;  %v1619_v46 = vsel %vm1606_vm1, %v1617_v0, %v1618_v19  ;;  %v1373_v9 = vmax.f32 %v1276_v18, %v1325_v8  ;;  %v1231_v51 = vld [vmem:[#allocation2 + $0xa0] sm:$0xf] }
 0x213   : > { %6416 = vmatprep.subr.bf16.mxu1 %v7685_v23  ;;  %v1867_v4 = vmax.f32 %v1722_v38, %v1761_v33  ;;  %v1578_v60 = vmax.f32 %v1371_v32, %v1474_v52  ;;  %v1764_v24 = vsel %vm1751_vm2, %v1762_v13, %v1763_v21  ;;  %v1909_v58 = vsel %vm1896_vm3, %v1907_v47, %v1908_v30  ;;  %v1328_v13 = vld [vmem:[#allocation2 + $0xb8] sm:$0xf]  ;;  %v7996_v54 = vld [vmem:[#allocation2 + $0xc0] sm:$0xff] }
 0x214   : > { %6368 = vmatprep.subr.bf16.mxu0 %v7550_v10  ;;  %976 = vst [vmem:[#allocation2 + $0x19a] sm:$0xff] %v867_v41  ;;  %v1475_v5 = vrot.slane %v1373_v9, 1  ;;  %v1620_v42 = vrot.slane %v1373_v9, 2  ;;  %v1765_v26 = vrot.slane %v1373_v9, 3  ;;  %v1910_v56 = vrot.slane %v1373_v9, 4  ;;  %6130 = vmatmul.mubr.f32.gmra.mrb[12].mxu1 %v866_v63 }
 0x215   : > { %6370 = vmatpush3.bf16.msra.mxu0 %v7550_v10  ;;  %v2012_v31 = vmax.f32 %v1867_v4, %v1906_v40  ;;  %v1723_v11 = vmax.f32 %v1578_v60, %v1619_v46  ;;  %v1085_v3 = vmax.f32 %v7734_v7, %v7763_v45  ;;  %v1180_v50 = vmax.f32 %v1084_v48, %v7873_v6  ;;  %v989_v7 = vld [vmem:[#allocation2 + $0x58] sm:$0xf] }
 0x216   : > { %6418 = vmatpush3.bf16.msra.mxu1 %v7685_v23  ;;  %v1476_v36 = vsel %vm1461_vm0, %v1473_v53, %v1475_v5  ;;  %v1621_v63 = vsel %vm1606_vm1, %v1618_v19, %v1620_v42  ;;  %v1766_v10 = vsel %vm1751_vm2, %v1763_v21, %v1765_v26  ;;  %v1911_v44 = vsel %vm1896_vm3, %v1908_v30, %v1910_v56  ;;  %v1234_v30 = vld [vmem:[#allocation2 + $0xb8] sm:$0xf] }
 0x217   : > { %6132 = vmatprep.mubr.f32.mxu1 %v867_v41  ;;  %6011 = vmatmul.mubr.f32.gmra.mrb[34].mxu0 %v2012_v31  ;;  %v1868_v59 = vmax.f32 %v1723_v11, %v1764_v24  ;;  %v1579_v17 = vmax.f32 %v7931_v1, %v1476_v36  ;;  %v1181_v48 = vmax.f32 %v1085_v3, %v7875_v55  ;;  %v8003_v24 = vld [vmem:[#allocation2 + $0xc8] sm:$0xff] }
 0x218   : > { %v1277_v23 = vmax.f32 %v1180_v50, %v7919_v43  ;;  %2510 = vst [vmem:[#allocation2 + $0x52] sm:$0xff] %v2012_v31  ;;  %v1086_v32 = vmax.f32 %v989_v7, %v1038_v29  ;;  %v1087_v18 = vmax.f32 %v7761_v27, %v7873_v6  ;;  %v1088_v34 = vmax.f32 %v7763_v45, %v7875_v55 }
 0x219   : > { %v1089_v35 = vmax.f32 %v992_v37, %v1041_v14  ;;  %6420 = vmatprep.subr.bf16.mxu1 %v7709_v2  ;;  %v2013_v1 = vmax.f32 %v1868_v59, %v1909_v58  ;;  %v1724_v25 = vmax.f32 %v1579_v17, %v1621_v63  ;;  %v1278_v15 = vmax.f32 %v1181_v48, %v7921_v62 }
 0x21a   : > { %v1374_v33 = vmax.f32 %v1277_v23, %v7975_v39  ;;  %6133 = vmatmul.mubr.f32.gmra.mrb[14].mxu1 %v7943_v57  ;;  %v1182_v40 = vmax.f32 %v1086_v32, %v1134_v61  ;;  %v1183_v49 = vmax.f32 %v1087_v18, %v7919_v43  ;;  %v1184_v27 = vmax.f32 %v1088_v34, %v7921_v62  ;;  %v1331_v32 = vld [vmem:[#allocation2 + $0xd0] sm:$0xf] }
 0x21b   : > { %v7992_v8 = vmax.f32 %v1089_v35, %v1137_v20  ;;  %6422 = vmatpush3.bf16.msra.mxu1 %v7709_v2  ;;  %6013 = vmatprep.mubr.f32.mxu0 %v2013_v1  ;;  %v1869_v45 = vmax.f32 %v1724_v25, %v1766_v10  ;;  %v1375_v53 = vmax.f32 %v1278_v15, %v7980_v12  ;;  %v1044_v25 = vld [vmem:[#allocation2 + $0xa0] sm:$0xf] }
 0x21c   : > { %v1477_v0 = vrot.slane %v1374_v33, 1  ;;  %v1622_v19 = vrot.slane %v1374_v33, 2  ;;  %2511 = vst [vmem:[#allocation2 + $0x62] sm:$0xff] %v2013_v1  ;;  %6372 = vmatprep.subr.bf16.mxu0 %v7554_v16  ;;  %v1767_v57 = vrot.slane %v1374_v33, 3  ;;  %v1912_v38 = vrot.slane %v1374_v33, 4  ;;  %v9749_v15 = vld [vmem:[#allocation20_spill] sm:$0xff] }
 0x21d   : > { %v1279_v21 = vmax.f32 %v1182_v40, %v1231_v51  ;;  %v1280_v47 = vmax.f32 %v1183_v49, %v7975_v39  ;;  %6374 = vmatpush3.bf16.msra.mxu0 %v7554_v16  ;;  %v2014_v2 = vmax.f32 %v1869_v45, %v1911_v44  ;;  %v1478_v41 = vrot.slane %v1375_v53, 1 }
 0x21e   : > { %v1623_v52 = vrot.slane %v1375_v53, 2  ;;  %v1768_v46 = vrot.slane %v1375_v53, 3  ;;  %6376 = vmatprep.subr.bf16.mxu0 %v7558_v22  ;;  %v1913_v9 = vrot.slane %v1375_v53, 4  ;;  %v1281_v60 = vmax.f32 %v1184_v27, %v7980_v12 }
 0x21f   : > { %v1376_v4 = vmax.f32 %v1279_v21, %v1328_v13  ;;  %v1377_v58 = vmax.f32 %v1280_v47, %v7996_v54  ;;  %6014 = vmatmul.mubr.f32.gmra.mrb[36].mxu0 %v2014_v2  ;;  %v1479_v5 = vsel %vm1461_vm0, %v1477_v0, %v1478_v41  ;;  %v1282_v26 = vmax.f32 %v7992_v8, %v1234_v30 }
 0x220   : > { %v1624_v42 = vsel %vm1606_vm1, %v1622_v19, %v1623_v52  ;;  %v1769_v16 = vsel %vm1751_vm2, %v1767_v57, %v1768_v46  ;;  %2512 = vst [vmem:[#allocation2 + $0x6a] sm:$0xff] %v2014_v2  ;;  %v1580_v56 = vmax.f32 %v1374_v33, %v1479_v5  ;;  %v1914_v31 = vsel %vm1896_vm3, %v1912_v38, %v1913_v9  ;;  %v1140_v57 = vld [vmem:[#allocation2 + $0xb8] sm:$0xf] }
 0x221   : > { %v1480_v11 = vrot.slane %v1376_v4, 1  ;;  %v1625_v3 = vrot.slane %v1376_v4, 2  ;;  %6378 = vmatpush3.bf16.msra.mxu0 %v7558_v22  ;;  %v1770_v50 = vrot.slane %v1376_v4, 3  ;;  %v1915_v29 = vrot.slane %v1376_v4, 4 }
 0x222   : > { %v8013_v14 = vmax.f32 %v1281_v60, %v8003_v24  ;;  %v1482_v36 = vrot.slane %v1377_v58, 1  ;;  %6380 = vmatprep.subr.bf16.mxu0 %v7562_v28  ;;  %v1725_v63 = vmax.f32 %v1580_v56, %v1624_v42  ;;  %v1627_v7 = vrot.slane %v1377_v58, 2  ;;  %v1047_v42 = vld [vmem:[#allocation2 + $0xb8] sm:$0xf] }
 0x223   : > { %v1481_v10 = vsel %vm1461_vm0, %v1478_v41, %v1480_v11  ;;  %v1626_v44 = vsel %vm1606_vm1, %v1623_v52, %v1625_v3  ;;  %v1771_v17 = vsel %vm1751_vm2, %v1768_v46, %v1770_v50  ;;  %v1916_v48 = vsel %vm1896_vm3, %v1913_v9, %v1915_v29  ;;  %v1237_v9 = vld [vmem:[#allocation2 + $0xd0] sm:$0xf]  ;;  %v8048_v11 = vld [vmem:[#allocation2 + $0xe0] sm:$0xff]  ;;  %v1334_v3 = vld [vmem:[#allocation2 + $0xe8] sm:$0xf] }
 0x224   : > { %v1581_v59 = vmax.f32 %v1375_v53, %v1481_v10  ;;  %v1483_v22 = vrot.slane %v8013_v14, 1  ;;  %v1870_v23 = vmax.f32 %v1725_v63, %v1769_v16  ;;  %v1628_v61 = vrot.slane %v8013_v14, 2  ;;  %v995_v53 = vld [vmem:[#allocation2 + $0x88] sm:$0xf]  ;;  %v998_v10 = vld [vmem:[#allocation2 + $0xa0] sm:$0xf] }
 0x225   : > { %v1772_v37 = vrot.slane %v1377_v58, 3  ;;  %v1773_v20 = vrot.slane %v8013_v14, 3  ;;  %6382 = vmatpush3.bf16.msra.mxu0 %v7562_v28  ;;  %v1917_v35 = vrot.slane %v1377_v58, 4  ;;  %v1918_v1 = vrot.slane %v8013_v14, 4 }
 0x226   : > { %v1726_v18 = vmax.f32 %v1581_v59, %v1626_v44  ;;  %v1484_v34 = vsel %vm1461_vm0, %v1482_v36, %v1483_v22  ;;  %6384 = vmatprep.subr.bf16.mxu0 %v9749_v15  ;;  %v2015_v33 = vmax.f32 %v1870_v23, %v1914_v31  ;;  %v1629_v40 = vsel %vm1606_vm1, %v1627_v7, %v1628_v61 }
 0x227   : > { %v1582_v51 = vmax.f32 %v1377_v58, %v1484_v34  ;;  %v1774_v49 = vsel %vm1751_vm2, %v1772_v37, %v1773_v20  ;;  %v1919_v8 = vsel %vm1896_vm3, %v1917_v35, %v1918_v1  ;;  %v1379_v45 = vmax.f32 %v1282_v26, %v1331_v32  ;;  %v8043_v58 = vld [vmem:[#allocation2 + $0xd8] sm:$0xff] }
 0x228   : > { %v1871_v27 = vmax.f32 %v1726_v18, %v1771_v17  ;;  %v1090_v28 = vmax.f32 %v7873_v6, %v7919_v43  ;;  %6016 = vmatprep.mubr.f32.mxu0 %v2015_v33  ;;  %v1091_v19 = vmax.f32 %v7875_v55, %v7921_v62  ;;  %2513 = vst [vmem:[#allocation2 + $0x7a] sm:$0xff] %v2015_v33  ;;  %v9750_v55 = vld [vmem:[#allocation21_spill] sm:$0xff] }
 0x229   : > { %v1727_v0 = vmax.f32 %v1582_v51, %v1629_v40  ;;  %v1092_v13 = vmax.f32 %v995_v53, %v1044_v25  ;;  %v1093_v38 = vmax.f32 %v7919_v43, %v7975_v39  ;;  %v1485_v47 = vrot.slane %v1379_v45, 1  ;;  %6386 = vmatpush3.bf16.msra.mxu0 %v9749_v15 }
 0x22a   : > { %v2016_v21 = vmax.f32 %v1871_v27, %v1916_v48  ;;  %v1630_v30 = vrot.slane %v1379_v45, 2  ;;  %v1775_v2 = vrot.slane %v1379_v45, 3  ;;  %v1920_v6 = vrot.slane %v1379_v45, 4  ;;  %6388 = vmatprep.subr.bf16.mxu0 %v9750_v55  ;;  %v8064_v27 = vld [vmem:[#allocation2 + $0xf0] sm:$0xff] }
 0x22b   : > { %v1872_v41 = vmax.f32 %v1727_v0, %v1774_v49  ;;  %v1186_v52 = vmax.f32 %v1090_v28, %v7975_v39  ;;  %v1187_v46 = vmax.f32 %v1091_v19, %v7980_v12  ;;  %v1486_v4 = vsel %vm1461_vm0, %v1483_v22, %v1485_v47  ;;  %v8069_v19 = vld [vmem:[#allocation2 + $0xf8] sm:$0xff] }
 0x22c   : > { %6017 = vmatmul.mubr.f32.gmra.mrb[38].mxu0 %v2016_v21  ;;  %v1631_v43 = vsel %vm1606_vm1, %v1628_v61, %v1630_v30  ;;  %v1776_v60 = vsel %vm1751_vm2, %v1773_v20, %v1775_v2  ;;  %v1188_v5 = vmax.f32 %v1092_v13, %v1140_v57  ;;  %2514 = vst [vmem:[#allocation2 + $0x82] sm:$0xff] %v2016_v21 }
 0x22d   : > { %v2017_v16 = vmax.f32 %v1872_v41, %v1919_v8  ;;  %v1583_v26 = vmax.f32 %v8013_v14, %v1486_v4  ;;  %v1921_v56 = vsel %vm1896_vm3, %v1918_v1, %v1920_v6  ;;  %v1283_v31 = vmax.f32 %v1186_v52, %v7996_v54  ;;  %6390 = vmatpush3.bf16.msra.mxu0 %v9750_v55  ;;  %v1143_v8 = vld [vmem:[#allocation2 + $0xd0] sm:$0xf] }
 0x22e   : > { %v1284_v50 = vmax.f32 %v1187_v46, %v8003_v24  ;;  %v1285_v29 = vmax.f32 %v1188_v5, %v1237_v9  ;;  %v1094_v36 = vmax.f32 %v7921_v62, %v7980_v12  ;;  %v1189_v63 = vmax.f32 %v1093_v38, %v7996_v54  ;;  %v1240_v9 = vld [vmem:[#allocation2 + $0xe8] sm:$0xf] }
 0x22f   : > { %6019 = vmatprep.mubr.f32.mxu0 %v2017_v16  ;;  %v1728_v14 = vmax.f32 %v1583_v26, %v1631_v43  ;;  %v1380_v44 = vmax.f32 %v1283_v31, %v8043_v58  ;;  %2515 = vst [vmem:[#allocation2 + $0x92] sm:$0xff] %v2017_v16  ;;  %v1095_v7 = vmax.f32 %v998_v10, %v1047_v42  ;;  %v1337_v31 = vld [vmem:[#allocation2 + $0x100] sm:$0xf] }
 0x230   : > { %v1096_v59 = vmax.f32 %v7975_v39, %v7996_v54  ;;  %v1381_v17 = vmax.f32 %v1284_v50, %v8048_v11  ;;  %v1382_v48 = vmax.f32 %v1285_v29, %v1334_v3  ;;  %v1190_v22 = vmax.f32 %v1094_v36, %v8003_v24  ;;  %v1050_v36 = vld [vmem:[#allocation2 + $0xd0] sm:$0xf] }
 0x231   : > { %v1286_v62 = vmax.f32 %v1189_v63, %v8043_v58  ;;  %v1873_v23 = vmax.f32 %v1728_v14, %v1776_v60  ;;  %v1487_v61 = vrot.slane %v1380_v44, 1  ;;  %v1632_v37 = vrot.slane %v1380_v44, 2 }
 0x232   : > { %v1777_v20 = vrot.slane %v1380_v44, 3  ;;  %v1488_v32 = vrot.slane %v1381_v17, 1  ;;  %v1633_v18 = vrot.slane %v1381_v17, 2  ;;  %v1778_v34 = vrot.slane %v1381_v17, 3 }
 0x233   : > { %v1922_v35 = vrot.slane %v1380_v44, 4  ;;  %v2018_v1 = vmax.f32 %v1873_v23, %v1921_v56  ;;  %v1923_v25 = vrot.slane %v1381_v17, 4  ;;  %v1490_v15 = vrot.slane %v1382_v48, 1  ;;  %v1146_v23 = vld [vmem:[#allocation2 + $0xe8] sm:$0xf] }
 0x234   : > { %v1635_v33 = vrot.slane %v1382_v48, 2  ;;  %v1489_v39 = vsel %vm1461_vm0, %v1487_v61, %v1488_v32  ;;  %v1634_v51 = vsel %vm1606_vm1, %v1632_v37, %v1633_v18  ;;  %v1779_v40 = vsel %vm1751_vm2, %v1777_v20, %v1778_v34 }
 0x235   : > { %v1780_v49 = vrot.slane %v1382_v48, 3  ;;  %6020 = vmatmul.mubr.f32.gmra.mrb[40].mxu0 %v2018_v1  ;;  %v1584_v45 = vmax.f32 %v1380_v44, %v1489_v39  ;;  %v1924_v28 = vsel %vm1896_vm3, %v1922_v35, %v1923_v25  ;;  %v1491_v53 = vsel %vm1461_vm0, %v1488_v32, %v1490_v15  ;;  %2516 = vst [vmem:[#allocation2 + $0x9a] sm:$0xff] %v2018_v1 }
 0x236   : > { %v1636_v0 = vsel %vm1606_vm1, %v1633_v18, %v1635_v33  ;;  %v1585_v13 = vmax.f32 %v1381_v17, %v1491_v53  ;;  %v1925_v38 = vrot.slane %v1382_v48, 4  ;;  %v1287_v21 = vmax.f32 %v1190_v22, %v8048_v11  ;;  %v8084_v22 = vld [vmem:[#allocation2 + $0x108] sm:$0xff] }
 0x237   : > { %v1781_v57 = vsel %vm1751_vm2, %v1778_v34, %v1780_v49  ;;  %v1729_v47 = vmax.f32 %v1584_v45, %v1634_v51  ;;  %v1383_v30 = vmax.f32 %v1286_v62, %v8064_v27  ;;  %v1191_v2 = vmax.f32 %v1095_v7, %v1143_v8  ;;  %v1001_v62 = vld [vmem:[#allocation2 + $0xb8] sm:$0xf] }
 0x238   : > { %v1097_v41 = vmax.f32 %v7980_v12, %v8003_v24  ;;  %v1730_v6 = vmax.f32 %v1585_v13, %v1636_v0  ;;  %v1926_v52 = vsel %vm1896_vm3, %v1923_v25, %v1925_v38  ;;  %v1384_v46 = vmax.f32 %v1287_v21, %v8069_v19  ;;  %v8091_v25 = vld [vmem:[#allocation2 + $0x110] sm:$0xff]  ;;  %v1243_v0 = vld [vmem:[#allocation2 + $0x100] sm:$0xf] }
 0x239   : > { %v1192_v55 = vmax.f32 %v1096_v59, %v8043_v58  ;;  %v1874_v4 = vmax.f32 %v1729_v47, %v1779_v40  ;;  %v1492_v43 = vrot.slane %v1383_v30, 1  ;;  %v1637_v60 = vrot.slane %v1383_v30, 2 }
 0x23a   : > { %v1782_v5 = vrot.slane %v1383_v30, 3  ;;  %v1875_v42 = vmax.f32 %v1730_v6, %v1781_v57  ;;  %v1493_v16 = vrot.slane %v1384_v46, 1  ;;  %v1638_v26 = vrot.slane %v1384_v46, 2  ;;  %v1340_v6 = vld [vmem:[#allocation2 + $0x118] sm:$0xf] }
 0x23b   : > { %v1783_v56 = vrot.slane %v1384_v46, 3  ;;  %v2019_v3 = vmax.f32 %v1874_v4, %v1924_v28  ;;  %v1927_v50 = vrot.slane %v1383_v30, 4  ;;  %v1928_v12 = vrot.slane %v1384_v46, 4  ;;  %v1053_v4 = vld [vmem:[#allocation2 + $0xe8] sm:$0xf] }
 0x23c   : > { %v1288_v29 = vmax.f32 %v1191_v2, %v1240_v9  ;;  %v2020_v63 = vmax.f32 %v1875_v42, %v1926_v52  ;;  %v1494_v10 = vsel %vm1461_vm0, %v1492_v43, %v1493_v16  ;;  %v1639_v14 = vsel %vm1606_vm1, %v1637_v60, %v1638_v26  ;;  %v8102_v43 = vld [vmem:[#allocation2 + $0x30] sm:$0xff] }
 0x23d   : > { %v1784_v44 = vsel %vm1751_vm2, %v1782_v5, %v1783_v56  ;;  %6022 = vmatprep.mubr.f32.mxu0 %v2019_v3  ;;  %v1586_v7 = vmax.f32 %v1383_v30, %v1494_v10  ;;  %v1929_v59 = vsel %vm1896_vm3, %v1927_v50, %v1928_v12  ;;  %v1193_v48 = vmax.f32 %v1097_v41, %v8048_v11 }
 0x23e   : > { %v1385_v17 = vmax.f32 %v1288_v29, %v1337_v31  ;;  %2517 = vst [vmem:[#allocation2 + $0xaa] sm:$0xff] %v2019_v3  ;;  %6023 = vmatmul.mubr.f32.gmra.mrb[42].mxu0 %v2020_v63  ;;  %v1289_v61 = vmax.f32 %v1192_v55, %v8064_v27  ;;  %v1098_v37 = vmax.f32 %v1001_v62, %v1050_v36  ;;  %2518 = vst [vmem:[#allocation2 + $0xb2] sm:$0xff] %v2020_v63  ;;  %v8111_v29 = vld [vmem:[#allocation2 + $0x128] sm:$0xff]  ;;  %v1149_v36 = vld [vmem:[#allocation2 + $0x100] sm:$0xf] }
 0x23f   : > { %v1099_v20 = vmax.f32 %v7996_v54, %v8043_v58  ;;  %v1100_v32 = vmax.f32 %v8003_v24, %v8048_v11  ;;  %v1731_v18 = vmax.f32 %v1586_v7, %v1639_v14  ;;  %v1290_v33 = vmax.f32 %v1193_v48, %v8069_v19 }
 0x240   : > { %v1495_v34 = vrot.slane %v1385_v17, 1  ;;  %v1640_v35 = vrot.slane %v1385_v17, 2  ;;  %v1785_v1 = vrot.slane %v1385_v17, 3  ;;  %v1930_v15 = vrot.slane %v1385_v17, 4 }
 0x241   : > { %v1386_v39 = vmax.f32 %v1289_v61, %v8084_v22  ;;  %v1194_v51 = vmax.f32 %v1098_v37, %v1146_v23  ;;  %v1876_v40 = vmax.f32 %v1731_v18, %v1784_v44  ;;  %v1387_v28 = vmax.f32 %v1290_v33, %v8091_v25  ;;  %v1246_v33 = vld [vmem:[#allocation2 + $0x118] sm:$0xf] }
 0x242   : > { %v1496_v49 = vsel %vm1461_vm0, %v1493_v16, %v1495_v34  ;;  %v1641_v54 = vsel %vm1606_vm1, %v1638_v26, %v1640_v35  ;;  %v1786_v8 = vsel %vm1751_vm2, %v1783_v56, %v1785_v1  ;;  %v1931_v45 = vsel %vm1896_vm3, %v1928_v12, %v1930_v15  ;;  %v1004_v26 = vld [vmem:[#allocation2 + $0xd0] sm:$0xf]  ;;  %v8109_v12 = vld [vmem:[#allocation2 + $0x120] sm:$0xff] }
 0x243   : > { %v1587_v24 = vmax.f32 %v1384_v46, %v1496_v49  ;;  %v1497_v53 = vrot.slane %v1386_v39, 1  ;;  %v2021_v13 = vmax.f32 %v1876_v40, %v1929_v59  ;;  %v1642_v57 = vrot.slane %v1386_v39, 2 }
 0x244   : > { %v1787_v38 = vrot.slane %v1386_v39, 3  ;;  %v1932_v21 = vrot.slane %v1386_v39, 4  ;;  %v1498_v30 = vrot.slane %v1387_v28, 1  ;;  %v1643_v2 = vrot.slane %v1387_v28, 2 }
 0x245   : > { %v1732_v47 = vmax.f32 %v1587_v24, %v1641_v54  ;;  %v1788_v41 = vrot.slane %v1387_v28, 3  ;;  %6025 = vmatprep.mubr.f32.mxu0 %v2021_v13  ;;  %v1933_v52 = vrot.slane %v1387_v28, 4  ;;  %v1291_v9 = vmax.f32 %v1194_v51, %v1243_v0  ;;  %2519 = vst [vmem:[#allocation2 + $0xc2] sm:$0xff] %v2021_v13  ;;  %v8124_v54 = vld [vmem:[#allocation2 + $0x38] sm:$0xff]  ;;  %v1343_v0 = vld [vmem:[#allocation2 + $0x130] sm:$0xf] }
 0x246   : > { %v1195_v46 = vmax.f32 %v1099_v20, %v8064_v27  ;;  %v1196_v55 = vmax.f32 %v1100_v32, %v8069_v19  ;;  %v1499_v5 = vsel %vm1461_vm0, %v1497_v53, %v1498_v30  ;;  %v1644_v42 = vsel %vm1606_vm1, %v1642_v57, %v1643_v2  ;;  %v4956_v13 = vld [vmem:[#allocation12] sm:$0xff]  ;;  %v4957_v57 = vld [vmem:[#allocation12 + $0x8] sm:$0xff] }
 0x247   : > { %v1877_v60 = vmax.f32 %v1732_v47, %v1786_v8  ;;  %v1789_v16 = vsel %vm1751_vm2, %v1787_v38, %v1788_v41  ;;  %v1588_v56 = vmax.f32 %v1386_v39, %v1499_v5  ;;  %v1934_v31 = vsel %vm1896_vm3, %v1932_v21, %v1933_v52  ;;  %v8126_v8 = vld [vmem:[#allocation2 + $0x48] sm:$0xff] }
 0x248   : > { %v1388_v3 = vmax.f32 %v1291_v9, %v1340_v6  ;;  %v1292_v50 = vmax.f32 %v1195_v46, %v8084_v22  ;;  %v1293_v10 = vmax.f32 %v1196_v55, %v8091_v25  ;;  %v1101_v14 = vmax.f32 %v1004_v26, %v1053_v4 }
 0x249   : > { %v2022_v63 = vmax.f32 %v1877_v60, %v1931_v45  ;;  %v1733_v44 = vmax.f32 %v1588_v56, %v1644_v42  ;;  %v2827_v9 = vmax.f32 %v8102_v43, %v8126_v8  ;;  %v8140_v60 = vld [vmem:[#allocation2 + $0x68] sm:$0xff]  ;;  %v8142_v5 = vpack.c.bf16 %v4957_v57, %v4956_v13  ;;  %v8185_v57 = vld [vmem:[#allocation2 + $0x138] sm:$0xff] }
 0x24a   : > { %v1500_v7 = vrot.slane %v1388_v3, 1  ;;  %v1645_v59 = vrot.slane %v1388_v3, 2  ;;  %v1790_v17 = vrot.slane %v1388_v3, 3  ;;  %v1935_v48 = vrot.slane %v1388_v3, 4 }
 0x24b   : > { %6026 = vmatmul.mubr.f32.gmra.mrb[44].mxu0 %v2022_v63  ;;  %v1389_v62 = vmax.f32 %v1292_v50, %v8109_v12  ;;  %v8116_v23 = vmax.f32 %v1293_v10, %v8111_v29  ;;  %v1197_v61 = vmax.f32 %v1101_v14, %v1149_v36  ;;  %2520 = vst [vmem:[#allocation2 + $0xca] sm:$0xff] %v2022_v63  ;;  %v1007_v63 = vld [vmem:[#allocation2 + $0xe8] sm:$0xf] }
 0x24c   : > { %v1878_v37 = vmax.f32 %v1733_v44, %v1789_v16  ;;  %v1501_v20 = vsel %vm1461_vm0, %v1498_v30, %v1500_v7  ;;  %v1646_v32 = vsel %vm1606_vm1, %v1643_v2, %v1645_v59  ;;  %v1791_v18 = vsel %vm1751_vm2, %v1788_v41, %v1790_v17  ;;  %v8132_v2 = vld [vmem:[#allocation2 + $0x50] sm:$0xff]  ;;  %v8134_v41 = vld [vmem:[#allocation2 + $0x60] sm:$0xff]  ;;  %6424 = vmatprep.subr.bf16.mxu1 %v8142_v5 }
 0x24d   : > { %v1589_v34 = vmax.f32 %v1387_v28, %v1501_v20  ;;  %v1936_v35 = vsel %vm1896_vm3, %v1933_v52, %v1935_v48  ;;  %v1502_v1 = vrot.slane %v1389_v62, 1  ;;  %v1503_v15 = vrot.slane %v8116_v23, 1 }
 0x24e   : > { %v2023_v39 = vmax.f32 %v1878_v37, %v1934_v31  ;;  %v1647_v51 = vrot.slane %v1389_v62, 2  ;;  %v1648_v40 = vrot.slane %v8116_v23, 2  ;;  %v1792_v49 = vrot.slane %v1389_v62, 3 }
 0x24f   : > { %v1734_v24 = vmax.f32 %v1589_v34, %v1646_v32  ;;  %v1504_v45 = vsel %vm1461_vm0, %v1502_v1, %v1503_v15  ;;  %v1793_v28 = vrot.slane %v8116_v23, 3  ;;  %v1937_v53 = vrot.slane %v1389_v62, 4  ;;  %v1056_v32 = vld [vmem:[#allocation2 + $0x100] sm:$0xf] }
 0x250   : > { %6028 = vmatprep.mubr.f32.mxu0 %v2023_v39  ;;  %v1590_v38 = vmax.f32 %v1389_v62, %v1504_v45  ;;  %v1649_v21 = vsel %vm1606_vm1, %v1647_v51, %v1648_v40  ;;  %v1938_v47 = vrot.slane %v8116_v23, 4  ;;  %v1294_v30 = vmax.f32 %v1197_v61, %v1246_v33  ;;  %2521 = vst [vmem:[#allocation2 + $0xda] sm:$0xff] %v2023_v39 }
 0x251   : > { %v1879_v6 = vmax.f32 %v1734_v24, %v1791_v18  ;;  %v1794_v52 = vsel %vm1751_vm2, %v1792_v49, %v1793_v28  ;;  %v2828_v16 = vmax.f32 %v8124_v54, %v8132_v2  ;;  %v8147_v26 = vmax.f32 %v2827_v9, %v8134_v41  ;;  %v8191_v9 = vld [vmem:[#allocation2 + $0x140] sm:$0xff] }
 0x252   : > { %v1735_v46 = vmax.f32 %v1590_v38, %v1649_v21  ;;  %v1939_v55 = vsel %vm1896_vm3, %v1937_v53, %v1938_v47  ;;  %v1391_v4 = vmax.f32 %v1294_v30, %v1343_v0  ;;  %v1102_v56 = vmax.f32 %v8043_v58, %v8064_v27  ;;  %v1152_v53 = vld [vmem:[#allocation2 + $0x118] sm:$0xf] }
 0x253   : > { %v2024_v42 = vmax.f32 %v1879_v6, %v1936_v35  ;;  %v8153_v14 = vmax.f32 %v2828_v16, %v8140_v60  ;;  %v3019_v44 = vrot.slane %v8147_v26, 1  ;;  %v3163_v7 = vrot.slane %v8147_v26, 2  ;;  %v9752_v38 = vld [vmem:[#allocation27_spill] sm:$0xff] }
 0x254   : > { %v1880_v31 = vmax.f32 %v1735_v46, %v1794_v52  ;;  %v1505_v3 = vrot.slane %v1391_v4, 1  ;;  %v1650_v50 = vrot.slane %v1391_v4, 2  ;;  %v1795_v36 = vrot.slane %v1391_v4, 3  ;;  %v2877_v46 = vld [vmem:[#allocation2 + $0x70] sm:$0xf] }
 0x255   : > { %6029 = vmatmul.mubr.f32.gmra.mrb[46].mxu0 %v2024_v42  ;;  %v1940_v10 = vrot.slane %v1391_v4, 4  ;;  %2522 = vst [vmem:[#allocation2 + $0xe2] sm:$0xff] %v2024_v42  ;;  %v3020_v37 = vrot.slane %v8153_v14, 1  ;;  %v3164_v20 = vrot.slane %v8153_v14, 2  ;;  %v3307_v18 = vrot.slane %v8147_v26, 3  ;;  %v6926_v4 = vld [vmem:[#allocation2] sm:$0xff] }
 0x256   : > { %v2025_v59 = vmax.f32 %v1880_v31, %v1939_v55  ;;  %v1506_v58 = vsel %vm1461_vm0, %v1503_v15, %v1505_v3  ;;  %v1651_v17 = vsel %vm1606_vm1, %v1648_v40, %v1650_v50  ;;  %v1796_v48 = vsel %vm1751_vm2, %v1793_v28, %v1795_v36  ;;  %v2685_v15 = vld [vmem:[#allocation2 + $0x40] sm:$0xf]  ;;  %v2781_v28 = vld [vmem:[#allocation2 + $0x58] sm:$0xf]  ;;  %v1249_v55 = vld [vmem:[#allocation2 + $0x130] sm:$0xf] }
 0x257   : > { %v1591_v62 = vmax.f32 %v8116_v23, %v1506_v58  ;;  %v1941_v61 = vsel %vm1896_vm3, %v1938_v47, %v1940_v10  ;;  %v3308_v34 = vrot.slane %v8153_v14, 3  ;;  %v3451_v35 = vrot.slane %v8147_v26, 4 }
 0x258   : > { %6031 = vmatprep.mubr.f32.mxu0 %v2025_v59  ;;  %v3452_v1 = vrot.slane %v8153_v14, 4  ;;  %2523 = vst [vmem:[#allocation2 + $0xf2] sm:$0xff] %v2025_v59  ;;  %v3021_v23 = vsel %vm1461_vm0, %v3019_v44, %v3020_v37  ;;  %v3165_v39 = vsel %vm1606_vm1, %v3163_v7, %v3164_v20  ;;  %v1103_v51 = vmax.f32 %v8048_v11, %v8069_v19  ;;  %v9751_v11 = vld [vmem:[#allocation26_spill] sm:$0xff]  ;;  %v8199_v7 = vld [vmem:[#allocation2 + $0x100] sm:$0xf] }
 0x259   : > { %v1736_v33 = vmax.f32 %v1591_v62, %v1651_v17  ;;  %v3131_v40 = vmax.f32 %v8147_v26, %v3021_v23  ;;  %v3309_v49 = vsel %vm1751_vm2, %v3307_v18, %v3308_v34  ;;  %v1198_v45 = vmax.f32 %v1102_v56, %v8084_v22 }
 0x25a   : > { %v3453_v24 = vsel %vm1896_vm3, %v3451_v35, %v3452_v1  ;;  %v1199_v13 = vmax.f32 %v1103_v51, %v8091_v25  ;;  %v9753_v21 = vmax.f32 %v9751_v11, %v9752_v38  ;;  %v1104_v30 = vmax.f32 %v1007_v63, %v1056_v32 }
 0x25b   : > { %v1881_v0 = vmax.f32 %v1736_v33, %v1796_v48  ;;  %v3275_v6 = vmax.f32 %v3131_v40, %v3165_v39  ;;  %v1295_v52 = vmax.f32 %v1198_v45, %v8109_v12  ;;  %v2638_v42 = vmax.f32 %v6926_v4, %v8102_v43  ;;  %v1346_v40 = vld [vmem:[#allocation2 + $0x148] sm:$0xf] }
 0x25c   : > { %v2733_v47 = vmax.f32 %v9753_v21, %v2685_v15  ;;  %v2639_v16 = vmax.f32 %v6926_v4, %v8124_v54  ;;  %v1296_v31 = vmax.f32 %v1199_v13, %v8111_v29  ;;  %v1200_v50 = vmax.f32 %v1104_v30, %v1152_v53 }
 0x25d   : > { %v2026_v56 = vmax.f32 %v1881_v0, %v1941_v61  ;;  %v3419_v36 = vmax.f32 %v3275_v6, %v3309_v49  ;;  %v1392_v63 = vmax.f32 %v1295_v52, %v8185_v57  ;;  %v2734_v10 = vmax.f32 %v2638_v42, %v8126_v8  ;;  %v8227_v6 = vld [vmem:[#allocation2 + $0x78] sm:$0xff]  ;;  %v8229_v52 = vld [vmem:[#allocation2 + $0x80] sm:$0xff] }
 0x25e   : > { %v2829_v3 = vmax.f32 %v2733_v47, %v2781_v28  ;;  %v2735_v44 = vmax.f32 %v2639_v16, %v8132_v2  ;;  %v8202_v59 = vmax.f32 %v1296_v31, %v8191_v9  ;;  %v1297_v54 = vmax.f32 %v1200_v50, %v1249_v55 }
 0x25f   : > { %6032 = vmatmul.mubr.f32.gmra.mrb[48].mxu0 %v2026_v56  ;;  %v1105_v58 = vmax.f32 %v8064_v27, %v8084_v22  ;;  %2524 = vst [vmem:[#allocation2 + $0xfa] sm:$0xff] %v2026_v56  ;;  %v3563_v17 = vmax.f32 %v3419_v36, %v3453_v24  ;;  %v1507_v48 = vrot.slane %v1392_v63, 1  ;;  %v1652_v62 = vrot.slane %v1392_v63, 2 }
 0x260   : > { %v2925_v43 = vmax.f32 %v2829_v3, %v2877_v46  ;;  %v1797_v61 = vrot.slane %v1392_v63, 3  ;;  %v1508_v32 = vrot.slane %v8202_v59, 1  ;;  %v1653_v18 = vrot.slane %v8202_v59, 2 }
 0x261   : > { %v1798_v35 = vrot.slane %v8202_v59, 3  ;;  %v1942_v15 = vrot.slane %v1392_v63, 4  ;;  %6167 = vmatprep.mubr.f32.mxu1 %v3563_v17  ;;  %v1943_v33 = vrot.slane %v8202_v59, 4  ;;  %3868 = vst [vmem:[#allocation2 + $0x32] sm:$0xff] %v3563_v17  ;;  %v1394_v30 = vmax.f32 %v1297_v54, %v1346_v40  ;;  %v2544_v17 = vld [vmem:[#allocation2 + $0x28] sm:$0xf] }
 0x262   : > { %v3022_v23 = vrot.slane %v2925_v43, 1  ;;  %v3166_v39 = vrot.slane %v2925_v43, 2  ;;  %v3310_v51 = vrot.slane %v2925_v43, 3  ;;  %v1509_v49 = vsel %vm1461_vm0, %v1507_v48, %v1508_v32  ;;  %v1059_v48 = vld [vmem:[#allocation2 + $0x118] sm:$0xf] }
 0x263   : > { %v1654_v24 = vsel %vm1606_vm1, %v1652_v62, %v1653_v18  ;;  %v1799_v45 = vsel %vm1751_vm2, %v1797_v61, %v1798_v35  ;;  %v3454_v28 = vrot.slane %v2925_v43, 4  ;;  %v1592_v53 = vmax.f32 %v1392_v63, %v1509_v49 }
 0x264   : > { %v1944_v0 = vsel %vm1896_vm3, %v1942_v15, %v1943_v33  ;;  %v3023_v13 = vsel %vm1461_vm0, %v3020_v37, %v3022_v23  ;;  %v3167_v11 = vsel %vm1606_vm1, %v3164_v20, %v3166_v39  ;;  %v3311_v21 = vsel %vm1751_vm2, %v3308_v34, %v3310_v51  ;;  %v2592_v39 = vld [vmem:[#allocation2 + $0x40] sm:$0xf] }
 0x265   : > { %v3132_v38 = vmax.f32 %v8153_v14, %v3023_v13  ;;  %v3455_v47 = vsel %vm1896_vm3, %v3452_v1, %v3454_v28  ;;  %v1737_v37 = vmax.f32 %v1592_v53, %v1654_v24  ;;  %v2830_v46 = vmax.f32 %v2734_v10, %v8134_v41  ;;  %v8265_v13 = vld [vmem:[#allocation2 + $0x150] sm:$0xff] }
 0x266   : > { %v2831_v20 = vmax.f32 %v2735_v44, %v8140_v60  ;;  %v1106_v55 = vmax.f32 %v8069_v19, %v8091_v25  ;;  %v1510_v42 = vrot.slane %v1394_v30, 1  ;;  %v1655_v34 = vrot.slane %v1394_v30, 2 }
 0x267   : > { %v3276_v4 = vmax.f32 %v3132_v38, %v3167_v11  ;;  %v1800_v16 = vrot.slane %v1394_v30, 3  ;;  %v1882_v56 = vmax.f32 %v1737_v37, %v1799_v45  ;;  %v1945_v31 = vrot.slane %v1394_v30, 4  ;;  %v2688_v11 = vld [vmem:[#allocation2 + $0x58] sm:$0xf]  ;;  %v1155_v38 = vld [vmem:[#allocation2 + $0x130] sm:$0xf] }
 0x268   : > { %v2926_v1 = vmax.f32 %v2830_v46, %v8227_v6  ;;  %v8237_v3 = vmax.f32 %v2831_v20, %v8229_v52  ;;  %v1511_v36 = vsel %vm1461_vm0, %v1508_v32, %v1510_v42  ;;  %v1656_v63 = vsel %vm1606_vm1, %v1653_v18, %v1655_v34  ;;  %v4958_v30 = vld [vmem:[#allocation12 + $0x10] sm:$0xff]  ;;  %v4959_v37 = vld [vmem:[#allocation12 + $0x18] sm:$0xff] }
 0x269   : > { %v3420_v50 = vmax.f32 %v3276_v4, %v3311_v21  ;;  %v1801_v10 = vsel %vm1751_vm2, %v1798_v35, %v1800_v16  ;;  %v2027_v44 = vmax.f32 %v1882_v56, %v1944_v0  ;;  %v1593_v19 = vmax.f32 %v8202_v59, %v1511_v36  ;;  %v8247_v59 = vld [vmem:[#allocation2 + $0x40] sm:$0xf]  ;;  %v8271_v21 = vld [vmem:[#allocation2 + $0x158] sm:$0xff] }
 0x26a   : > { %v1946_v43 = vsel %vm1896_vm3, %v1943_v33, %v1945_v31  ;;  %v3024_v54 = vrot.slane %v2926_v1, 1  ;;  %v3025_v61 = vrot.slane %v8237_v3, 1  ;;  %v3168_v15 = vrot.slane %v2926_v1, 2  ;;  %v8276_v16 = vld [vmem:[#allocation2 + $0x118] sm:$0xf] }
 0x26b   : > { %v3564_v62 = vmax.f32 %v3420_v50, %v3455_v47  ;;  %v3169_v23 = vrot.slane %v8237_v3, 2  ;;  %6034 = vmatprep.mubr.f32.mxu0 %v2027_v44  ;;  %v1738_v32 = vmax.f32 %v1593_v19, %v1656_v63  ;;  %v3312_v18 = vrot.slane %v2926_v1, 3  ;;  %2525 = vst [vmem:[#allocation2 + $0x10a] sm:$0xff] %v2027_v44  ;;  %v1252_v50 = vld [vmem:[#allocation2 + $0x148] sm:$0xf] }
 0x26c   : > { %v3313_v35 = vrot.slane %v8237_v3, 3  ;;  %v3456_v51 = vrot.slane %v2926_v1, 4  ;;  %v3026_v33 = vsel %vm1461_vm0, %v3024_v54, %v3025_v61  ;;  %v3457_v49 = vrot.slane %v8237_v3, 4  ;;  %v1349_v19 = vld [vmem:[#allocation2 + $0x160] sm:$0xf] }
 0x26d   : > { %6168 = vmatmul.mubr.f32.vlgmr.msra.gmra.mrb[16].mxu1 %v3564_v62  ;;  %v3170_v40 = vsel %vm1606_vm1, %v3168_v15, %v3169_v23  ;;  %v1201_v24 = vmax.f32 %v1105_v58, %v8109_v12  ;;  %3869 = vst [vmem:[#allocation2 + $0x3a] sm:$0xff] %v3564_v62  ;;  %v1883_v45 = vmax.f32 %v1738_v32, %v1801_v10  ;;  %v2880_v62 = vld [vmem:[#allocation2 + $0x88] sm:$0xf] }
 0x26e   : > { %6426 = vmatpush3.bf16.msra.mxu1 %v8142_v5  ;;  %v3133_v28 = vmax.f32 %v2926_v1, %v3026_v33  ;;  %v3314_v53 = vsel %vm1751_vm2, %v3312_v18, %v3313_v35  ;;  %v1202_v0 = vmax.f32 %v1106_v55, %v8111_v29  ;;  %v3458_v27 = vsel %vm1896_vm3, %v3456_v51, %v3457_v49  ;;  %v2784_v1 = vld [vmem:[#allocation2 + $0x70] sm:$0xf] }
 0x26f   : > { %v1298_v58 = vmax.f32 %v1201_v24, %v8185_v57  ;;  %v2640_v5 = vmax.f32 %v2544_v17, %v2592_v39  ;;  %v1107_v47 = vmax.f32 %v8199_v7, %v1059_v48  ;;  %v2028_v46 = vmax.f32 %v1883_v45, %v1946_v43  ;;  %v8285_v18 = vld [vmem:[#allocation2 + $0x90] sm:$0xff] }
 0x270   : > { %v3277_v20 = vmax.f32 %v3133_v28, %v3170_v40  ;;  %v1299_v55 = vmax.f32 %v1202_v0, %v8191_v9  ;;  %v6427_v7 = vpack.c.bf16 %v4959_v37, %v4958_v30  ;;  %v2833_v24 = vmax.f32 %v8147_v26, %v8227_v6 }
 0x271   : > { %v1395_v4 = vmax.f32 %v1298_v58, %v8265_v13  ;;  %v2736_v42 = vmax.f32 %v2640_v5, %v2688_v11  ;;  %v1203_v34 = vmax.f32 %v1107_v47, %v1155_v38  ;;  %6035 = vmatmul.mubr.f32.gmra.mrb[50].mxu0 %v2028_v46  ;;  %2526 = vst [vmem:[#allocation2 + $0x112] sm:$0xff] %v2028_v46 }
 0x272   : > { %v3421_v56 = vmax.f32 %v3277_v20, %v3314_v53  ;;  %v8279_v31 = vmax.f32 %v1299_v55, %v8271_v21  ;;  %6428 = vmatprep.subr.bf16.mxu1 %v6427_v7  ;;  %v2834_v11 = vmax.f32 %v8153_v14, %v8229_v52  ;;  %v8296_v38 = vmax.f32 %v2833_v24, %v8285_v18 }
 0x273   : > { %v1512_v36 = vrot.slane %v1395_v4, 1  ;;  %v1657_v63 = vrot.slane %v1395_v4, 2  ;;  %v1802_v10 = vrot.slane %v1395_v4, 3  ;;  %v1947_v44 = vrot.slane %v1395_v4, 4  ;;  %6430 = vmatpush3.bf16.msra.mxu1 %v6427_v7 }
 0x274   : > { %v3565_v43 = vmax.f32 %v3421_v56, %v3458_v27  ;;  %v1513_v54 = vrot.slane %v8279_v31, 1  ;;  %v1658_v17 = vrot.slane %v8279_v31, 2  ;;  %v1803_v48 = vrot.slane %v8279_v31, 3 }
 0x275   : > { %v1948_v15 = vrot.slane %v8279_v31, 4  ;;  %v2832_v39 = vmax.f32 %v2736_v42, %v2784_v1  ;;  %v1300_v32 = vmax.f32 %v1203_v34, %v1252_v50  ;;  %v1108_v27 = vmax.f32 %v8084_v22, %v8109_v12  ;;  %v8311_v42 = vld [vmem:[#allocation2 + $0x98] sm:$0xff] }
 0x276   : > { %6170 = vmatprep.mubr.f32.mxu1 %v3565_v43  ;;  %v1514_v51 = vsel %vm1461_vm0, %v1512_v36, %v1513_v54  ;;  %v1659_v33 = vsel %vm1606_vm1, %v1657_v63, %v1658_v17  ;;  %v1804_v40 = vsel %vm1751_vm2, %v1802_v10, %v1803_v48  ;;  %3870 = vst [vmem:[#allocation2 + $0x4a] sm:$0xff] %v3565_v43  ;;  %v3029_v10 = vrot.slane %v8296_v38, 1 }
 0x277   : > { %v1594_v45 = vmax.f32 %v1395_v4, %v1514_v51  ;;  %v1949_v28 = vsel %vm1896_vm3, %v1947_v44, %v1948_v15  ;;  %v2928_v53 = vmax.f32 %v2832_v39, %v2880_v62  ;;  %v1397_v0 = vmax.f32 %v1300_v32, %v1349_v19 }
 0x278   : > { %v1109_v58 = vmax.f32 %v8091_v25, %v8111_v29  ;;  %v3317_v19 = vrot.slane %v8296_v38, 3  ;;  %v3461_v43 = vrot.slane %v8296_v38, 4  ;;  %v1204_v32 = vmax.f32 %v1108_v27, %v8185_v57 }
 0x279   : > { %v1739_v5 = vmax.f32 %v1594_v45, %v1659_v33  ;;  %v3027_v26 = vrot.slane %v2928_v53, 1  ;;  %v3171_v47 = vrot.slane %v2928_v53, 2  ;;  %v3315_v30 = vrot.slane %v2928_v53, 3  ;;  %v1062_v33 = vld [vmem:[#allocation2 + $0x130] sm:$0xf] }
 0x27a   : > { %v3459_v37 = vrot.slane %v2928_v53, 4  ;;  %v1515_v46 = vrot.slane %v1397_v0, 1  ;;  %v1660_v20 = vrot.slane %v1397_v0, 2  ;;  %v1805_v55 = vrot.slane %v1397_v0, 3  ;;  %v8344_v53 = vld [vmem:[#allocation2 + $0x168] sm:$0xff] }
 0x27b   : > { %v1884_v4 = vmax.f32 %v1739_v5, %v1804_v40  ;;  %v3028_v14 = vsel %vm1461_vm0, %v3025_v61, %v3027_v26  ;;  %v3172_v22 = vsel %vm1606_vm1, %v3169_v23, %v3171_v47  ;;  %v3316_v25 = vsel %vm1751_vm2, %v3313_v35, %v3315_v30  ;;  %v8351_v26 = vld [vmem:[#allocation2 + $0x170] sm:$0xff]  ;;  %v8353_v30 = vld [vmem:[#allocation2 + $0x58] sm:$0xf] }
 0x27c   : > { %v3134_v34 = vmax.f32 %v8237_v3, %v3028_v14  ;;  %v3460_v56 = vsel %vm1896_vm3, %v3457_v49, %v3459_v37  ;;  %v1516_v1 = vsel %vm1461_vm0, %v1513_v54, %v1515_v46  ;;  %v1661_v61 = vsel %vm1606_vm1, %v1658_v17, %v1660_v20  ;;  %v2691_v47 = vld [vmem:[#allocation2 + $0x70] sm:$0xf] }
 0x27d   : > { %v2029_v50 = vmax.f32 %v1884_v4, %v1949_v28  ;;  %v1595_v7 = vmax.f32 %v8279_v31, %v1516_v1  ;;  %v1806_v23 = vsel %vm1751_vm2, %v1803_v48, %v1805_v55  ;;  %v1950_v36 = vrot.slane %v1397_v0, 4  ;;  %v1158_v0 = vld [vmem:[#allocation2 + $0x148] sm:$0xf]  ;;  %v8360_v55 = vld [vmem:[#allocation2 + $0x130] sm:$0xf] }
 0x27e   : > { %v3278_v63 = vmax.f32 %v3134_v34, %v3172_v22  ;;  %v8322_v35 = vmax.f32 %v2834_v11, %v8311_v42  ;;  %v3173_v3 = vrot.slane %v8296_v38, 2  ;;  %v1205_v51 = vmax.f32 %v1109_v58, %v8191_v9  ;;  %v2787_v34 = vld [vmem:[#allocation2 + $0x88] sm:$0xf] }
 0x27f   : > { %6037 = vmatprep.mubr.f32.mxu0 %v2029_v50  ;;  %v1740_v49 = vmax.f32 %v1595_v7, %v1661_v61  ;;  %v1951_v44 = vsel %vm1896_vm3, %v1948_v15, %v1950_v36  ;;  %2527 = vst [vmem:[#allocation2 + $0x122] sm:$0xff] %v2029_v50  ;;  %v2595_v15 = vld [vmem:[#allocation2 + $0x58] sm:$0xf]  ;;  %v1301_v5 = vmax.f32 %v1204_v32, %v8265_v13 }
 0x280   : > { %v3422_v31 = vmax.f32 %v3278_v63, %v3316_v25  ;;  %v3030_v54 = vrot.slane %v8322_v35, 1  ;;  %v3174_v17 = vrot.slane %v8322_v35, 2  ;;  %v3318_v48 = vrot.slane %v8322_v35, 3  ;;  %v1352_v36 = vld [vmem:[#allocation2 + $0x178] sm:$0xf] }
 0x281   : > { %v1885_v62 = vmax.f32 %v1740_v49, %v1806_v23  ;;  %v3462_v39 = vrot.slane %v8322_v35, 4  ;;  %v1302_v37 = vmax.f32 %v1205_v51, %v8271_v21  ;;  %v2643_v46 = vmax.f32 %v8247_v59, %v2595_v15 }
 0x282   : > { %v3566_v40 = vmax.f32 %v3422_v31, %v3460_v56  ;;  %v3031_v24 = vsel %vm1461_vm0, %v3029_v10, %v3030_v54  ;;  %v3175_v45 = vsel %vm1606_vm1, %v3173_v3, %v3174_v17  ;;  %v3319_v28 = vsel %vm1751_vm2, %v3317_v19, %v3318_v48  ;;  %v1255_v56 = vld [vmem:[#allocation2 + $0x160] sm:$0xf] }
 0x283   : > { %v2030_v11 = vmax.f32 %v1885_v62, %v1951_v44  ;;  %v3135_v27 = vmax.f32 %v8296_v38, %v3031_v24  ;;  %v3463_v58 = vsel %vm1896_vm3, %v3461_v43, %v3462_v39  ;;  %v1110_v20 = vmax.f32 %v8276_v16, %v1062_v33  ;;  %v2883_v3 = vld [vmem:[#allocation2 + $0xa0] sm:$0xf] }
 0x284   : > { %6171 = vmatmul.mubr.f32.gmra.mrb[18].mxu1 %v3566_v40  ;;  %v2644_v38 = vmax.f32 %v8126_v8, %v8134_v41  ;;  %3871 = vst [vmem:[#allocation2 + $0x52] sm:$0xff] %v3566_v40  ;;  %v1398_v14 = vmax.f32 %v1301_v5, %v8344_v53  ;;  %v2645_v22 = vmax.f32 %v8132_v2, %v8140_v60 }
 0x285   : > { %6038 = vmatmul.mubr.f32.gmra.mrb[52].mxu0 %v2030_v11  ;;  %v3279_v4 = vmax.f32 %v3135_v27, %v3175_v45  ;;  %v1111_v25 = vmax.f32 %v8109_v12, %v8185_v57  ;;  %2528 = vst [vmem:[#allocation2 + $0x12a] sm:$0xff] %v2030_v11  ;;  %v8368_v59 = vmax.f32 %v1302_v37, %v8351_v26 }
 0x286   : > { %v2739_v16 = vmax.f32 %v2643_v46, %v2691_v47  ;;  %v1206_v8 = vmax.f32 %v1110_v20, %v1158_v0  ;;  %v2740_v1 = vmax.f32 %v2644_v38, %v8227_v6  ;;  %v1517_v50 = vrot.slane %v1398_v14, 1 }
 0x287   : > { %v3423_v61 = vmax.f32 %v3279_v4, %v3319_v28  ;;  %v1662_v7 = vrot.slane %v1398_v14, 2  ;;  %v1807_v23 = vrot.slane %v1398_v14, 3  ;;  %v1518_v2 = vrot.slane %v8368_v59, 1 }
 0x288   : > { %v1663_v63 = vrot.slane %v8368_v59, 2  ;;  %v1808_v12 = vrot.slane %v8368_v59, 3  ;;  %v1952_v10 = vrot.slane %v1398_v14, 4  ;;  %v1953_v44 = vrot.slane %v8368_v59, 4 }
 0x289   : > { %v3567_v49 = vmax.f32 %v3423_v61, %v3463_v58  ;;  %v2835_v19 = vmax.f32 %v2739_v16, %v2787_v34  ;;  %v1303_v43 = vmax.f32 %v1206_v8, %v1255_v56  ;;  %v1519_v31 = vsel %vm1461_vm0, %v1517_v50, %v1518_v2  ;;  %v8396_v16 = vld [vmem:[#allocation2 + $0xb0] sm:$0xff] }
 0x28a   : > { %v1664_v62 = vsel %vm1606_vm1, %v1662_v7, %v1663_v63  ;;  %v1809_v32 = vsel %vm1751_vm2, %v1807_v23, %v1808_v12  ;;  %v2741_v51 = vmax.f32 %v2645_v22, %v8229_v52  ;;  %v1596_v15 = vmax.f32 %v1398_v14, %v1519_v31 }
 0x28b   : > { %6173 = vmatprep.mubr.f32.mxu1 %v3567_v49  ;;  %v1954_v33 = vsel %vm1896_vm3, %v1952_v10, %v1953_v44  ;;  %v2931_v40 = vmax.f32 %v2835_v19, %v2883_v3  ;;  %v1400_v24 = vmax.f32 %v1303_v43, %v1352_v36  ;;  %3872 = vst [vmem:[#allocation2 + $0x62] sm:$0xff] %v3567_v49 }
 0x28c   : > { %v2836_v45 = vmax.f32 %v2740_v1, %v8285_v18  ;;  %v2837_v28 = vmax.f32 %v2741_v51, %v8311_v42  ;;  %v1112_v0 = vmax.f32 %v8111_v29, %v8191_v9  ;;  %v1207_v11 = vmax.f32 %v1111_v25, %v8265_v13  ;;  %v8394_v25 = vld [vmem:[#allocation2 + $0xa8] sm:$0xff]  ;;  %v2598_v1 = vld [vmem:[#allocation2 + $0x70] sm:$0xf] }
 0x28d   : > { %v1741_v27 = vmax.f32 %v1596_v15, %v1664_v62  ;;  %v3032_v58 = vrot.slane %v2931_v40, 1  ;;  %v3176_v5 = vrot.slane %v2931_v40, 2  ;;  %v3320_v47 = vrot.slane %v2931_v40, 3  ;;  %v2694_v51 = vld [vmem:[#allocation2 + $0x88] sm:$0xf] }
 0x28e   : > { %v3464_v37 = vrot.slane %v2931_v40, 4  ;;  %v1520_v46 = vrot.slane %v1400_v24, 1  ;;  %v1665_v20 = vrot.slane %v1400_v24, 2  ;;  %v1810_v38 = vrot.slane %v1400_v24, 3  ;;  %v1065_v40 = vld [vmem:[#allocation2 + $0x148] sm:$0xf] }
 0x28f   : > { %v1886_v4 = vmax.f32 %v1741_v27, %v1809_v32  ;;  %v3033_v14 = vsel %vm1461_vm0, %v3030_v54, %v3032_v58  ;;  %v3177_v22 = vsel %vm1606_vm1, %v3174_v17, %v3176_v5  ;;  %v3321_v29 = vsel %vm1751_vm2, %v3318_v48, %v3320_v47  ;;  %v8417_v32 = vld [vmem:[#allocation2 + $0x180] sm:$0xff]  ;;  %v8431_v27 = vld [vmem:[#allocation2 + $0x70] sm:$0xf] }
 0x290   : > { %v3136_v34 = vmax.f32 %v8322_v35, %v3033_v14  ;;  %v3465_v8 = vsel %vm1896_vm3, %v3462_v39, %v3464_v37  ;;  %v1521_v54 = vsel %vm1461_vm0, %v1518_v2, %v1520_v46  ;;  %v1666_v56 = vsel %vm1606_vm1, %v1663_v63, %v1665_v20  ;;  %v2790_v46 = vld [vmem:[#allocation2 + $0xa0] sm:$0xf] }
 0x291   : > { %v2031_v17 = vmax.f32 %v1886_v4, %v1954_v33  ;;  %v1597_v61 = vmax.f32 %v8368_v59, %v1521_v54  ;;  %v1811_v48 = vsel %vm1751_vm2, %v1808_v12, %v1810_v38  ;;  %v1955_v50 = vrot.slane %v1400_v24, 4  ;;  %v1161_v20 = vld [vmem:[#allocation2 + $0x160] sm:$0xf]  ;;  %v8438_v38 = vld [vmem:[#allocation2 + $0x148] sm:$0xf] }
 0x292   : > { %v3280_v7 = vmax.f32 %v3136_v34, %v3177_v22  ;;  %v2932_v23 = vmax.f32 %v2836_v45, %v8394_v25  ;;  %v8408_v36 = vmax.f32 %v2837_v28, %v8396_v16  ;;  %v1208_v35 = vmax.f32 %v1112_v0, %v8271_v21  ;;  %v1258_v22 = vld [vmem:[#allocation2 + $0x178] sm:$0xf] }
 0x293   : > { %6040 = vmatprep.mubr.f32.mxu0 %v2031_v17  ;;  %v1742_v39 = vmax.f32 %v1597_v61, %v1666_v56  ;;  %v1956_v2 = vsel %vm1896_vm3, %v1953_v44, %v1955_v50  ;;  %v1304_v63 = vmax.f32 %v1207_v11, %v8344_v53  ;;  %v2646_v10 = vmax.f32 %v8353_v30, %v2598_v1  ;;  %v8429_v11 = vld [vmem:[#allocation2 + $0x188] sm:$0xff] }
 0x294   : > { %2529 = vst [vmem:[#allocation2 + $0x13a] sm:$0xff] %v2031_v17  ;;  %v3424_v59 = vmax.f32 %v3280_v7, %v3321_v29  ;;  %v3034_v12 = vrot.slane %v2932_v23, 1  ;;  %v3035_v3 = vrot.slane %v8408_v36, 1  ;;  %v3178_v49 = vrot.slane %v2932_v23, 2  ;;  %v2886_v17 = vld [vmem:[#allocation2 + $0xb8] sm:$0xf] }
 0x295   : > { %v1887_v19 = vmax.f32 %v1742_v39, %v1811_v48  ;;  %v3179_v43 = vrot.slane %v8408_v36, 2  ;;  %v3322_v31 = vrot.slane %v2932_v23, 3  ;;  %v3323_v62 = vrot.slane %v8408_v36, 3 }
 0x296   : > { %v3568_v44 = vmax.f32 %v3424_v59, %v3465_v8  ;;  %v3036_v30 = vsel %vm1461_vm0, %v3034_v12, %v3035_v3  ;;  %v3466_v15 = vrot.slane %v2932_v23, 4  ;;  %v3467_v33 = vrot.slane %v8408_v36, 4 }
 0x297   : > { %v2032_v24 = vmax.f32 %v1887_v19, %v1956_v2  ;;  %v3137_v45 = vmax.f32 %v2932_v23, %v3036_v30  ;;  %v3180_v28 = vsel %vm1606_vm1, %v3178_v49, %v3179_v43  ;;  %v3324_v0 = vsel %vm1751_vm2, %v3322_v31, %v3323_v62 }
 0x298   : > { %6174 = vmatmul.mubr.f32.gmra.mrb[20].mxu1 %v3568_v44  ;;  %v3468_v58 = vsel %vm1896_vm3, %v3466_v15, %v3467_v33  ;;  %v1305_v5 = vmax.f32 %v1208_v35, %v8351_v26  ;;  %v1401_v47 = vmax.f32 %v1304_v63, %v8417_v32  ;;  %v2742_v37 = vmax.f32 %v2646_v10, %v2694_v51  ;;  %v1355_v10 = vld [vmem:[#allocation2 + $0x190] sm:$0xf] }
 0x299   : > { %3873 = vst [vmem:[#allocation2 + $0x6a] sm:$0xff] %v3568_v44  ;;  %6041 = vmatmul.mubr.f32.gmra.mrb[54].mxu0 %v2032_v24  ;;  %v3281_v4 = vmax.f32 %v3137_v45, %v3180_v28  ;;  %v1113_v14 = vmax.f32 %v8360_v55, %v1065_v40  ;;  %v2647_v29 = vmax.f32 %v8134_v41, %v8227_v6  ;;  %2530 = vst [vmem:[#allocation2 + $0x142] sm:$0xff] %v2032_v24 }
 0x29a   : > { %v2648_v34 = vmax.f32 %v8140_v60, %v8229_v52  ;;  %v1402_v8 = vmax.f32 %v1305_v5, %v8429_v11  ;;  %v1522_v54 = vrot.slane %v1401_v47, 1  ;;  %v1667_v56 = vrot.slane %v1401_v47, 2 }
 0x29b   : > { %v1812_v1 = vrot.slane %v1401_v47, 3  ;;  %v3425_v61 = vmax.f32 %v3281_v4, %v3324_v0  ;;  %v1957_v48 = vrot.slane %v1401_v47, 4  ;;  %v2838_v50 = vmax.f32 %v2742_v37, %v2790_v46 }
 0x29c   : > { %v1209_v7 = vmax.f32 %v1113_v14, %v1161_v20  ;;  %v1523_v23 = vrot.slane %v1402_v8, 1  ;;  %v1668_v55 = vrot.slane %v1402_v8, 2  ;;  %v1813_v35 = vrot.slane %v1402_v8, 3 }
 0x29d   : > { %v1958_v39 = vrot.slane %v1402_v8, 4  ;;  %v3569_v2 = vmax.f32 %v3425_v61, %v3468_v58  ;;  %v2934_v41 = vmax.f32 %v2838_v50, %v2886_v17  ;;  %v2743_v60 = vmax.f32 %v2647_v29, %v8285_v18 }
 0x29e   : > { %v1306_v63 = vmax.f32 %v1209_v7, %v1258_v22  ;;  %v1524_v59 = vsel %vm1461_vm0, %v1522_v54, %v1523_v23  ;;  %v1669_v12 = vsel %vm1606_vm1, %v1667_v56, %v1668_v55  ;;  %v1814_v49 = vsel %vm1751_vm2, %v1812_v1, %v1813_v35  ;;  %v4960_v1 = vld [vmem:[#allocation12 + $0x20] sm:$0xff] }
 0x29f   : > { %v1959_v19 = vsel %vm1896_vm3, %v1957_v48, %v1958_v39  ;;  %6176 = vmatprep.mubr.f32.mxu1 %v3569_v2  ;;  %v1598_v31 = vmax.f32 %v1401_v47, %v1524_v59  ;;  %v3037_v51 = vrot.slane %v2934_v41, 1  ;;  %v3181_v44 = vrot.slane %v2934_v41, 2  ;;  %3874 = vst [vmem:[#allocation2 + $0x7a] sm:$0xff] %v3569_v2  ;;  %v8462_v47 = vld [vmem:[#allocation2 + $0xc0] sm:$0xff] }
 0x2a0   : > { %v3325_v30 = vrot.slane %v2934_v41, 3  ;;  %v3469_v15 = vrot.slane %v2934_v41, 4  ;;  %v1403_v40 = vmax.f32 %v1306_v63, %v1355_v10  ;;  %v2744_v24 = vmax.f32 %v2648_v34, %v8311_v42 }
 0x2a1   : > { %v2839_v45 = vmax.f32 %v2743_v60, %v8394_v25  ;;  %v1743_v28 = vmax.f32 %v1598_v31, %v1669_v12  ;;  %v3038_v0 = vsel %vm1461_vm0, %v3035_v3, %v3037_v51  ;;  %v3182_v58 = vsel %vm1606_vm1, %v3179_v43, %v3181_v44  ;;  %v8469_v43 = vld [vmem:[#allocation2 + $0xc8] sm:$0xff]  ;;  %v1068_v12 = vld [vmem:[#allocation2 + $0x160] sm:$0xf] }
 0x2a2   : > { %v3326_v5 = vsel %vm1751_vm2, %v3323_v62, %v3325_v30  ;;  %v3138_v37 = vmax.f32 %v8408_v36, %v3038_v0  ;;  %v3470_v46 = vsel %vm1896_vm3, %v3467_v33, %v3469_v15  ;;  %v1525_v20 = vrot.slane %v1403_v40, 1  ;;  %v4961_v36 = vld [vmem:[#allocation12 + $0x28] sm:$0xff]  ;;  %v2697_v44 = vld [vmem:[#allocation2 + $0xa0] sm:$0xf] }
 0x2a3   : > { %v1670_v4 = vrot.slane %v1403_v40, 2  ;;  %v1888_v14 = vmax.f32 %v1743_v28, %v1814_v49  ;;  %v1815_v3 = vrot.slane %v1403_v40, 3  ;;  %v1960_v22 = vrot.slane %v1403_v40, 4  ;;  %v2601_v60 = vld [vmem:[#allocation2 + $0x88] sm:$0xf] }
 0x2a4   : > { %v2840_v29 = vmax.f32 %v2744_v24, %v8396_v16  ;;  %v3282_v34 = vmax.f32 %v3138_v37, %v3182_v58  ;;  %v1526_v62 = vsel %vm1461_vm0, %v1523_v23, %v1525_v20  ;;  %v2935_v56 = vmax.f32 %v2839_v45, %v8462_v47  ;;  %v8487_v30 = vld [vmem:[#allocation2 + $0x88] sm:$0xf]  ;;  %v2793_v58 = vld [vmem:[#allocation2 + $0xb8] sm:$0xf] }
 0x2a5   : > { %v1671_v54 = vsel %vm1606_vm1, %v1668_v55, %v1670_v4  ;;  %v2033_v17 = vmax.f32 %v1888_v14, %v1959_v19  ;;  %v1599_v33 = vmax.f32 %v1402_v8, %v1526_v62  ;;  %v1816_v61 = vsel %vm1751_vm2, %v1813_v35, %v1815_v3  ;;  %v8509_v14 = vld [vmem:[#allocation2 + $0x160] sm:$0xf]  ;;  %v1261_v62 = vld [vmem:[#allocation2 + $0x190] sm:$0xf] }
 0x2a6   : > { %v1961_v48 = vsel %vm1896_vm3, %v1958_v39, %v1960_v22  ;;  %v3426_v50 = vmax.f32 %v3282_v34, %v3326_v5  ;;  %v8477_v7 = vmax.f32 %v2840_v29, %v8469_v43  ;;  %v3039_v2 = vrot.slane %v2935_v56, 1  ;;  %v1164_v5 = vld [vmem:[#allocation2 + $0x178] sm:$0xf]  ;;  %v8512_v29 = vld [vmem:[#allocation2 + $0x1a0] sm:$0xff]  ;;  %v2889_v34 = vld [vmem:[#allocation2 + $0xd0] sm:$0xf] }
 0x2a7   : > { %v3183_v41 = vrot.slane %v2935_v56, 2  ;;  %6043 = vmatprep.mubr.f32.mxu0 %v2033_v17  ;;  %v1744_v23 = vmax.f32 %v1599_v33, %v1671_v54  ;;  %v3327_v63 = vrot.slane %v2935_v56, 3  ;;  %v3471_v55 = vrot.slane %v2935_v56, 4  ;;  %2531 = vst [vmem:[#allocation2 + $0x152] sm:$0xff] %v2033_v17 }
 0x2a8   : > { %v6431_v10 = vpack.c.bf16 %v4961_v36, %v4960_v1  ;;  %v3570_v59 = vmax.f32 %v3426_v50, %v3470_v46  ;;  %v3040_v8 = vrot.slane %v8477_v7, 1  ;;  %v3184_v35 = vrot.slane %v8477_v7, 2  ;;  %v8504_v46 = vld [vmem:[#allocation2 + $0x198] sm:$0xff] }
 0x2a9   : > { %v3328_v39 = vrot.slane %v8477_v7, 3  ;;  %v1889_v49 = vmax.f32 %v1744_v23, %v1816_v61  ;;  %v3472_v19 = vrot.slane %v8477_v7, 4  ;;  %v1114_v31 = vmax.f32 %v8185_v57, %v8265_v13 }
 0x2aa   : > { %6432 = vmatprep.subr.bf16.mxu1 %v6431_v10  ;;  %v1115_v51 = vmax.f32 %v8191_v9, %v8271_v21  ;;  %6177 = vmatmul.mubr.f32.gmra.mrb[22].mxu1 %v3570_v59  ;;  %v3041_v15 = vsel %vm1461_vm0, %v3039_v2, %v3040_v8  ;;  %v3185_v40 = vsel %vm1606_vm1, %v3183_v41, %v3184_v35 }
 0x2ab   : > { %v3329_v24 = vsel %vm1751_vm2, %v3327_v63, %v3328_v39  ;;  %v2649_v57 = vmax.f32 %v8431_v27, %v2601_v60  ;;  %3875 = vst [vmem:[#allocation2 + $0x82] sm:$0xff] %v3570_v59  ;;  %v2034_v9 = vmax.f32 %v1889_v49, %v1961_v48  ;;  %v3139_v45 = vmax.f32 %v2935_v56, %v3041_v15  ;;  %v1358_v15 = vld [vmem:[#allocation2 + $0x1a8] sm:$0xf] }
 0x2ac   : > { %v3473_v28 = vsel %vm1896_vm3, %v3471_v55, %v3472_v19  ;;  %v1210_v0 = vmax.f32 %v1114_v31, %v8344_v53  ;;  %6434 = vmatpush3.bf16.msra.mxu1 %v6431_v10  ;;  %v1211_v37 = vmax.f32 %v1115_v51, %v8351_v26  ;;  %v1116_v4 = vmax.f32 %v8438_v38, %v1068_v12 }
 0x2ad   : > { %v2745_v20 = vmax.f32 %v2649_v57, %v2697_v44  ;;  %v2650_v27 = vmax.f32 %v8227_v6, %v8285_v18  ;;  %6044 = vmatmul.mubr.f32.gmra.mrb[56].mxu0 %v2034_v9  ;;  %v3283_v3 = vmax.f32 %v3139_v45, %v3185_v40  ;;  %v2651_v54 = vmax.f32 %v8229_v52, %v8311_v42  ;;  %v8529_v45 = vld [vmem:[#allocation2 + $0xd8] sm:$0xff] }
 0x2ae   : > { %v1307_v22 = vmax.f32 %v1210_v0, %v8417_v32  ;;  %v1117_v56 = vmax.f32 %v8265_v13, %v8344_v53  ;;  %2532 = vst [vmem:[#allocation2 + $0x15a] sm:$0xff] %v2034_v9  ;;  %v1308_v38 = vmax.f32 %v1211_v37, %v8429_v11  ;;  %v1212_v1 = vmax.f32 %v1116_v4, %v1164_v5 }
 0x2af   : > { %v2841_v6 = vmax.f32 %v2745_v20, %v2793_v58  ;;  %v2746_v36 = vmax.f32 %v2650_v27, %v8394_v25  ;;  %v3427_v17 = vmax.f32 %v3283_v3, %v3329_v24  ;;  %v2747_v61 = vmax.f32 %v2651_v54, %v8396_v16  ;;  %v8545_v3 = vld [vmem:[#allocation2 + $0xe0] sm:$0xff] }
 0x2b0   : > { %v1404_v33 = vmax.f32 %v1307_v22, %v8504_v46  ;;  %v1118_v48 = vmax.f32 %v8271_v21, %v8351_v26  ;;  %v1405_v52 = vmax.f32 %v1308_v38, %v8512_v29  ;;  %v1309_v2 = vmax.f32 %v1212_v1, %v1261_v62 }
 0x2b1   : > { %v2937_v50 = vmax.f32 %v2841_v6, %v2889_v34  ;;  %v2842_v13 = vmax.f32 %v2746_v36, %v8462_v47  ;;  %v3571_v41 = vmax.f32 %v3427_v17, %v3473_v28 }
 0x2b2   : > { %v1527_v23 = vrot.slane %v1404_v33, 1  ;;  %v1672_v63 = vrot.slane %v1404_v33, 2  ;;  %v1817_v55 = vrot.slane %v1404_v33, 3  ;;  %v1528_v10 = vrot.slane %v1405_v52, 1 }
 0x2b3   : > { %v1673_v60 = vrot.slane %v1405_v52, 2  ;;  %v1818_v59 = vrot.slane %v1405_v52, 3  ;;  %v1962_v12 = vrot.slane %v1404_v33, 4  ;;  %6179 = vmatprep.mubr.f32.mxu1 %v3571_v41  ;;  %v1963_v49 = vrot.slane %v1405_v52, 4  ;;  %3876 = vst [vmem:[#allocation2 + $0x92] sm:$0xff] %v3571_v41 }
 0x2b4   : > { %v3042_v31 = vrot.slane %v2937_v50, 1  ;;  %v3186_v51 = vrot.slane %v2937_v50, 2  ;;  %v3330_v44 = vrot.slane %v2937_v50, 3  ;;  %v1529_v40 = vsel %vm1461_vm0, %v1527_v23, %v1528_v10 }
 0x2b5   : > { %v1674_v24 = vsel %vm1606_vm1, %v1672_v63, %v1673_v60  ;;  %v1819_v57 = vsel %vm1751_vm2, %v1817_v55, %v1818_v59  ;;  %v3474_v9 = vrot.slane %v2937_v50, 4  ;;  %v1600_v28 = vmax.f32 %v1404_v33, %v1529_v40 }
 0x2b6   : > { %v1964_v0 = vsel %vm1896_vm3, %v1962_v12, %v1963_v49  ;;  %v3043_v58 = vsel %vm1461_vm0, %v3040_v8, %v3042_v31  ;;  %v3187_v5 = vsel %vm1606_vm1, %v3184_v35, %v3186_v51  ;;  %v3331_v20 = vsel %vm1751_vm2, %v3328_v39, %v3330_v44  ;;  %v2604_v12 = vld [vmem:[#allocation2 + $0xa0] sm:$0xf] }
 0x2b7   : > { %v3140_v37 = vmax.f32 %v8477_v7, %v3043_v58  ;;  %v3475_v4 = vsel %vm1896_vm3, %v3472_v19, %v3474_v9  ;;  %v1406_v27 = vmax.f32 %v1309_v2, %v1358_v15  ;;  %v1745_v22 = vmax.f32 %v1600_v28, %v1674_v24  ;;  %v2700_v24 = vld [vmem:[#allocation2 + $0xb8] sm:$0xf]  ;;  %v1167_v58 = vld [vmem:[#allocation2 + $0x190] sm:$0xf] }
 0x2b8   : > { %v2843_v8 = vmax.f32 %v2747_v61, %v8469_v43  ;;  %v2938_v34 = vmax.f32 %v2842_v13, %v8529_v45  ;;  %v1213_v35 = vmax.f32 %v1117_v56, %v8417_v32  ;;  %v1214_v40 = vmax.f32 %v1118_v48, %v8429_v11 }
 0x2b9   : > { %v3284_v62 = vmax.f32 %v3140_v37, %v3187_v5  ;;  %v1530_v54 = vrot.slane %v1406_v27, 1  ;;  %v1675_v38 = vrot.slane %v1406_v27, 2  ;;  %v1820_v6 = vrot.slane %v1406_v27, 3 }
 0x2ba   : > { %v1890_v1 = vmax.f32 %v1745_v22, %v1819_v57  ;;  %v1965_v39 = vrot.slane %v1406_v27, 4  ;;  %v8551_v7 = vmax.f32 %v2843_v8, %v8545_v3  ;;  %v3044_v19 = vrot.slane %v2938_v34, 1 }
 0x2bb   : > { %v3428_v36 = vmax.f32 %v3284_v62, %v3331_v20  ;;  %v1531_v17 = vsel %vm1461_vm0, %v1528_v10, %v1530_v54  ;;  %v1676_v33 = vsel %vm1606_vm1, %v1673_v60, %v1675_v38  ;;  %v1821_v61 = vsel %vm1751_vm2, %v1818_v59, %v1820_v6  ;;  %v1264_v54 = vld [vmem:[#allocation2 + $0x1a8] sm:$0xf] }
 0x2bc   : > { %v2035_v50 = vmax.f32 %v1890_v1, %v1964_v0  ;;  %v1601_v2 = vmax.f32 %v1405_v52, %v1531_v17  ;;  %v1966_v56 = vsel %vm1896_vm3, %v1963_v49, %v1965_v39  ;;  %v3045_v13 = vrot.slane %v8551_v7, 1  ;;  %v1071_v52 = vld [vmem:[#allocation2 + $0x178] sm:$0xf]  ;;  %v8563_v49 = vld [vmem:[#allocation2 + $0xa0] sm:$0xf] }
 0x2bd   : > { %v3572_v41 = vmax.f32 %v3428_v36, %v3475_v4  ;;  %v3188_v23 = vrot.slane %v2938_v34, 2  ;;  %v3189_v63 = vrot.slane %v8551_v7, 2  ;;  %v3332_v55 = vrot.slane %v2938_v34, 3  ;;  %v8583_v4 = vld [vmem:[#allocation2] sm:$0xff] }
 0x2be   : > { %6046 = vmatprep.mubr.f32.mxu0 %v2035_v50  ;;  %v1746_v31 = vmax.f32 %v1601_v2, %v1676_v33  ;;  %v3046_v10 = vsel %vm1461_vm0, %v3044_v19, %v3045_v13  ;;  %v3333_v60 = vrot.slane %v8551_v7, 3  ;;  %v3476_v59 = vrot.slane %v2938_v34, 4  ;;  %2533 = vst [vmem:[#allocation2 + $0x16a] sm:$0xff] %v2035_v50  ;;  %v1361_v36 = vld [vmem:[#allocation2 + $0x1c0] sm:$0xf] }
 0x2bf   : > { %6180 = vmatmul.mubr.f32.gmra.mrb[24].mxu1 %v3572_v41  ;;  %v3141_v51 = vmax.f32 %v2938_v34, %v3046_v10  ;;  %v3190_v44 = vsel %vm1606_vm1, %v3188_v23, %v3189_v63  ;;  %v3477_v15 = vrot.slane %v8551_v7, 4  ;;  %3877 = vst [vmem:[#allocation2 + $0x9a] sm:$0xff] %v3572_v41  ;;  %v1310_v28 = vmax.f32 %v1213_v35, %v8504_v46  ;;  %v2796_v35 = vld [vmem:[#allocation2 + $0xd0] sm:$0xf]  ;;  %v2892_v50 = vld [vmem:[#allocation2 + $0xe8] sm:$0xf] }
 0x2c0   : > { %v1891_v57 = vmax.f32 %v1746_v31, %v1821_v61  ;;  %v3334_v9 = vsel %vm1751_vm2, %v3332_v55, %v3333_v60  ;;  %v2652_v0 = vmax.f32 %v8487_v30, %v2604_v12  ;;  %v1311_v21 = vmax.f32 %v1214_v40, %v8512_v29 }
 0x2c1   : > { %v3285_v5 = vmax.f32 %v3141_v51, %v3190_v44  ;;  %v3478_v37 = vsel %vm1896_vm3, %v3476_v59, %v3477_v15  ;;  %v1119_v48 = vmax.f32 %v8509_v14, %v1071_v52  ;;  %v1407_v27 = vmax.f32 %v1310_v28, %v8583_v4  ;;  %v8593_v14 = vld [vmem:[#allocation2 + $0x178] sm:$0xf] }
 0x2c2   : > { %v2036_v20 = vmax.f32 %v1891_v57, %v1966_v56  ;;  %v2748_v22 = vmax.f32 %v2652_v0, %v2700_v24  ;;  %v2653_v8 = vmax.f32 %v8285_v18, %v8394_v25  ;;  %v8589_v34 = vmax.f32 %v1311_v21, %v8583_v4 }
 0x2c3   : > { %v3429_v30 = vmax.f32 %v3285_v5, %v3334_v9  ;;  %v1215_v62 = vmax.f32 %v1119_v48, %v1167_v58  ;;  %v2654_v38 = vmax.f32 %v8311_v42, %v8396_v16  ;;  %v1532_v6 = vrot.slane %v1407_v27, 1 }
 0x2c4   : > { %6047 = vmatmul.mubr.f32.gmra.mrb[58].mxu0 %v2036_v20  ;;  %v1677_v1 = vrot.slane %v1407_v27, 2  ;;  %v1822_v39 = vrot.slane %v1407_v27, 3  ;;  %v1967_v19 = vrot.slane %v1407_v27, 4  ;;  %2534 = vst [vmem:[#allocation2 + $0x172] sm:$0xff] %v2036_v20  ;;  %v1533_v17 = vrot.slane %v8589_v34, 1 }
 0x2c5   : > { %v3573_v18 = vmax.f32 %v3429_v30, %v3478_v37  ;;  %v1678_v33 = vrot.slane %v8589_v34, 2  ;;  %v1823_v61 = vrot.slane %v8589_v34, 3  ;;  %v1968_v2 = vrot.slane %v8589_v34, 4 }
 0x2c6   : > { %v2844_v42 = vmax.f32 %v2748_v22, %v2796_v35  ;;  %v1312_v56 = vmax.f32 %v1215_v62, %v1264_v54  ;;  %v2749_v41 = vmax.f32 %v2653_v8, %v8462_v47  ;;  %v1534_v23 = vsel %vm1461_vm0, %v1532_v6, %v1533_v17  ;;  %v4962_v35 = vld [vmem:[#allocation12 + $0x30] sm:$0xff] }
 0x2c7   : > { %6182 = vmatprep.mubr.f32.mxu1 %v3573_v18  ;;  %v1679_v55 = vsel %vm1606_vm1, %v1677_v1, %v1678_v33  ;;  %v1824_v12 = vsel %vm1751_vm2, %v1822_v39, %v1823_v61  ;;  %v2750_v31 = vmax.f32 %v2654_v38, %v8469_v43  ;;  %3878 = vst [vmem:[#allocation2 + $0xaa] sm:$0xff] %v3573_v18 }
 0x2c8   : > { %v1602_v10 = vmax.f32 %v1407_v27, %v1534_v23  ;;  %v1969_v59 = vsel %vm1896_vm3, %v1967_v19, %v1968_v2  ;;  %v2940_v52 = vmax.f32 %v2844_v42, %v2892_v50  ;;  %v1409_v51 = vmax.f32 %v1312_v56, %v1361_v36 }
 0x2c9   : > { %v2845_v44 = vmax.f32 %v2749_v41, %v8529_v45  ;;  %v2846_v40 = vmax.f32 %v2750_v31, %v8545_v3  ;;  %v1120_v24 = vmax.f32 %v8344_v53, %v8417_v32  ;;  %v1121_v57 = vmax.f32 %v8351_v26, %v8429_v11  ;;  %v8620_v32 = vld [vmem:[#allocation2 + $0xf0] sm:$0xff]  ;;  %v8622_v11 = vld [vmem:[#allocation2 + $0xf8] sm:$0xff] }
 0x2ca   : > { %v1747_v9 = vmax.f32 %v1602_v10, %v1679_v55  ;;  %v3047_v28 = vrot.slane %v2940_v52, 1  ;;  %v3191_v0 = vrot.slane %v2940_v52, 2  ;;  %v3335_v58 = vrot.slane %v2940_v52, 3 }
 0x2cb   : > { %v3479_v5 = vrot.slane %v2940_v52, 4  ;;  %v1535_v37 = vrot.slane %v1409_v51, 1  ;;  %v1680_v21 = vrot.slane %v1409_v51, 2  ;;  %v1825_v48 = vrot.slane %v1409_v51, 3  ;;  %v2703_v52 = vld [vmem:[#allocation2 + $0xd0] sm:$0xf] }
 0x2cc   : > { %v1892_v20 = vmax.f32 %v1747_v9, %v1824_v12  ;;  %v3048_v27 = vsel %vm1461_vm0, %v3045_v13, %v3047_v28  ;;  %v3192_v53 = vsel %vm1606_vm1, %v3189_v63, %v3191_v0  ;;  %v3336_v26 = vsel %vm1751_vm2, %v3333_v60, %v3335_v58  ;;  %v4963_v63 = vld [vmem:[#allocation12 + $0x38] sm:$0xff]  ;;  %v1074_v12 = vld [vmem:[#allocation2 + $0x190] sm:$0xf]  ;;  %v1170_v9 = vld [vmem:[#allocation2 + $0x1a8] sm:$0xf] }
 0x2cd   : > { %v3142_v22 = vmax.f32 %v8551_v7, %v3048_v27  ;;  %v3480_v8 = vsel %vm1896_vm3, %v3477_v15, %v3479_v5  ;;  %v1536_v13 = vsel %vm1461_vm0, %v1533_v17, %v1535_v37  ;;  %v1681_v30 = vsel %vm1606_vm1, %v1678_v33, %v1680_v21  ;;  %v2610_v28 = vld [vmem:[#allocation2 + $0xd0] sm:$0xf] }
 0x2ce   : > { %v2037_v62 = vmax.f32 %v1892_v20, %v1969_v59  ;;  %v1603_v54 = vmax.f32 %v8589_v34, %v1536_v13  ;;  %v1826_v60 = vsel %vm1751_vm2, %v1823_v61, %v1825_v48  ;;  %v1970_v38 = vrot.slane %v1409_v51, 4  ;;  %v2562_v51 = vld [vmem:[#allocation2 + $0xb8] sm:$0xf] }
 0x2cf   : > { %v3286_v6 = vmax.f32 %v3142_v22, %v3192_v53  ;;  %v2941_v1 = vmax.f32 %v2845_v44, %v8620_v32  ;;  %v8634_v39 = vmax.f32 %v2846_v40, %v8622_v11  ;;  %v1216_v7 = vmax.f32 %v1120_v24, %v8504_v46  ;;  %v2607_v46 = vld [vmem:[#allocation2 + $0xb8] sm:$0xf]  ;;  %v2799_v53 = vld [vmem:[#allocation2 + $0xe8] sm:$0xf] }
 0x2d0   : > { %6049 = vmatprep.mubr.f32.mxu0 %v2037_v62  ;;  %v1748_v15 = vmax.f32 %v1603_v54, %v1681_v30  ;;  %v1971_v19 = vsel %vm1896_vm3, %v1968_v2, %v1970_v38  ;;  %v1217_v36 = vmax.f32 %v1121_v57, %v8512_v29  ;;  %2535 = vst [vmem:[#allocation2 + $0x182] sm:$0xff] %v2037_v62 }
 0x2d1   : > { %v6435_v18 = vpack.c.bf16 %v4963_v63, %v4962_v35  ;;  %v3430_v34 = vmax.f32 %v3286_v6, %v3336_v26  ;;  %v3049_v17 = vrot.slane %v2941_v1, 1  ;;  %v3050_v33 = vrot.slane %v8634_v39, 1  ;;  %v1267_v35 = vld [vmem:[#allocation2 + $0x1c0] sm:$0xf] }
 0x2d2   : > { %v3193_v61 = vrot.slane %v2941_v1, 2  ;;  %v1893_v50 = vmax.f32 %v1748_v15, %v1826_v60  ;;  %v3194_v42 = vrot.slane %v8634_v39, 2  ;;  %v3337_v56 = vrot.slane %v2941_v1, 3  ;;  %v2895_v60 = vld [vmem:[#allocation2 + $0x100] sm:$0xf]  ;;  %v8674_v15 = vld [vmem:[#allocation2 + $0x108] sm:$0xff] }
 0x2d3   : > { %v3338_v41 = vrot.slane %v8634_v39, 3  ;;  %6436 = vmatprep.subr.bf16.mxu1 %v6435_v18  ;;  %v3574_v23 = vmax.f32 %v3430_v34, %v3480_v8  ;;  %v3051_v29 = vsel %vm1461_vm0, %v3049_v17, %v3050_v33  ;;  %v3481_v2 = vrot.slane %v2941_v1, 4 }
 0x2d4   : > { %v3482_v55 = vrot.slane %v8634_v39, 4  ;;  %6438 = vmatpush3.bf16.msra.mxu1 %v6435_v18  ;;  %v2038_v31 = vmax.f32 %v1893_v50, %v1971_v19  ;;  %v3143_v10 = vmax.f32 %v2941_v1, %v3051_v29  ;;  %v3195_v59 = vsel %vm1606_vm1, %v3193_v61, %v3194_v42  ;;  %v1364_v1 = vld [vmem:[#allocation2 + $0x1d8] sm:$0xf]  ;;  %v2706_v19 = vld [vmem:[#allocation2 + $0xe8] sm:$0xf] }
 0x2d5   : > { %6183 = vmatmul.mubr.f32.gmra.mrb[26].mxu1 %v3574_v23  ;;  %v3339_v44 = vsel %vm1751_vm2, %v3337_v56, %v3338_v41  ;;  %v1313_v40 = vmax.f32 %v1216_v7, %v8583_v4  ;;  %v1314_v24 = vmax.f32 %v1217_v36, %v8583_v4  ;;  %v2655_v57 = vmax.f32 %v8563_v49, %v2607_v46 }
 0x2d6   : > { %3879 = vst [vmem:[#allocation2 + $0xb2] sm:$0xff] %v3574_v23  ;;  %6050 = vmatmul.mubr.f32.gmra.mrb[60].mxu0 %v2038_v31  ;;  %v3287_v0 = vmax.f32 %v3143_v10, %v3195_v59  ;;  %v3483_v58 = vsel %vm1896_vm3, %v3481_v2, %v3482_v55  ;;  %v1122_v5 = vmax.f32 %v8593_v14, %v1074_v12  ;;  %2536 = vst [vmem:[#allocation2 + $0x18a] sm:$0xff] %v2038_v31 }
 0x2d7   : > { %v2656_v37 = vmax.f32 %v8394_v25, %v8462_v47  ;;  %v1410_v21 = vmax.f32 %v1313_v40, %v8583_v4  ;;  %v8663_v48 = vmax.f32 %v1314_v24, %v8583_v4  ;;  %v2751_v49 = vmax.f32 %v2655_v57, %v2703_v52  ;;  %v8682_v24 = vld [vmem:[#allocation2 + $0x110] sm:$0xff] }
 0x2d8   : > { %v2657_v20 = vmax.f32 %v8396_v16, %v8469_v43  ;;  %v3431_v27 = vmax.f32 %v3287_v0, %v3339_v44  ;;  %v1218_v26 = vmax.f32 %v1122_v5, %v1170_v9  ;;  %v2658_v8 = vmax.f32 %v2562_v51, %v2610_v28 }
 0x2d9   : > { %v2752_v22 = vmax.f32 %v2656_v37, %v8529_v45  ;;  %v1537_v14 = vrot.slane %v1410_v21, 1  ;;  %v1538_v13 = vrot.slane %v8663_v48, 1  ;;  %v1682_v30 = vrot.slane %v1410_v21, 2 }
 0x2da   : > { %v1683_v25 = vrot.slane %v8663_v48, 2  ;;  %v3575_v63 = vmax.f32 %v3431_v27, %v3483_v58  ;;  %v1827_v4 = vrot.slane %v1410_v21, 3  ;;  %v1828_v62 = vrot.slane %v8663_v48, 3 }
 0x2db   : > { %v1972_v54 = vrot.slane %v1410_v21, 4  ;;  %v1539_v16 = vsel %vm1461_vm0, %v1537_v14, %v1538_v13  ;;  %v1973_v38 = vrot.slane %v8663_v48, 4  ;;  %v2847_v6 = vmax.f32 %v2751_v49, %v2799_v53 }
 0x2dc   : > { %v2753_v7 = vmax.f32 %v2657_v20, %v8545_v3  ;;  %6185 = vmatprep.mubr.f32.mxu1 %v3575_v63  ;;  %v1604_v36 = vmax.f32 %v1410_v21, %v1539_v16  ;;  %v1684_v18 = vsel %vm1606_vm1, %v1682_v30, %v1683_v25  ;;  %v1315_v34 = vmax.f32 %v1218_v26, %v1267_v35  ;;  %v2898_v35 = vld [vmem:[#allocation2 + $0x118] sm:$0xf]  ;;  %v4964_v16 = vld [vmem:[#allocation12 + $0x40] sm:$0xff] }
 0x2dd   : > { %v2848_v17 = vmax.f32 %v2752_v22, %v8620_v32  ;;  %3880 = vst [vmem:[#allocation2 + $0xc2] sm:$0xff] %v3575_v63  ;;  %v1829_v61 = vsel %vm1751_vm2, %v1827_v4, %v1828_v62  ;;  %v1974_v50 = vsel %vm1896_vm3, %v1972_v54, %v1973_v38  ;;  %v2943_v56 = vmax.f32 %v2847_v6, %v2895_v60  ;;  %v2802_v22 = vld [vmem:[#allocation2 + $0x100] sm:$0xf]  ;;  %v4965_v6 = vld [vmem:[#allocation12 + $0x48] sm:$0xff] }
 0x2de   : > { %v2849_v46 = vmax.f32 %v2753_v7, %v8622_v11  ;;  %v1749_v23 = vmax.f32 %v1604_v36, %v1684_v18  ;;  %v1412_v29 = vmax.f32 %v1315_v34, %v1364_v1  ;;  %v2754_v12 = vmax.f32 %v2658_v8, %v2706_v19 }
 0x2df   : > { %v2944_v2 = vmax.f32 %v2848_v17, %v8674_v15  ;;  %v3052_v31 = vrot.slane %v2943_v56, 1  ;;  %v3196_v10 = vrot.slane %v2943_v56, 2  ;;  %v3340_v59 = vrot.slane %v2943_v56, 3 }
 0x2e0   : > { %v3484_v52 = vrot.slane %v2943_v56, 4  ;;  %v1894_v51 = vmax.f32 %v1749_v23, %v1829_v61  ;;  %v1540_v44 = vrot.slane %v1412_v29, 1  ;;  %v1685_v40 = vrot.slane %v1412_v29, 2 }
 0x2e1   : > { %v2659_v57 = vmax.f32 %v8462_v47, %v8529_v45  ;;  %v3053_v9 = vsel %vm1461_vm0, %v3050_v33, %v3052_v31  ;;  %v3197_v28 = vsel %vm1606_vm1, %v3194_v42, %v3196_v10  ;;  %v3341_v0 = vsel %vm1751_vm2, %v3338_v41, %v3340_v59  ;;  %v8718_v10 = vld [vmem:[#allocation2 + $0x120] sm:$0xff] }
 0x2e2   : > { %v1830_v58 = vrot.slane %v1412_v29, 3  ;;  %v2039_v5 = vmax.f32 %v1894_v51, %v1974_v50  ;;  %v3144_v37 = vmax.f32 %v8634_v39, %v3053_v9  ;;  %v3485_v47 = vsel %vm1896_vm3, %v3482_v55, %v3484_v52  ;;  %v9754_v52 = vld [vmem:[#allocation23_spill] sm:$0xff] }
 0x2e3   : > { %v1541_v21 = vsel %vm1461_vm0, %v1538_v13, %v1540_v44  ;;  %v1686_v49 = vsel %vm1606_vm1, %v1683_v25, %v1685_v40  ;;  %v1975_v20 = vrot.slane %v1412_v29, 4  ;;  %v8703_v42 = vmax.f32 %v2849_v46, %v8682_v24  ;;  %v2709_v44 = vld [vmem:[#allocation2 + $0x100] sm:$0xf] }
 0x2e4   : > { %v1605_v33 = vmax.f32 %v8663_v48, %v1541_v21  ;;  %6052 = vmatprep.mubr.f32.mxu0 %v2039_v5  ;;  %2537 = vst [vmem:[#allocation2 + $0x19a] sm:$0xff] %v2039_v5  ;;  %v3288_v41 = vmax.f32 %v3144_v37, %v3197_v28  ;;  %v3054_v27 = vrot.slane %v2944_v2, 1  ;;  %v3198_v53 = vrot.slane %v2944_v2, 2  ;;  %v8726_v28 = vld [vmem:[#allocation2 + $0x128] sm:$0xff]  ;;  %v2805_v21 = vld [vmem:[#allocation2 + $0x118] sm:$0xf] }
 0x2e5   : > { %v3342_v26 = vrot.slane %v2944_v2, 3  ;;  %v1831_v55 = vsel %vm1751_vm2, %v1828_v62, %v1830_v58  ;;  %v3055_v8 = vrot.slane %v8703_v42, 1  ;;  %v3199_v48 = vrot.slane %v8703_v42, 2  ;;  %v2613_v62 = vld [vmem:[#allocation2 + $0xe8] sm:$0xf] }
 0x2e6   : > { %v1750_v39 = vmax.f32 %v1605_v33, %v1686_v49  ;;  %v3432_v14 = vmax.f32 %v3288_v41, %v3341_v0  ;;  %v3343_v13 = vrot.slane %v8703_v42, 3  ;;  %v3486_v30 = vrot.slane %v2944_v2, 4  ;;  %v9755_v49 = vld [vmem:[#allocation22_spill] sm:$0xff] }
 0x2e7   : > { %v3487_v25 = vrot.slane %v8703_v42, 4  ;;  %v1976_v4 = vsel %vm1896_vm3, %v1973_v38, %v1975_v20  ;;  %v3056_v54 = vsel %vm1461_vm0, %v3054_v27, %v3055_v8  ;;  %v2850_v60 = vmax.f32 %v2754_v12, %v2802_v22  ;;  %v2565_v38 = vld [vmem:[#allocation2 + $0xd0] sm:$0xf]  ;;  %v9756_v22 = vld [vmem:[#allocation25_spill] sm:$0xff] }
 0x2e8   : > { %v1895_v63 = vmax.f32 %v1750_v39, %v1831_v55  ;;  %v3576_v1 = vmax.f32 %v3432_v14, %v3485_v47  ;;  %v3145_v7 = vmax.f32 %v2944_v2, %v3056_v54  ;;  %v3200_v19 = vsel %vm1606_vm1, %v3198_v53, %v3199_v48  ;;  %v2901_v39 = vld [vmem:[#allocation2 + $0x130] sm:$0xf]  ;;  %v2616_v55 = vld [vmem:[#allocation2 + $0x100] sm:$0xf] }
 0x2e9   : > { %v3344_v36 = vsel %vm1751_vm2, %v3342_v26, %v3343_v13  ;;  %v3488_v34 = vsel %vm1896_vm3, %v3486_v30, %v3487_v25  ;;  %v2946_v17 = vmax.f32 %v2850_v60, %v2898_v35  ;;  %v2660_v61 = vmax.f32 %v8469_v43, %v8545_v3  ;;  %v9757_v60 = vld [vmem:[#allocation24_spill] sm:$0xff] }
 0x2ea   : > { %v2040_v18 = vmax.f32 %v1895_v63, %v1976_v4  ;;  %6186 = vmatmul.mubr.f32.gmra.mrb[28].mxu1 %v3576_v1  ;;  %v3289_v50 = vmax.f32 %v3145_v7, %v3200_v19  ;;  %v2755_v56 = vmax.f32 %v2659_v57, %v8620_v32  ;;  %v6439_v46 = vpack.c.bf16 %v4965_v6, %v4964_v16  ;;  %v2568_v63 = vld [vmem:[#allocation2 + $0xe8] sm:$0xf]  ;;  %v8749_v6 = vld [vmem:[#allocation2 + $0x138] sm:$0xff] }
 0x2eb   : > { %v2661_v23 = vmax.f32 %v2565_v38, %v2613_v62  ;;  %3881 = vst [vmem:[#allocation2 + $0xca] sm:$0xff] %v3576_v1  ;;  %v3057_v29 = vrot.slane %v2946_v17, 1  ;;  %v3201_v2 = vrot.slane %v2946_v17, 2  ;;  %v3345_v12 = vrot.slane %v2946_v17, 3  ;;  %v8751_v62 = vld [vmem:[#allocation2 + $0x140] sm:$0xff] }
 0x2ec   : > { %6053 = vmatmul.mubr.f32.gmra.mrb[62].mxu0 %v2040_v18  ;;  %2538 = vst [vmem:[#allocation2 + $0x1a2] sm:$0xff] %v2040_v18  ;;  %v3489_v31 = vrot.slane %v2946_v17, 4  ;;  %v3433_v59 = vmax.f32 %v3289_v50, %v3344_v36  ;;  %v2756_v43 = vmax.f32 %v2660_v61, %v8622_v11  ;;  %v2851_v51 = vmax.f32 %v2755_v56, %v8674_v15  ;;  %v2712_v56 = vld [vmem:[#allocation2 + $0x118] sm:$0xf] }
 0x2ed   : > { %6087 = vmatprep.mubr.f32.mxu0 %v9754_v52  ;;  %6440 = vmatprep.subr.bf16.mxu1 %v6439_v46  ;;  %v3058_v40 = vsel %vm1461_vm0, %v3055_v8, %v3057_v29  ;;  %v3202_v57 = vsel %vm1606_vm1, %v3199_v48, %v3201_v2  ;;  %v3346_v9 = vsel %vm1751_vm2, %v3343_v13, %v3345_v12 }
 0x2ee   : > { %6442 = vmatpush3.bf16.msra.mxu1 %v6439_v46  ;;  %v2662_v0 = vmax.f32 %v8529_v45, %v8620_v32  ;;  %v3577_v58 = vmax.f32 %v3433_v59, %v3488_v34  ;;  %v3146_v5 = vmax.f32 %v8703_v42, %v3058_v40  ;;  %v2852_v37 = vmax.f32 %v2756_v43, %v8682_v24  ;;  %v9758_v34 = vld [vmem:[#allocation29_spill] sm:$0xff]  ;;  %v9759_v43 = vld [vmem:[#allocation28_spill] sm:$0xff] }
 0x2ef   : > { %v2947_v47 = vmax.f32 %v2851_v51, %v8718_v10  ;;  %v3490_v33 = vsel %vm1896_vm3, %v3487_v25, %v3489_v31  ;;  %v2757_v20 = vmax.f32 %v2661_v23, %v2709_v44  ;;  %v2663_v41 = vmax.f32 %v8545_v3, %v8622_v11 }
 0x2f0   : > { %6088 = vmatmul.mubr.f32.vlgmr.msra.gmra.mrb[32].mxu0 %v9755_v49  ;;  %v2758_v27 = vmax.f32 %v2662_v0, %v8674_v15  ;;  %6188 = vmatprep.mubr.f32.mxu1 %v3577_v58  ;;  %v3290_v45 = vmax.f32 %v3146_v5, %v3202_v57  ;;  %v8739_v53 = vmax.f32 %v2852_v37, %v8726_v28 }
 0x2f1   : > { %v3059_v42 = vrot.slane %v2947_v47, 1  ;;  %v3203_v26 = vrot.slane %v2947_v47, 2  ;;  %6090 = vmatprep.mubr.f32.mxu0 %v9756_v22  ;;  %3882 = vst [vmem:[#allocation2 + $0xda] sm:$0xff] %v3577_v58  ;;  %v3347_v8 = vrot.slane %v2947_v47, 3  ;;  %v3491_v48 = vrot.slane %v2947_v47, 4 }
 0x2f2   : > { %v2853_v14 = vmax.f32 %v2757_v20, %v2805_v21  ;;  %v2759_v13 = vmax.f32 %v2663_v41, %v8682_v24  ;;  %v3434_v3 = vmax.f32 %v3290_v45, %v3346_v9  ;;  %v3060_v30 = vrot.slane %v8739_v53, 1  ;;  %v9760_v9 = vld [vmem:[#allocation31_spill] sm:$0xff]  ;;  %v4966_v41 = vld [vmem:[#allocation12 + $0x50] sm:$0xff]  ;;  %v2904_v22 = vld [vmem:[#allocation2 + $0x148] sm:$0xf] }
 0x2f3   : > { %v3204_v25 = vrot.slane %v8739_v53, 2  ;;  %v3348_v35 = vrot.slane %v8739_v53, 3  ;;  %v3492_v4 = vrot.slane %v8739_v53, 4  ;;  %v2854_v16 = vmax.f32 %v2758_v27, %v8718_v10  ;;  %v4967_v27 = vld [vmem:[#allocation12 + $0x58] sm:$0xff] }
 0x2f4   : > { %v2949_v54 = vmax.f32 %v2853_v14, %v2901_v39  ;;  %6091 = vmatmul.mubr.f32.gmra.mrb[34].mxu0 %v9757_v60  ;;  %v2664_v1 = vmax.f32 %v2568_v63, %v2616_v55  ;;  %v3578_v7 = vmax.f32 %v3434_v3, %v3490_v33  ;;  %v3061_v19 = vsel %vm1461_vm0, %v3059_v42, %v3060_v30  ;;  %v9761_v39 = vld [vmem:[#allocation30_spill] sm:$0xff]  ;;  %v9762_v3 = vld [vmem:[#allocation33_spill] sm:$0xff] }
 0x2f5   : > { %v3205_v36 = vsel %vm1606_vm1, %v3203_v26, %v3204_v25  ;;  %v2855_v18 = vmax.f32 %v2759_v13, %v8726_v28  ;;  %6093 = vmatprep.mubr.f32.mxu0 %v9758_v34  ;;  %v3147_v17 = vmax.f32 %v2947_v47, %v3061_v19  ;;  %v3349_v61 = vsel %vm1751_vm2, %v3347_v8, %v3348_v35  ;;  %v2808_v47 = vld [vmem:[#allocation2 + $0x130] sm:$0xf]  ;;  %v2619_v13 = vld [vmem:[#allocation2 + $0x118] sm:$0xf] }
 0x2f6   : > { %v3062_v38 = vrot.slane %v2949_v54, 1  ;;  %v3206_v50 = vrot.slane %v2949_v54, 2  ;;  %6189 = vmatmul.mubr.f32.gmra.mrb[30].mxu1 %v3578_v7  ;;  %v3493_v46 = vsel %vm1896_vm3, %v3491_v48, %v3492_v4  ;;  %v3350_v23 = vrot.slane %v2949_v54, 3  ;;  %3883 = vst [vmem:[#allocation2 + $0xe2] sm:$0xff] %v3578_v7 }
 0x2f7   : > { %v2950_v29 = vmax.f32 %v2854_v16, %v8749_v6  ;;  %v8761_v2 = vmax.f32 %v2855_v18, %v8751_v62  ;;  %v3291_v12 = vmax.f32 %v3147_v17, %v3205_v36  ;;  %v3494_v52 = vrot.slane %v2949_v54, 4  ;;  %v2715_v18 = vld [vmem:[#allocation2 + $0x130] sm:$0xf] }
 0x2f8   : > { %v3063_v31 = vsel %vm1461_vm0, %v3060_v30, %v3062_v38  ;;  %v3207_v59 = vsel %vm1606_vm1, %v3204_v25, %v3206_v50  ;;  %6094 = vmatmul.mubr.f32.gmra.mrb[36].mxu0 %v9759_v43  ;;  %v3351_v44 = vsel %vm1751_vm2, %v3348_v35, %v3350_v23  ;;  %v2760_v57 = vmax.f32 %v2664_v1, %v2712_v56  ;;  %v2571_v1 = vld [vmem:[#allocation2 + $0x100] sm:$0xf]  ;;  %v8788_v38 = vld [vmem:[#allocation2 + $0x150] sm:$0xff]  ;;  %v8790_v50 = vld [vmem:[#allocation2 + $0x158] sm:$0xff] }
 0x2f9   : > { %v3148_v51 = vmax.f32 %v8739_v53, %v3063_v31  ;;  %v3064_v40 = vrot.slane %v2950_v29, 1  ;;  %6096 = vmatprep.mubr.f32.mxu0 %v9760_v9  ;;  %v3435_v0 = vmax.f32 %v3291_v12, %v3349_v61  ;;  %v3065_v58 = vrot.slane %v8761_v2, 1  ;;  %v9763_v56 = vld [vmem:[#allocation32_spill] sm:$0xff]  ;;  %v2811_v12 = vld [vmem:[#allocation2 + $0x148] sm:$0xf]  ;;  %v9764_v31 = vld [vmem:[#allocation35_spill] sm:$0xff] }
 0x2fa   : > { %v3208_v5 = vrot.slane %v2950_v29, 2  ;;  %v3209_v37 = vrot.slane %v8761_v2, 2  ;;  %v3352_v33 = vrot.slane %v2950_v29, 3  ;;  %v3353_v49 = vrot.slane %v8761_v2, 3 }
 0x2fb   : > { %v3292_v21 = vmax.f32 %v3148_v51, %v3207_v59  ;;  %v3496_v20 = vrot.slane %v2950_v29, 4  ;;  %v3579_v45 = vmax.f32 %v3435_v0, %v3493_v46  ;;  %v3495_v53 = vsel %vm1896_vm3, %v3492_v4, %v3494_v52 }
 0x2fc   : > { %v3066_v42 = vsel %vm1461_vm0, %v3064_v40, %v3065_v58  ;;  %v3497_v26 = vrot.slane %v8761_v2, 4  ;;  %6097 = vmatmul.mubr.f32.gmra.mrb[38].mxu0 %v9761_v39  ;;  %v3210_v48 = vsel %vm1606_vm1, %v3208_v5, %v3209_v37  ;;  %v2856_v14 = vmax.f32 %v2760_v57, %v2808_v47  ;;  %v2907_v5 = vld [vmem:[#allocation2 + $0x160] sm:$0xf] }
 0x2fd   : > { %v3436_v55 = vmax.f32 %v3292_v21, %v3351_v44  ;;  %v3149_v8 = vmax.f32 %v2950_v29, %v3066_v42  ;;  %6099 = vmatprep.mubr.f32.mxu0 %v9762_v3  ;;  %6191 = vmatprep.mubr.f32.mxu1 %v3579_v45  ;;  %v3354_v30 = vsel %vm1751_vm2, %v3352_v33, %v3353_v49  ;;  %v9766_v42 = vld [vmem:[#allocation37_spill] sm:$0xff] }
 0x2fe   : > { %v2665_v25 = vmax.f32 %v8620_v32, %v8674_v15  ;;  %v2666_v35 = vmax.f32 %v8622_v11, %v8682_v24  ;;  %3884 = vst [vmem:[#allocation2 + $0xf2] sm:$0xff] %v3579_v45  ;;  %v6443_v63 = vpack.c.bf16 %v4967_v27, %v4966_v41  ;;  %v3498_v60 = vsel %vm1896_vm3, %v3496_v20, %v3497_v26  ;;  %v9765_v20 = vld [vmem:[#allocation34_spill] sm:$0xff]  ;;  %v8818_v3 = vld [vmem:[#allocation2 + $0x168] sm:$0xff] }
 0x2ff   : > { %v3580_v4 = vmax.f32 %v3436_v55, %v3495_v53  ;;  %v3293_v54 = vmax.f32 %v3149_v8, %v3210_v48  ;;  %v2952_v16 = vmax.f32 %v2856_v14, %v2904_v22  ;;  %v2667_v36 = vmax.f32 %v2571_v1, %v2619_v13  ;;  %v2574_v8 = vld [vmem:[#allocation2 + $0x118] sm:$0xf] }
 0x300   : > { %v2761_v7 = vmax.f32 %v2665_v25, %v8718_v10  ;;  %v2762_v19 = vmax.f32 %v2666_v35, %v8726_v28  ;;  %6444 = vmatprep.subr.bf16.mxu1 %v6443_v63  ;;  %v2668_v32 = vmax.f32 %v8674_v15, %v8718_v10  ;;  %6100 = vmatmul.mubr.f32.gmra.mrb[40].mxu0 %v9763_v56 }
 0x301   : > { %6192 = vmatmul.mubr.f32.gmra.mrb[0].mxu1 %v3580_v4  ;;  %v3437_v11 = vmax.f32 %v3293_v54, %v3354_v30  ;;  %v3067_v34 = vrot.slane %v2952_v16, 1  ;;  %v3211_v17 = vrot.slane %v2952_v16, 2  ;;  %v3355_v61 = vrot.slane %v2952_v16, 3  ;;  %3885 = vst [vmem:[#allocation2 + $0xfa] sm:$0xff] %v3580_v4  ;;  %6102 = vmatprep.mubr.f32.mxu0 %v9764_v31  ;;  %v2718_v54 = vld [vmem:[#allocation2 + $0x148] sm:$0xf] }
 0x302   : > { %v3499_v46 = vrot.slane %v2952_v16, 4  ;;  %v2857_v23 = vmax.f32 %v2761_v7, %v8749_v6  ;;  %v2858_v29 = vmax.f32 %v2762_v19, %v8751_v62  ;;  %6446 = vmatpush3.bf16.msra.mxu1 %v6443_v63  ;;  %v2669_v15 = vmax.f32 %v8682_v24, %v8726_v28 }
 0x303   : > { %v3581_v59 = vmax.f32 %v3437_v11, %v3498_v60  ;;  %v3068_v52 = vsel %vm1461_vm0, %v3065_v58, %v3067_v34  ;;  %v3212_v43 = vsel %vm1606_vm1, %v3209_v37, %v3211_v17  ;;  %v2763_v51 = vmax.f32 %v2667_v36, %v2715_v18  ;;  %v9767_v60 = vld [vmem:[#allocation36_spill] sm:$0xff]  ;;  %v8823_v36 = vld [vmem:[#allocation2 + $0x170] sm:$0xff]  ;;  %v9768_v18 = vld [vmem:[#allocation39_spill] sm:$0xff] }
 0x304   : > { %v3150_v44 = vmax.f32 %v8761_v2, %v3068_v52  ;;  %v3356_v40 = vsel %vm1751_vm2, %v3353_v49, %v3355_v61  ;;  %v2953_v57 = vmax.f32 %v2857_v23, %v8788_v38  ;;  %v8804_v9 = vmax.f32 %v2858_v29, %v8790_v50  ;;  %v2622_v49 = vld [vmem:[#allocation2 + $0x130] sm:$0xf]  ;;  %6103 = vmatmul.mubr.f32.gmra.mrb[42].mxu0 %v9765_v20  ;;  %v2814_v61 = vld [vmem:[#allocation2 + $0x160] sm:$0xf]  ;;  %v2910_v52 = vld [vmem:[#allocation2 + $0x178] sm:$0xf] }
 0x305   : > { %6194 = vmatprep.mubr.f32.mxu1 %v3581_v59  ;;  %v3500_v24 = vsel %vm1896_vm3, %v3497_v26, %v3499_v46  ;;  %v2859_v0 = vmax.f32 %v2763_v51, %v2811_v12  ;;  %v2764_v47 = vmax.f32 %v2668_v32, %v8749_v6  ;;  %v2765_v58 = vmax.f32 %v2669_v15, %v8751_v62 }
 0x306   : > { %3886 = vst [vmem:[#allocation2 + $0x10a] sm:$0xff] %v3581_v59  ;;  %v3294_v37 = vmax.f32 %v3150_v44, %v3212_v43  ;;  %v3069_v21 = vrot.slane %v2953_v57, 1  ;;  %v3070_v2 = vrot.slane %v8804_v9, 1  ;;  %v3213_v33 = vrot.slane %v2953_v57, 2  ;;  %6105 = vmatprep.mubr.f32.mxu0 %v9766_v42  ;;  %v9769_v43 = vld [vmem:[#allocation38_spill] sm:$0xff] }
 0x307   : > { %v3214_v41 = vrot.slane %v8804_v9, 2  ;;  %v3357_v27 = vrot.slane %v2953_v57, 3  ;;  %v3358_v45 = vrot.slane %v8804_v9, 3  ;;  %v3501_v53 = vrot.slane %v2953_v57, 4 }
 0x308   : > { %v3438_v26 = vmax.f32 %v3294_v37, %v3356_v40  ;;  %v3071_v22 = vsel %vm1461_vm0, %v3069_v21, %v3070_v2  ;;  %v3502_v39 = vrot.slane %v8804_v9, 4  ;;  %v2955_v55 = vmax.f32 %v2859_v0, %v2907_v5  ;;  %6106 = vmatmul.mubr.f32.gmra.mrb[44].mxu0 %v9767_v60  ;;  %v8851_v60 = vld [vmem:[#allocation2 + $0x188] sm:$0xff] }
 0x309   : > { %v3151_v48 = vmax.f32 %v2953_v57, %v3071_v22  ;;  %v3215_v14 = vsel %vm1606_vm1, %v3213_v33, %v3214_v41  ;;  %v3359_v13 = vsel %vm1751_vm2, %v3357_v27, %v3358_v45  ;;  %v2670_v30 = vmax.f32 %v2574_v8, %v2622_v49  ;;  %6108 = vmatprep.mubr.f32.mxu0 %v9768_v18  ;;  %v4969_v27 = vld [vmem:[#allocation12 + $0x68] sm:$0xff]  ;;  %v2577_v8 = vld [vmem:[#allocation2 + $0x130] sm:$0xf] }
 0x30a   : > { %v3582_v25 = vmax.f32 %v3438_v26, %v3500_v24  ;;  %v3072_v35 = vrot.slane %v2955_v55, 1  ;;  %v3216_v63 = vrot.slane %v2955_v55, 2  ;;  %v2860_v4 = vmax.f32 %v2764_v47, %v8788_v38 }
 0x30b   : > { %v3295_v16 = vmax.f32 %v3151_v48, %v3215_v14  ;;  %v3503_v1 = vsel %vm1896_vm3, %v3501_v53, %v3502_v39  ;;  %v3360_v7 = vrot.slane %v2955_v55, 3  ;;  %v3504_v19 = vrot.slane %v2955_v55, 4  ;;  %v2625_v48 = vld [vmem:[#allocation2 + $0x148] sm:$0xf] }
 0x30c   : > { %6195 = vmatmul.mubr.f32.gmra.mrb[2].mxu1 %v3582_v25  ;;  %v3073_v32 = vsel %vm1461_vm0, %v3070_v2, %v3072_v35  ;;  %v3217_v11 = vsel %vm1606_vm1, %v3214_v41, %v3216_v63  ;;  %v2861_v34 = vmax.f32 %v2765_v58, %v8790_v50  ;;  %v2956_v17 = vmax.f32 %v2860_v4, %v8818_v3  ;;  %v4968_v41 = vld [vmem:[#allocation12 + $0x60] sm:$0xff] }
 0x30d   : > { %3887 = vst [vmem:[#allocation2 + $0x112] sm:$0xff] %v3582_v25  ;;  %v3439_v56 = vmax.f32 %v3295_v16, %v3359_v13  ;;  %v3152_v46 = vmax.f32 %v8804_v9, %v3073_v32  ;;  %v3361_v23 = vsel %vm1751_vm2, %v3358_v45, %v3360_v7  ;;  %v2766_v29 = vmax.f32 %v2670_v30, %v2718_v54  ;;  %v8846_v30 = vld [vmem:[#allocation2 + $0x180] sm:$0xff] }
 0x30e   : > { %v2957_v12 = vmax.f32 %v2861_v34, %v8823_v36  ;;  %v3074_v15 = vrot.slane %v2956_v17, 1  ;;  %v3218_v31 = vrot.slane %v2956_v17, 2  ;;  %v3362_v59 = vrot.slane %v2956_v17, 3  ;;  %6109 = vmatmul.mubr.f32.gmra.mrb[46].mxu0 %v9769_v43  ;;  %v2721_v16 = vld [vmem:[#allocation2 + $0x160] sm:$0xf] }
 0x30f   : > { %v3583_v51 = vmax.f32 %v3439_v56, %v3503_v1  ;;  %v3296_v44 = vmax.f32 %v3152_v46, %v3217_v11  ;;  %v3506_v40 = vrot.slane %v2956_v17, 4  ;;  %v2862_v57 = vmax.f32 %v2766_v29, %v2814_v61 }
 0x310   : > { %v3075_v24 = vrot.slane %v2957_v12, 1  ;;  %v3219_v0 = vrot.slane %v2957_v12, 2  ;;  %v3363_v5 = vrot.slane %v2957_v12, 3  ;;  %v3507_v47 = vrot.slane %v2957_v12, 4 }
 0x311   : > { %6197 = vmatprep.mubr.f32.mxu1 %v3583_v51  ;;  %v3440_v9 = vmax.f32 %v3296_v44, %v3361_v23  ;;  %v3505_v58 = vsel %vm1896_vm3, %v3502_v39, %v3504_v19  ;;  %v2958_v37 = vmax.f32 %v2862_v57, %v2910_v52  ;;  %v2671_v21 = vmax.f32 %v8718_v10, %v8749_v6  ;;  %v2817_v23 = vld [vmem:[#allocation2 + $0x178] sm:$0xf] }
 0x312   : > { %3888 = vst [vmem:[#allocation2 + $0x122] sm:$0xff] %v3583_v51  ;;  %v3076_v2 = vsel %vm1461_vm0, %v3074_v15, %v3075_v24  ;;  %v3220_v33 = vsel %vm1606_vm1, %v3218_v31, %v3219_v0  ;;  %v3364_v49 = vsel %vm1751_vm2, %v3362_v59, %v3363_v5  ;;  %v2672_v20 = vmax.f32 %v8726_v28, %v8751_v62  ;;  %v2628_v59 = vld [vmem:[#allocation2 + $0x160] sm:$0xf] }
 0x313   : > { %v3584_v45 = vmax.f32 %v3440_v9, %v3505_v58  ;;  %v3153_v53 = vmax.f32 %v2956_v17, %v3076_v2  ;;  %v3077_v42 = vrot.slane %v2958_v37, 1  ;;  %v3221_v26 = vrot.slane %v2958_v37, 2  ;;  %v2724_v9 = vld [vmem:[#allocation2 + $0x178] sm:$0xf] }
 0x314   : > { %v3508_v22 = vsel %vm1896_vm3, %v3506_v40, %v3507_v47  ;;  %v3365_v39 = vrot.slane %v2958_v37, 3  ;;  %v3509_v10 = vrot.slane %v2958_v37, 4  ;;  %v2767_v55 = vmax.f32 %v2671_v21, %v8788_v38  ;;  %v2913_v40 = vld [vmem:[#allocation2 + $0x190] sm:$0xf] }
 0x315   : > { %6198 = vmatmul.mubr.f32.gmra.mrb[4].mxu1 %v3584_v45  ;;  %v3297_v14 = vmax.f32 %v3153_v53, %v3220_v33  ;;  %v3078_v13 = vsel %vm1461_vm0, %v3075_v24, %v3077_v42  ;;  %v2768_v28 = vmax.f32 %v2672_v20, %v8790_v50  ;;  %v6447_v25 = vpack.c.bf16 %v4969_v27, %v4968_v41  ;;  %v8870_v27 = vld [vmem:[#allocation2 + $0x1a0] sm:$0xff] }
 0x316   : > { %3889 = vst [vmem:[#allocation2 + $0x12a] sm:$0xff] %v3584_v45  ;;  %v3154_v35 = vmax.f32 %v2957_v12, %v3078_v13  ;;  %v3222_v63 = vsel %vm1606_vm1, %v3219_v0, %v3221_v26  ;;  %v3366_v4 = vsel %vm1751_vm2, %v3363_v5, %v3365_v39  ;;  %v2863_v54 = vmax.f32 %v2767_v55, %v8818_v3  ;;  %v8863_v5 = vld [vmem:[#allocation2 + $0x198] sm:$0xff] }
 0x317   : > { %v3441_v1 = vmax.f32 %v3297_v14, %v3364_v49  ;;  %v2864_v7 = vmax.f32 %v2768_v28, %v8823_v36  ;;  %6448 = vmatprep.subr.bf16.mxu1 %v6447_v25  ;;  %v2673_v19 = vmax.f32 %v2577_v8, %v2625_v48  ;;  %v2674_v18 = vmax.f32 %v8749_v6, %v8788_v38 }
 0x318   : > { %v3298_v32 = vmax.f32 %v3154_v35, %v3222_v63  ;;  %v3510_v11 = vsel %vm1896_vm3, %v3507_v47, %v3509_v10  ;;  %v2959_v34 = vmax.f32 %v2863_v54, %v8846_v30  ;;  %6450 = vmatpush3.bf16.msra.mxu1 %v6447_v25  ;;  %v2675_v17 = vmax.f32 %v8751_v62, %v8790_v50  ;;  %v2580_v47 = vld [vmem:[#allocation2 + $0x148] sm:$0xf] }
 0x319   : > { %v3585_v61 = vmax.f32 %v3441_v1, %v3508_v22  ;;  %v2960_v56 = vmax.f32 %v2864_v7, %v8851_v60  ;;  %v2769_v46 = vmax.f32 %v2673_v19, %v2721_v16  ;;  %v2770_v29 = vmax.f32 %v2674_v18, %v8818_v3  ;;  %v2820_v1 = vld [vmem:[#allocation2 + $0x190] sm:$0xf] }
 0x31a   : > { %v3442_v12 = vmax.f32 %v3298_v32, %v3366_v4  ;;  %v3079_v15 = vrot.slane %v2959_v34, 1  ;;  %v3223_v31 = vrot.slane %v2959_v34, 2  ;;  %v3367_v6 = vrot.slane %v2959_v34, 3  ;;  %v4970_v32 = vld [vmem:[#allocation12 + $0x70] sm:$0xff] }
 0x31b   : > { %6200 = vmatprep.mubr.f32.mxu1 %v3585_v61  ;;  %v3080_v52 = vrot.slane %v2960_v56, 1  ;;  %v3224_v43 = vrot.slane %v2960_v56, 2  ;;  %v3368_v51 = vrot.slane %v2960_v56, 3  ;;  %v3511_v44 = vrot.slane %v2959_v34, 4  ;;  %3890 = vst [vmem:[#allocation2 + $0x13a] sm:$0xff] %v3585_v61 }
 0x31c   : > { %v3586_v62 = vmax.f32 %v3442_v12, %v3510_v11  ;;  %v3512_v57 = vrot.slane %v2960_v56, 4  ;;  %v2865_v24 = vmax.f32 %v2769_v46, %v2817_v23  ;;  %v2771_v0 = vmax.f32 %v2675_v17, %v8823_v36  ;;  %v4971_v11 = vld [vmem:[#allocation12 + $0x78] sm:$0xff]  ;;  %v2916_v46 = vld [vmem:[#allocation2 + $0x1a8] sm:$0xf] }
 0x31d   : > { %v3081_v58 = vsel %vm1461_vm0, %v3079_v15, %v3080_v52  ;;  %v3225_v37 = vsel %vm1606_vm1, %v3223_v31, %v3224_v43  ;;  %v2866_v21 = vmax.f32 %v2770_v29, %v8846_v30  ;;  %v2676_v2 = vmax.f32 %v2580_v47, %v2628_v59  ;;  %v2631_v23 = vld [vmem:[#allocation2 + $0x178] sm:$0xf] }
 0x31e   : > { %6201 = vmatmul.mubr.f32.gmra.mrb[6].mxu1 %v3586_v62  ;;  %v3155_v33 = vmax.f32 %v2959_v34, %v3081_v58  ;;  %v3369_v49 = vsel %vm1751_vm2, %v3367_v6, %v3368_v51  ;;  %v2961_v20 = vmax.f32 %v2865_v24, %v2913_v40  ;;  %v2867_v41 = vmax.f32 %v2771_v0, %v8851_v60 }
 0x31f   : > { %3891 = vst [vmem:[#allocation2 + $0x142] sm:$0xff] %v3586_v62  ;;  %v3513_v45 = vsel %vm1896_vm3, %v3511_v44, %v3512_v57  ;;  %v2962_v53 = vmax.f32 %v2866_v21, %v8863_v5  ;;  %v2772_v42 = vmax.f32 %v2676_v2, %v2724_v9  ;;  %v2677_v26 = vmax.f32 %v8788_v38, %v8818_v3  ;;  %v2727_v9 = vld [vmem:[#allocation2 + $0x190] sm:$0xf] }
 0x320   : > { %v3299_v22 = vmax.f32 %v3155_v33, %v3225_v37  ;;  %v3082_v39 = vrot.slane %v2961_v20, 1  ;;  %v3226_v10 = vrot.slane %v2961_v20, 2  ;;  %v3370_v55 = vrot.slane %v2961_v20, 3 }
 0x321   : > { %v3514_v8 = vrot.slane %v2961_v20, 4  ;;  %v8877_v48 = vmax.f32 %v2867_v41, %v8870_v27  ;;  %v3084_v14 = vrot.slane %v2962_v53, 1  ;;  %v2678_v13 = vmax.f32 %v8790_v50, %v8823_v36  ;;  %v8899_v20 = vld [vmem:[#allocation2] sm:$0xff] }
 0x322   : > { %v3443_v28 = vmax.f32 %v3299_v22, %v3369_v49  ;;  %v3083_v25 = vsel %vm1461_vm0, %v3080_v52, %v3082_v39  ;;  %v3227_v35 = vsel %vm1606_vm1, %v3224_v43, %v3226_v10  ;;  %v3228_v63 = vrot.slane %v2962_v53, 2 }
 0x323   : > { %v3156_v4 = vmax.f32 %v2960_v56, %v3083_v25  ;;  %v3371_v38 = vsel %vm1751_vm2, %v3368_v51, %v3370_v55  ;;  %v3085_v54 = vrot.slane %v8877_v48, 1  ;;  %v3229_v16 = vrot.slane %v8877_v48, 2  ;;  %v2583_v51 = vld [vmem:[#allocation2 + $0x160] sm:$0xf] }
 0x324   : > { %v3587_v7 = vmax.f32 %v3443_v28, %v3513_v45  ;;  %v3515_v19 = vsel %vm1896_vm3, %v3512_v57, %v3514_v8  ;;  %v3372_v18 = vrot.slane %v2962_v53, 3  ;;  %v3373_v50 = vrot.slane %v8877_v48, 3  ;;  %v2823_v8 = vld [vmem:[#allocation2 + $0x1a8] sm:$0xf] }
 0x325   : > { %v3300_v34 = vmax.f32 %v3156_v4, %v3227_v35  ;;  %v3086_v17 = vsel %vm1461_vm0, %v3084_v14, %v3085_v54  ;;  %v3516_v61 = vrot.slane %v2962_v53, 4  ;;  %v3517_v56 = vrot.slane %v8877_v48, 4  ;;  %v2634_v4 = vld [vmem:[#allocation2 + $0x190] sm:$0xf] }
 0x326   : > { %6203 = vmatprep.mubr.f32.mxu1 %v3587_v7  ;;  %v3157_v29 = vmax.f32 %v2962_v53, %v3086_v17  ;;  %v3230_v12 = vsel %vm1606_vm1, %v3228_v63, %v3229_v16  ;;  %v2868_v15 = vmax.f32 %v2772_v42, %v2820_v1  ;;  %v2773_v31 = vmax.f32 %v2677_v26, %v8846_v30  ;;  %v2919_v63 = vld [vmem:[#allocation2 + $0x1c0] sm:$0xf] }
 0x327   : > { %3892 = vst [vmem:[#allocation2 + $0x152] sm:$0xff] %v3587_v7  ;;  %v3444_v6 = vmax.f32 %v3300_v34, %v3371_v38  ;;  %v3374_v59 = vsel %vm1751_vm2, %v3372_v18, %v3373_v50  ;;  %v2774_v52 = vmax.f32 %v2678_v13, %v8851_v60  ;;  %v6451_v43 = vpack.c.bf16 %v4971_v11, %v4970_v32  ;;  %v2586_v32 = vld [vmem:[#allocation2 + $0x178] sm:$0xf] }
 0x328   : > { %v3301_v44 = vmax.f32 %v3157_v29, %v3230_v12  ;;  %v2964_v40 = vmax.f32 %v2868_v15, %v2916_v46  ;;  %v2869_v62 = vmax.f32 %v2773_v31, %v8863_v5  ;;  %v2679_v57 = vmax.f32 %v2583_v51, %v2631_v23  ;;  %v3902_v46 = vld [vmem:[#allocation2 + $0x10] sm:$0xf]  ;;  %v3950_v23 = vld [vmem:[#allocation2 + $0x28] sm:$0xf] }
 0x329   : > { %v3588_v24 = vmax.f32 %v3444_v6, %v3515_v19  ;;  %v3518_v0 = vsel %vm1896_vm3, %v3516_v61, %v3517_v56  ;;  %v2870_v47 = vmax.f32 %v2774_v52, %v8870_v27  ;;  %6452 = vmatprep.subr.bf16.mxu1 %v6451_v43  ;;  %v2680_v58 = vmax.f32 %v8818_v3, %v8846_v30  ;;  %v2730_v15 = vld [vmem:[#allocation2 + $0x1a8] sm:$0xf] }
 0x32a   : > { %v3445_v37 = vmax.f32 %v3301_v44, %v3374_v59  ;;  %v3087_v21 = vrot.slane %v2964_v40, 1  ;;  %v3231_v2 = vrot.slane %v2964_v40, 2  ;;  %v3375_v33 = vrot.slane %v2964_v40, 3  ;;  %6454 = vmatpush3.bf16.msra.mxu1 %v6451_v43 }
 0x32b   : > { %6204 = vmatmul.mubr.f32.gmra.mrb[8].mxu1 %v3588_v24  ;;  %v3519_v49 = vrot.slane %v2964_v40, 4  ;;  %v2965_v41 = vmax.f32 %v2869_v62, %v8899_v20  ;;  %v8903_v45 = vmax.f32 %v2870_v47, %v8899_v20  ;;  %3893 = vst [vmem:[#allocation2 + $0x15a] sm:$0xff] %v3588_v24  ;;  %v2681_v53 = vmax.f32 %v8823_v36, %v8851_v60 }
 0x32c   : > { %v3589_v42 = vmax.f32 %v3445_v37, %v3518_v0  ;;  %v3088_v3 = vsel %vm1461_vm0, %v3085_v54, %v3087_v21  ;;  %v3232_v30 = vsel %vm1606_vm1, %v3229_v16, %v3231_v2  ;;  %v2775_v26 = vmax.f32 %v2679_v57, %v2727_v9 }
 0x32d   : > { %v3158_v22 = vmax.f32 %v8877_v48, %v3088_v3  ;;  %v3376_v39 = vsel %vm1751_vm2, %v3373_v50, %v3375_v33  ;;  %v3089_v10 = vrot.slane %v2965_v41, 1  ;;  %v3090_v55 = vrot.slane %v8903_v45, 1 }
 0x32e   : > { %6206 = vmatprep.mubr.f32.mxu1 %v3589_v42  ;;  %v3233_v14 = vrot.slane %v2965_v41, 2  ;;  %v3234_v13 = vrot.slane %v8903_v45, 2  ;;  %v3377_v28 = vrot.slane %v2965_v41, 3  ;;  %v3378_v36 = vrot.slane %v8903_v45, 3  ;;  %3894 = vst [vmem:[#allocation2 + $0x16a] sm:$0xff] %v3589_v42 }
 0x32f   : > { %v3302_v60 = vmax.f32 %v3158_v22, %v3232_v30  ;;  %v3091_v25 = vsel %vm1461_vm0, %v3089_v10, %v3090_v55  ;;  %v3521_v35 = vrot.slane %v2965_v41, 4  ;;  %v3522_v48 = vrot.slane %v8903_v45, 4  ;;  %v2922_v30 = vld [vmem:[#allocation2 + $0x1d8] sm:$0xf] }
 0x330   : > { %v3520_v38 = vsel %vm1896_vm3, %v3517_v56, %v3519_v49  ;;  %v3159_v54 = vmax.f32 %v2965_v41, %v3091_v25  ;;  %v3235_v16 = vsel %vm1606_vm1, %v3233_v14, %v3234_v13  ;;  %v2871_v1 = vmax.f32 %v2775_v26, %v2823_v8  ;;  %v8935_v49 = vld [vmem:[#allocation2 + $0x30] sm:$0xff]  ;;  %v8937_v41 = vld [vmem:[#allocation2 + $0x38] sm:$0xff]  ;;  %v4046_v26 = vld [vmem:[#allocation2 + $0x40] sm:$0xf] }
 0x331   : > { %v3446_v7 = vmax.f32 %v3302_v60, %v3376_v39  ;;  %v3379_v19 = vsel %vm1751_vm2, %v3377_v28, %v3378_v36  ;;  %v2776_v18 = vmax.f32 %v2680_v58, %v8863_v5  ;;  %v2777_v50 = vmax.f32 %v2681_v53, %v8870_v27  ;;  %v2826_v58 = vld [vmem:[#allocation2 + $0x1c0] sm:$0xf]  ;;  %v8943_v8 = vld [vmem:[#allocation2 + $0x48] sm:$0xff]  ;;  %v8945_v14 = vld [vmem:[#allocation2 + $0x50] sm:$0xff] }
 0x332   : > { %v3303_v11 = vmax.f32 %v3159_v54, %v3235_v16  ;;  %v3523_v34 = vsel %vm1896_vm3, %v3521_v35, %v3522_v48  ;;  %v2967_v17 = vmax.f32 %v2871_v1, %v2919_v63  ;;  %v2682_v61 = vmax.f32 %v2586_v32, %v2634_v4  ;;  %v8953_v63 = vld [vmem:[#allocation2 + $0x60] sm:$0xff]  ;;  %v8955_v4 = vld [vmem:[#allocation2 + $0x68] sm:$0xff] }
 0x333   : > { %v3590_v56 = vmax.f32 %v3446_v7, %v3520_v38  ;;  %v2872_v29 = vmax.f32 %v2776_v18, %v8899_v20  ;;  %v2873_v12 = vmax.f32 %v2777_v50, %v8899_v20  ;;  %v3998_v51 = vmax.f32 %v3902_v46, %v3950_v23  ;;  %v4142_v7 = vld [vmem:[#allocation2 + $0x58] sm:$0xf] }
 0x334   : > { %v3447_v31 = vmax.f32 %v3303_v11, %v3379_v19  ;;  %v3092_v6 = vrot.slane %v2967_v17, 1  ;;  %v3236_v59 = vrot.slane %v2967_v17, 2  ;;  %v3380_v5 = vrot.slane %v2967_v17, 3 }
 0x335   : > { %6207 = vmatmul.mubr.f32.gmra.mrb[10].mxu1 %v3590_v56  ;;  %v3524_v27 = vrot.slane %v2967_v17, 4  ;;  %v2968_v52 = vmax.f32 %v2872_v29, %v8899_v20  ;;  %v8926_v43 = vmax.f32 %v2873_v12, %v8899_v20  ;;  %3895 = vst [vmem:[#allocation2 + $0x172] sm:$0xff] %v3590_v56  ;;  %v2778_v57 = vmax.f32 %v2682_v61, %v2730_v15 }
 0x336   : > { %v3591_v44 = vmax.f32 %v3447_v31, %v3523_v34  ;;  %v3093_v40 = vsel %vm1461_vm0, %v3090_v55, %v3092_v6  ;;  %v3237_v62 = vsel %vm1606_vm1, %v3234_v13, %v3236_v59  ;;  %v3381_v0 = vsel %vm1751_vm2, %v3378_v36, %v3380_v5  ;;  %v4238_v31 = vld [vmem:[#allocation2 + $0x70] sm:$0xf] }
 0x337   : > { %v3160_v24 = vmax.f32 %v8903_v45, %v3093_v40  ;;  %v3094_v47 = vrot.slane %v2968_v52, 1  ;;  %v3095_v9 = vrot.slane %v8926_v43, 1  ;;  %v3238_v37 = vrot.slane %v2968_v52, 2 }
 0x338   : > { %6209 = vmatprep.mubr.f32.mxu1 %v3591_v44  ;;  %v3239_v21 = vrot.slane %v8926_v43, 2  ;;  %v3382_v2 = vrot.slane %v2968_v52, 3  ;;  %v3383_v33 = vrot.slane %v8926_v43, 3  ;;  %3896 = vst [vmem:[#allocation2 + $0x182] sm:$0xff] %v3591_v44  ;;  %v3526_v42 = vrot.slane %v2968_v52, 4 }
 0x339   : > { %v3304_v53 = vmax.f32 %v3160_v24, %v3237_v62  ;;  %v3096_v45 = vsel %vm1461_vm0, %v3094_v47, %v3095_v9  ;;  %v3527_v3 = vrot.slane %v8926_v43, 4  ;;  %v3525_v22 = vsel %vm1896_vm3, %v3522_v48, %v3524_v27 }
 0x33a   : > { %v3161_v39 = vmax.f32 %v2968_v52, %v3096_v45  ;;  %v3240_v10 = vsel %vm1606_vm1, %v3238_v37, %v3239_v21  ;;  %v2874_v55 = vmax.f32 %v2778_v57, %v2826_v58  ;;  %v3384_v28 = vsel %vm1751_vm2, %v3382_v2, %v3383_v33  ;;  %v8975_v2 = vld [vmem:[#allocation2 + $0x78] sm:$0xff] }
 0x33b   : > { %v3448_v13 = vmax.f32 %v3304_v53, %v3381_v0  ;;  %v4092_v36 = vmax.f32 %v8899_v20, %v8935_v49  ;;  %v4093_v60 = vmax.f32 %v8899_v20, %v8937_v41  ;;  %v3528_v35 = vsel %vm1896_vm3, %v3526_v42, %v3527_v3  ;;  %v3905_v42 = vld [vmem:[#allocation2 + $0x28] sm:$0xf] }
 0x33c   : > { %v3305_v25 = vmax.f32 %v3161_v39, %v3240_v10  ;;  %v2970_v48 = vmax.f32 %v2874_v55, %v2922_v30  ;;  %v4094_v38 = vmax.f32 %v3998_v51, %v4046_v26 }
 0x33d   : > { %v3592_v54 = vmax.f32 %v3448_v13, %v3525_v22  ;;  %v4188_v16 = vmax.f32 %v4092_v36, %v8943_v8  ;;  %v4189_v1 = vmax.f32 %v4093_v60, %v8945_v14 }
 0x33e   : > { %v3449_v19 = vmax.f32 %v3305_v25, %v3384_v28  ;;  %v3097_v18 = vrot.slane %v2970_v48, 1  ;;  %v3241_v50 = vrot.slane %v2970_v48, 2  ;;  %v3385_v32 = vrot.slane %v2970_v48, 3  ;;  %v4049_v25 = vld [vmem:[#allocation2 + $0x58] sm:$0xf] }
 0x33f   : > { %6210 = vmatmul.mubr.f32.gmra.mrb[12].mxu1 %v3592_v54  ;;  %v3529_v20 = vrot.slane %v2970_v48, 4  ;;  %3897 = vst [vmem:[#allocation2 + $0x18a] sm:$0xff] %v3592_v54  ;;  %v4284_v11 = vmax.f32 %v4188_v16, %v8953_v63  ;;  %v8961_v34 = vmax.f32 %v4189_v1, %v8955_v4  ;;  %v4190_v23 = vmax.f32 %v4094_v38, %v4142_v7 }
 0x340   : > { %v3593_v17 = vmax.f32 %v3449_v19, %v3528_v35  ;;  %v3098_v61 = vsel %vm1461_vm0, %v3095_v9, %v3097_v18  ;;  %v3242_v46 = vsel %vm1606_vm1, %v3239_v21, %v3241_v50  ;;  %v3386_v29 = vsel %vm1751_vm2, %v3383_v33, %v3385_v32  ;;  %v8977_v33 = vld [vmem:[#allocation2 + $0x80] sm:$0xff]  ;;  %v4145_v32 = vld [vmem:[#allocation2 + $0x70] sm:$0xf] }
 0x341   : > { %v3162_v56 = vmax.f32 %v8926_v43, %v3098_v61  ;;  %v4380_v12 = vrot.slane %v4284_v11, 1  ;;  %v4381_v15 = vrot.slane %v8961_v34, 1  ;;  %v4524_v6 = vrot.slane %v4284_v11, 2 }
 0x342   : > { %6212 = vmatprep.mubr.f32.mxu1 %v3593_v17  ;;  %3898 = vst [vmem:[#allocation2 + $0x19a] sm:$0xff] %v3593_v17  ;;  %v4525_v59 = vrot.slane %v8961_v34, 2  ;;  %v4668_v5 = vrot.slane %v4284_v11, 3  ;;  %v4669_v27 = vrot.slane %v8961_v34, 3  ;;  %v4812_v44 = vrot.slane %v4284_v11, 4 }
 0x343   : > { %v3306_v52 = vmax.f32 %v3162_v56, %v3242_v46  ;;  %v4382_v51 = vsel %vm1461_vm0, %v4380_v12, %v4381_v15  ;;  %v4813_v43 = vrot.slane %v8961_v34, 4  ;;  %v3530_v40 = vsel %vm1896_vm3, %v3527_v3, %v3529_v20  ;;  %v3953_v3 = vld [vmem:[#allocation2 + $0x40] sm:$0xf] }
 0x344   : > { %v4492_v62 = vmax.f32 %v4284_v11, %v4382_v51  ;;  %v4526_v57 = vsel %vm1606_vm1, %v4524_v6, %v4525_v59  ;;  %v4286_v24 = vmax.f32 %v4190_v23, %v4238_v31  ;;  %v4670_v47 = vsel %vm1751_vm2, %v4668_v5, %v4669_v27  ;;  %v4241_v23 = vld [vmem:[#allocation2 + $0x88] sm:$0xf]  ;;  %v4052_v5 = vld [vmem:[#allocation2 + $0x70] sm:$0xf] }
 0x345   : > { %v3450_v0 = vmax.f32 %v3306_v52, %v3386_v29  ;;  %v4814_v45 = vsel %vm1896_vm3, %v4812_v44, %v4813_v43  ;;  %v4287_v13 = vmax.f32 %v4284_v11, %v8975_v2  ;;  %v8987_v28 = vmax.f32 %v8961_v34, %v8977_v33  ;;  %v3908_v29 = vld [vmem:[#allocation2 + $0x40] sm:$0xf] }
 0x346   : > { %v4636_v9 = vmax.f32 %v4492_v62, %v4526_v57  ;;  %v4383_v58 = vrot.slane %v4286_v24, 1  ;;  %v4527_v37 = vrot.slane %v4286_v24, 2  ;;  %v4671_v21 = vrot.slane %v4286_v24, 3  ;;  %v9008_v57 = vld [vmem:[#allocation2 + $0x98] sm:$0xff] }
 0x347   : > { %v3594_v53 = vmax.f32 %v3450_v0, %v3530_v40  ;;  %v4815_v39 = vrot.slane %v4286_v24, 4  ;;  %v4001_v60 = vmax.f32 %v3905_v42, %v3953_v3  ;;  %v4002_v35 = vmax.f32 %v8935_v49, %v8943_v8 }
 0x348   : > { %v4780_v30 = vmax.f32 %v4636_v9, %v4670_v47  ;;  %v4384_v26 = vsel %vm1461_vm0, %v4381_v15, %v4383_v58  ;;  %v4528_v22 = vsel %vm1606_vm1, %v4525_v59, %v4527_v37  ;;  %v4672_v55 = vsel %vm1751_vm2, %v4669_v27, %v4671_v21  ;;  %v9003_v59 = vld [vmem:[#allocation2 + $0x90] sm:$0xff]  ;;  %v3911_v47 = vld [vmem:[#allocation2 + $0x58] sm:$0xf] }
 0x349   : > { %6213 = vmatmul.mubr.f32.gmra.mrb[14].mxu1 %v3594_v53  ;;  %3899 = vst [vmem:[#allocation2 + $0x1a2] sm:$0xff] %v3594_v53  ;;  %v4493_v10 = vmax.f32 %v8961_v34, %v4384_v26  ;;  %v4003_v48 = vmax.f32 %v8937_v41, %v8945_v14  ;;  %v4385_v54 = vrot.slane %v4287_v13, 1  ;;  %v4386_v16 = vrot.slane %v8987_v28, 1  ;;  %v3956_v41 = vld [vmem:[#allocation2 + $0x58] sm:$0xf] }
 0x34a   : > { %v4924_v36 = vmax.f32 %v4780_v30, %v4814_v45  ;;  %v4529_v1 = vrot.slane %v4287_v13, 2  ;;  %v4530_v7 = vrot.slane %v8987_v28, 2  ;;  %v4673_v19 = vrot.slane %v4287_v13, 3  ;;  %v3959_v27 = vld [vmem:[#allocation2 + $0x70] sm:$0xf] }
 0x34b   : > { %v4637_v38 = vmax.f32 %v4493_v10, %v4528_v22  ;;  %v4674_v18 = vrot.slane %v8987_v28, 3  ;;  %v4817_v50 = vrot.slane %v4287_v13, 4  ;;  %v4387_v11 = vsel %vm1461_vm0, %v4385_v54, %v4386_v16 }
 0x34c   : > { %6247 = vmatprep.mubr.f32.mxu1 %v4924_v36  ;;  %v4818_v49 = vrot.slane %v8987_v28, 4  ;;  %v4097_v34 = vmax.f32 %v4001_v60, %v4049_v25  ;;  %v4816_v17 = vsel %vm1896_vm3, %v4813_v43, %v4815_v39  ;;  %v4494_v61 = vmax.f32 %v4287_v13, %v4387_v11 }
 0x34d   : > { %v4781_v20 = vmax.f32 %v4637_v38, %v4672_v55  ;;  %v4531_v46 = vsel %vm1606_vm1, %v4529_v1, %v4530_v7  ;;  %v4098_v56 = vmax.f32 %v4002_v35, %v8953_v63  ;;  %v4675_v15 = vsel %vm1751_vm2, %v4673_v19, %v4674_v18 }
 0x34e   : > { %v4193_v31 = vmax.f32 %v4097_v34, %v4145_v32  ;;  %v4099_v6 = vmax.f32 %v4003_v48, %v8955_v4  ;;  %v4638_v52 = vmax.f32 %v4494_v61, %v4531_v46  ;;  %v4819_v51 = vsel %vm1896_vm3, %v4817_v50, %v4818_v49  ;;  %v4244_v48 = vld [vmem:[#allocation2 + $0xa0] sm:$0xf]  ;;  %v9026_v34 = vld [vmem:[#allocation2 + $0xa8] sm:$0xff] }
 0x34f   : > { %v4925_v12 = vmax.f32 %v4781_v20, %v4816_v17  ;;  %v4194_v44 = vmax.f32 %v4098_v56, %v8975_v2  ;;  %v4004_v43 = vmax.f32 %v3908_v29, %v3956_v41  ;;  %v4005_v24 = vmax.f32 %v8943_v8, %v8953_v63  ;;  %v4148_v8 = vld [vmem:[#allocation2 + $0x88] sm:$0xf]  ;;  %v9028_v41 = vld [vmem:[#allocation2 + $0xb0] sm:$0xff] }
 0x350   : > { %v4289_v40 = vmax.f32 %v4193_v31, %v4241_v23  ;;  %v4195_v62 = vmax.f32 %v4099_v6, %v8977_v33  ;;  %v4006_v0 = vmax.f32 %v8945_v14, %v8955_v4  ;;  %v4782_v9 = vmax.f32 %v4638_v52, %v4675_v15  ;;  %v4055_v17 = vld [vmem:[#allocation2 + $0x88] sm:$0xf] }
 0x351   : > { %6248 = vmatmul.mubr.f32.vlgmr.msra.gmra.mrb[16].mxu1 %v4925_v12  ;;  %v4290_v58 = vmax.f32 %v4194_v44, %v9003_v59  ;;  %v4100_v37 = vmax.f32 %v4004_v43, %v4052_v5  ;;  %v4007_v21 = vmax.f32 %v3911_v47, %v3959_v27  ;;  %v4101_v3 = vmax.f32 %v4005_v24, %v8975_v2  ;;  %v4151_v47 = vld [vmem:[#allocation2 + $0xa0] sm:$0xf] }
 0x352   : > { %v4388_v53 = vrot.slane %v4289_v40, 1  ;;  %v4532_v45 = vrot.slane %v4289_v40, 2  ;;  %v4676_v42 = vrot.slane %v4289_v40, 3  ;;  %v4926_v30 = vmax.f32 %v4782_v9, %v4819_v51 }
 0x353   : > { %v4820_v26 = vrot.slane %v4289_v40, 4  ;;  %v4291_v22 = vmax.f32 %v4195_v62, %v9008_v57  ;;  %v4390_v39 = vrot.slane %v4290_v58, 1  ;;  %v4534_v13 = vrot.slane %v4290_v58, 2 }
 0x354   : > { %v4389_v10 = vsel %vm1461_vm0, %v4386_v16, %v4388_v53  ;;  %v4533_v14 = vsel %vm1606_vm1, %v4530_v7, %v4532_v45  ;;  %v4677_v55 = vsel %vm1751_vm2, %v4674_v18, %v4676_v42  ;;  %6250 = vmatprep.mubr.f32.mxu1 %v4926_v30  ;;  %v4678_v35 = vrot.slane %v4290_v58, 3  ;;  %v4247_v30 = vld [vmem:[#allocation2 + $0xb8] sm:$0xf] }
 0x355   : > { %v4495_v36 = vmax.f32 %v8987_v28, %v4389_v10  ;;  %v4391_v60 = vrot.slane %v4291_v22, 1  ;;  %v4535_v25 = vrot.slane %v4291_v22, 2  ;;  %v4679_v38 = vrot.slane %v4291_v22, 3  ;;  %v3962_v10 = vld [vmem:[#allocation2 + $0x88] sm:$0xf] }
 0x356   : > { %v4822_v54 = vrot.slane %v4290_v58, 4  ;;  %v4823_v1 = vrot.slane %v4291_v22, 4  ;;  %v4196_v19 = vmax.f32 %v4100_v37, %v4148_v8  ;;  %v4821_v32 = vsel %vm1896_vm3, %v4818_v49, %v4820_v26 }
 0x357   : > { %v4639_v50 = vmax.f32 %v4495_v36, %v4533_v14  ;;  %v4392_v16 = vsel %vm1461_vm0, %v4390_v39, %v4391_v60  ;;  %v4102_v7 = vmax.f32 %v4006_v0, %v8977_v33  ;;  %v4536_v20 = vsel %vm1606_vm1, %v4534_v13, %v4535_v25 }
 0x358   : > { %v4496_v18 = vmax.f32 %v4290_v58, %v4392_v16  ;;  %v4680_v28 = vsel %vm1751_vm2, %v4678_v35, %v4679_v38  ;;  %v4292_v11 = vmax.f32 %v4196_v19, %v4244_v48  ;;  %v4824_v46 = vsel %vm1896_vm3, %v4822_v54, %v4823_v1 }
 0x359   : > { %v4783_v61 = vmax.f32 %v4639_v50, %v4677_v55  ;;  %v4197_v49 = vmax.f32 %v4101_v3, %v9003_v59  ;;  %v4198_v23 = vmax.f32 %v4102_v7, %v9008_v57  ;;  %v4103_v27 = vmax.f32 %v4007_v21, %v4055_v17 }
 0x35a   : > { %v4640_v56 = vmax.f32 %v4496_v18, %v4536_v20  ;;  %v4393_v29 = vrot.slane %v4292_v11, 1  ;;  %v4537_v12 = vrot.slane %v4292_v11, 2  ;;  %v4681_v15 = vrot.slane %v4292_v11, 3  ;;  %v9055_v20 = vld [vmem:[#allocation2 + $0xc0] sm:$0xff] }
 0x35b   : > { %v4927_v31 = vmax.f32 %v4783_v61, %v4821_v32  ;;  %v4293_v6 = vmax.f32 %v4197_v49, %v9026_v34  ;;  %v9035_v5 = vmax.f32 %v4198_v23, %v9028_v41  ;;  %v4825_v43 = vrot.slane %v4292_v11, 4  ;;  %v4058_v32 = vld [vmem:[#allocation2 + $0xa0] sm:$0xf]  ;;  %v4154_v61 = vld [vmem:[#allocation2 + $0xb8] sm:$0xf] }
 0x35c   : > { %v4784_v52 = vmax.f32 %v4640_v56, %v4680_v28  ;;  %v4394_v51 = vsel %vm1461_vm0, %v4391_v60, %v4393_v29  ;;  %v4538_v44 = vsel %vm1606_vm1, %v4535_v25, %v4537_v12  ;;  %v4682_v62 = vsel %vm1751_vm2, %v4679_v38, %v4681_v15  ;;  %v3914_v38 = vld [vmem:[#allocation2 + $0x70] sm:$0xf] }
 0x35d   : > { %6251 = vmatmul.mubr.f32.gmra.mrb[18].mxu1 %v4927_v31  ;;  %v4497_v40 = vmax.f32 %v4291_v22, %v4394_v51  ;;  %v4395_v24 = vrot.slane %v4293_v6, 1  ;;  %v4396_v0 = vrot.slane %v9035_v5, 1  ;;  %v4539_v58 = vrot.slane %v4293_v6, 2  ;;  %v4250_v51 = vld [vmem:[#allocation2 + $0xd0] sm:$0xf] }
 0x35e   : > { %v4928_v9 = vmax.f32 %v4784_v52, %v4824_v46  ;;  %v4540_v37 = vrot.slane %v9035_v5, 2  ;;  %v4683_v53 = vrot.slane %v4293_v6, 3  ;;  %v4684_v42 = vrot.slane %v9035_v5, 3 }
 0x35f   : > { %v4641_v21 = vmax.f32 %v4497_v40, %v4538_v44  ;;  %v4397_v45 = vsel %vm1461_vm0, %v4395_v24, %v4396_v0  ;;  %v4827_v3 = vrot.slane %v4293_v6, 4  ;;  %v4826_v26 = vsel %vm1896_vm3, %v4823_v1, %v4825_v43  ;;  %v9073_v43 = vpop.f32.mrb[48].mxu0 }
 0x360   : > { %6253 = vmatprep.mubr.f32.mxu1 %v4928_v9  ;;  %v4498_v22 = vmax.f32 %v4293_v6, %v4397_v45  ;;  %v4828_v39 = vrot.slane %v9035_v5, 4  ;;  %v4199_v8 = vmax.f32 %v4103_v27, %v4151_v47  ;;  %v4541_v55 = vsel %vm1606_vm1, %v4539_v58, %v4540_v37  ;;  %v9075_v47 = vpop.f32.mrb[49].mxu0 }
 0x361   : > { %v4785_v14 = vmax.f32 %v4641_v21, %v4682_v62  ;;  %v4008_v13 = vmax.f32 %v8953_v63, %v8975_v2  ;;  %v4009_v36 = vmax.f32 %v8955_v4, %v8977_v33  ;;  %v4685_v25 = vsel %vm1751_vm2, %v4683_v53, %v4684_v42  ;;  %v9057_v4 = vld [vmem:[#allocation2 + $0xc8] sm:$0xff]  ;;  %v9077_v21 = vpop.f32.mrb[50].mxu0 }
 0x362   : > { %v4642_v60 = vmax.f32 %v4498_v22, %v4541_v55  ;;  %v4829_v35 = vsel %vm1896_vm3, %v4827_v3, %v4828_v39  ;;  %v4295_v48 = vmax.f32 %v4199_v8, %v4247_v30  ;;  %v4010_v50 = vmax.f32 %v3914_v38, %v3962_v10  ;;  %v3917_v30 = vld [vmem:[#allocation2 + $0x88] sm:$0xf] }
 0x363   : > { %v4929_v54 = vmax.f32 %v4785_v14, %v4826_v26  ;;  %v4104_v1 = vmax.f32 %v4008_v13, %v9003_v59  ;;  %v4105_v19 = vmax.f32 %v4009_v36, %v9008_v57  ;;  %v4011_v46 = vmax.f32 %v8975_v2, %v9003_v59  ;;  %v9080_v26 = vpop.f32.mrb[51].mxu0  ;;  %v4061_v14 = vld [vmem:[#allocation2 + $0xb8] sm:$0xf] }
 0x364   : > { %v4786_v16 = vmax.f32 %v4642_v60, %v4685_v25  ;;  %v4398_v7 = vrot.slane %v4295_v48, 1  ;;  %v4542_v63 = vrot.slane %v4295_v48, 2  ;;  %v4686_v18 = vrot.slane %v4295_v48, 3  ;;  %v9084_v55 = vpop.f32.mrb[52].mxu0 }
 0x365   : > { %6254 = vmatmul.mubr.f32.gmra.mrb[20].mxu1 %v4929_v54  ;;  %v4830_v28 = vrot.slane %v4295_v48, 4  ;;  %v4200_v11 = vmax.f32 %v4104_v1, %v9026_v34  ;;  %v4201_v17 = vmax.f32 %v4105_v19, %v9028_v41  ;;  %v4106_v29 = vmax.f32 %v4010_v50, %v4058_v32  ;;  %v9087_v48 = vpop.f32.mrb[53].mxu0  ;;  %v9090_v50 = vld [vmem:[#allocation2 + $0xd8] sm:$0xff]  ;;  %v9092_v32 = vld [vmem:[#allocation2 + $0xe0] sm:$0xff] }
 0x366   : > { %v4930_v49 = vmax.f32 %v4786_v16, %v4829_v35  ;;  %v4399_v23 = vsel %vm1461_vm0, %v4396_v0, %v4398_v7  ;;  %v4543_v56 = vsel %vm1606_vm1, %v4540_v37, %v4542_v63  ;;  %v4687_v15 = vsel %vm1751_vm2, %v4684_v42, %v4686_v18  ;;  %v3965_v0 = vld [vmem:[#allocation2 + $0xa0] sm:$0xf]  ;;  %v4157_v35 = vld [vmem:[#allocation2 + $0xd0] sm:$0xf] }
 0x367   : > { %v4499_v12 = vmax.f32 %v9035_v5, %v4399_v23  ;;  %v4296_v31 = vmax.f32 %v4200_v11, %v9055_v20  ;;  %v4297_v6 = vmax.f32 %v4201_v17, %v9057_v4  ;;  %v4831_v27 = vsel %vm1896_vm3, %v4828_v39, %v4830_v28 }
 0x368   : > { %6256 = vmatprep.mubr.f32.mxu1 %v4930_v49  ;;  %v4202_v52 = vmax.f32 %v4106_v29, %v4154_v61  ;;  %v4012_v2 = vmax.f32 %v8977_v33, %v9008_v57  ;;  %v4107_v44 = vmax.f32 %v4011_v46, %v9026_v34  ;;  %v4013_v10 = vmax.f32 %v3917_v30, %v3965_v0  ;;  %v4064_v30 = vld [vmem:[#allocation2 + $0xd0] sm:$0xf] }
 0x369   : > { %v4643_v40 = vmax.f32 %v4499_v12, %v4543_v56  ;;  %v4400_v5 = vrot.slane %v4296_v31, 1  ;;  %v4401_v62 = vrot.slane %v4297_v6, 1  ;;  %v4544_v24 = vrot.slane %v4296_v31, 2 }
 0x36a   : > { %v4545_v9 = vrot.slane %v4297_v6, 2  ;;  %v4688_v58 = vrot.slane %v4296_v31, 3  ;;  %v4689_v37 = vrot.slane %v4297_v6, 3  ;;  %v4832_v53 = vrot.slane %v4296_v31, 4 }
 0x36b   : > { %v4787_v45 = vmax.f32 %v4643_v40, %v4687_v15  ;;  %v4402_v33 = vsel %vm1461_vm0, %v4400_v5, %v4401_v62  ;;  %v4833_v42 = vrot.slane %v4297_v6, 4  ;;  %v4298_v3 = vmax.f32 %v4202_v52, %v4250_v51  ;;  %v3968_v51 = vld [vmem:[#allocation2 + $0xb8] sm:$0xf] }
 0x36c   : > { %v4500_v22 = vmax.f32 %v4296_v31, %v4402_v33  ;;  %v4546_v39 = vsel %vm1606_vm1, %v4544_v24, %v4545_v9  ;;  %v4690_v8 = vsel %vm1751_vm2, %v4688_v58, %v4689_v37  ;;  %v4108_v25 = vmax.f32 %v4012_v2, %v9028_v41  ;;  %v9094_v16 = vpop.f32.mrb[54].mxu0  ;;  %v3920_v58 = vld [vmem:[#allocation2 + $0xa0] sm:$0xf] }
 0x36d   : > { %v4931_v13 = vmax.f32 %v4787_v45, %v4831_v27  ;;  %v4403_v36 = vrot.slane %v4298_v3, 1  ;;  %v4547_v60 = vrot.slane %v4298_v3, 2  ;;  %v4834_v54 = vsel %vm1896_vm3, %v4832_v53, %v4833_v42  ;;  %v9099_v11 = vpop.f32.mrb[55].mxu0  ;;  %v4253_v27 = vld [vmem:[#allocation2 + $0xe8] sm:$0xf] }
 0x36e   : > { %v4644_v38 = vmax.f32 %v4500_v22, %v4546_v39  ;;  %v4691_v1 = vrot.slane %v4298_v3, 3  ;;  %v4835_v19 = vrot.slane %v4298_v3, 4  ;;  %v4203_v63 = vmax.f32 %v4107_v44, %v9055_v20 }
 0x36f   : > { %6257 = vmatmul.mubr.f32.gmra.mrb[22].mxu1 %v4931_v13  ;;  %v4404_v7 = vsel %vm1461_vm0, %v4401_v62, %v4403_v36  ;;  %v4204_v18 = vmax.f32 %v4108_v25, %v9057_v4  ;;  %v4109_v28 = vmax.f32 %v4013_v10, %v4061_v14  ;;  %v4548_v46 = vsel %vm1606_vm1, %v4545_v9, %v4547_v60  ;;  %v9116_v25 = vld [vmem:[#allocation2 + $0xf0] sm:$0xff] }
 0x370   : > { %v4788_v17 = vmax.f32 %v4644_v38, %v4690_v8  ;;  %v4501_v61 = vmax.f32 %v4297_v6, %v4404_v7  ;;  %v4692_v49 = vsel %vm1751_vm2, %v4689_v37, %v4691_v1  ;;  %v4836_v23 = vsel %vm1896_vm3, %v4833_v42, %v4835_v19  ;;  %v9121_v19 = vld [vmem:[#allocation2 + $0xf8] sm:$0xff] }
 0x371   : > { %v4299_v56 = vmax.f32 %v4203_v63, %v9090_v50  ;;  %v4300_v29 = vmax.f32 %v4204_v18, %v9092_v32  ;;  %v4205_v12 = vmax.f32 %v4109_v28, %v4157_v35  ;;  %v4014_v52 = vmax.f32 %v9003_v59, %v9026_v34  ;;  %v4160_v35 = vld [vmem:[#allocation2 + $0xe8] sm:$0xf] }
 0x372   : > { %v4932_v15 = vmax.f32 %v4788_v17, %v4834_v54  ;;  %v4645_v31 = vmax.f32 %v4501_v61, %v4548_v46  ;;  %v4015_v6 = vmax.f32 %v9008_v57, %v9028_v41  ;;  %v4016_v33 = vmax.f32 %v3920_v58, %v3968_v51 }
 0x373   : > { %v4405_v2 = vrot.slane %v4299_v56, 1  ;;  %v4406_v44 = vrot.slane %v4300_v29, 1  ;;  %v4549_v40 = vrot.slane %v4299_v56, 2  ;;  %v4550_v5 = vrot.slane %v4300_v29, 2 }
 0x374   : > { %6259 = vmatprep.mubr.f32.mxu1 %v4932_v15  ;;  %v4789_v62 = vmax.f32 %v4645_v31, %v4692_v49  ;;  %v4693_v24 = vrot.slane %v4299_v56, 3  ;;  %v4694_v0 = vrot.slane %v4300_v29, 3  ;;  %v4837_v9 = vrot.slane %v4299_v56, 4  ;;  %v4256_v31 = vld [vmem:[#allocation2 + $0x100] sm:$0xf] }
 0x375   : > { %v4407_v37 = vsel %vm1461_vm0, %v4405_v2, %v4406_v44  ;;  %v4838_v53 = vrot.slane %v4300_v29, 4  ;;  %v4301_v45 = vmax.f32 %v4205_v12, %v4253_v27  ;;  %v4551_v57 = vsel %vm1606_vm1, %v4549_v40, %v4550_v5  ;;  %v3971_v27 = vld [vmem:[#allocation2 + $0xd0] sm:$0xf] }
 0x376   : > { %v4933_v59 = vmax.f32 %v4789_v62, %v4836_v23  ;;  %v4502_v42 = vmax.f32 %v4299_v56, %v4407_v37  ;;  %v4695_v3 = vsel %vm1751_vm2, %v4693_v24, %v4694_v0  ;;  %v4110_v10 = vmax.f32 %v4014_v52, %v9055_v20  ;;  %v3923_v24 = vld [vmem:[#allocation2 + $0xb8] sm:$0xf] }
 0x377   : > { %v4408_v22 = vrot.slane %v4301_v45, 1  ;;  %v4552_v39 = vrot.slane %v4301_v45, 2  ;;  %v4696_v8 = vrot.slane %v4301_v45, 3  ;;  %v4839_v13 = vsel %vm1896_vm3, %v4837_v9, %v4838_v53 }
 0x378   : > { %6260 = vmatmul.mubr.f32.gmra.mrb[24].mxu1 %v4933_v59  ;;  %v4646_v14 = vmax.f32 %v4502_v42, %v4551_v57  ;;  %v4840_v36 = vrot.slane %v4301_v45, 4  ;;  %v4111_v60 = vmax.f32 %v4015_v6, %v9057_v4  ;;  %v4206_v1 = vmax.f32 %v4110_v10, %v9090_v50 }
 0x379   : > { %v4409_v38 = vsel %vm1461_vm0, %v4406_v44, %v4408_v22  ;;  %v4553_v54 = vsel %vm1606_vm1, %v4550_v5, %v4552_v39  ;;  %v4112_v7 = vmax.f32 %v4016_v33, %v4064_v30  ;;  %v4697_v28 = vsel %vm1751_vm2, %v4694_v0, %v4696_v8  ;;  %v4067_v33 = vld [vmem:[#allocation2 + $0xe8] sm:$0xf] }
 0x37a   : > { %v4790_v63 = vmax.f32 %v4646_v14, %v4695_v3  ;;  %v4503_v18 = vmax.f32 %v4300_v29, %v4409_v38  ;;  %v4207_v17 = vmax.f32 %v4111_v60, %v9092_v32  ;;  %v4841_v61 = vsel %vm1896_vm3, %v4838_v53, %v4840_v36  ;;  %v9137_v30 = vld [vmem:[#allocation2 + $0x108] sm:$0xff]  ;;  %v4163_v36 = vld [vmem:[#allocation2 + $0x100] sm:$0xf] }
 0x37b   : > { %v4302_v46 = vmax.f32 %v4206_v1, %v9116_v25  ;;  %v4208_v49 = vmax.f32 %v4112_v7, %v4160_v35  ;;  %v4017_v23 = vmax.f32 %v9026_v34, %v9055_v20  ;;  %v4018_v29 = vmax.f32 %v9028_v41, %v9057_v4 }
 0x37c   : > { %v4934_v56 = vmax.f32 %v4790_v63, %v4839_v13  ;;  %v4647_v12 = vmax.f32 %v4503_v18, %v4553_v54  ;;  %v4303_v15 = vmax.f32 %v4207_v17, %v9121_v19  ;;  %v4019_v58 = vmax.f32 %v3923_v24, %v3971_v27  ;;  %v9143_v13 = vld [vmem:[#allocation2 + $0x110] sm:$0xff] }
 0x37d   : > { %v4410_v52 = vrot.slane %v4302_v46, 1  ;;  %v4554_v6 = vrot.slane %v4302_v46, 2  ;;  %v4698_v51 = vrot.slane %v4302_v46, 3  ;;  %v4842_v2 = vrot.slane %v4302_v46, 4 }
 0x37e   : > { %6262 = vmatprep.mubr.f32.mxu1 %v4934_v56  ;;  %v4791_v44 = vmax.f32 %v4647_v12, %v4697_v28  ;;  %v4411_v40 = vrot.slane %v4303_v15, 1  ;;  %v4555_v5 = vrot.slane %v4303_v15, 2  ;;  %v4699_v62 = vrot.slane %v4303_v15, 3 }
 0x37f   : > { %v4843_v34 = vrot.slane %v4303_v15, 4  ;;  %v4304_v0 = vmax.f32 %v4208_v49, %v4256_v31  ;;  %v4113_v9 = vmax.f32 %v4017_v23, %v9090_v50  ;;  %v4114_v45 = vmax.f32 %v4018_v29, %v9092_v32  ;;  %v4259_v23 = vld [vmem:[#allocation2 + $0x118] sm:$0xf] }
 0x380   : > { %v4935_v37 = vmax.f32 %v4791_v44, %v4841_v61  ;;  %v4412_v53 = vsel %vm1461_vm0, %v4410_v52, %v4411_v40  ;;  %v4556_v41 = vsel %vm1606_vm1, %v4554_v6, %v4555_v5  ;;  %v4700_v42 = vsel %vm1751_vm2, %v4698_v51, %v4699_v62  ;;  %v9139_v22 = vpop.f32.mrb[56].mxu0 }
 0x381   : > { %v4504_v59 = vmax.f32 %v4302_v46, %v4412_v53  ;;  %v4413_v57 = vrot.slane %v4304_v0, 1  ;;  %v4557_v3 = vrot.slane %v4304_v0, 2  ;;  %v4844_v39 = vsel %vm1896_vm3, %v4842_v2, %v4843_v34  ;;  %v9145_v60 = vpop.f32.mrb[57].mxu0  ;;  %v3974_v53 = vld [vmem:[#allocation2 + $0xe8] sm:$0xf] }
 0x382   : > { %6263 = vmatmul.mubr.f32.gmra.mrb[26].mxu1 %v4935_v37  ;;  %v4701_v8 = vrot.slane %v4304_v0, 3  ;;  %v4845_v10 = vrot.slane %v4304_v0, 4  ;;  %v4209_v14 = vmax.f32 %v4113_v9, %v9116_v25  ;;  %v4210_v54 = vmax.f32 %v4114_v45, %v9121_v19 }
 0x383   : > { %v4648_v35 = vmax.f32 %v4504_v59, %v4556_v41  ;;  %v4414_v38 = vsel %vm1461_vm0, %v4411_v40, %v4413_v57  ;;  %v4115_v1 = vmax.f32 %v4019_v58, %v4067_v33  ;;  %v4558_v63 = vsel %vm1606_vm1, %v4555_v5, %v4557_v3 }
 0x384   : > { %v4505_v7 = vmax.f32 %v4303_v15, %v4414_v38  ;;  %v4702_v18 = vsel %vm1751_vm2, %v4699_v62, %v4701_v8  ;;  %v4305_v28 = vmax.f32 %v4209_v14, %v9137_v30  ;;  %v4846_v61 = vsel %vm1896_vm3, %v4843_v34, %v4845_v10  ;;  %v4070_v8 = vld [vmem:[#allocation2 + $0x100] sm:$0xf] }
 0x385   : > { %v4792_v17 = vmax.f32 %v4648_v35, %v4700_v42  ;;  %v4306_v46 = vmax.f32 %v4210_v54, %v9143_v13  ;;  %v4211_v49 = vmax.f32 %v4115_v1, %v4163_v36  ;;  %v4020_v34 = vmax.f32 %v9055_v20, %v9090_v50  ;;  %v9167_v36 = vld [vmem:[#allocation2 + $0x120] sm:$0xff]  ;;  %v9169_v35 = vld [vmem:[#allocation2 + $0x128] sm:$0xff] }
 0x386   : > { %v4649_v56 = vmax.f32 %v4505_v7, %v4558_v63  ;;  %v4415_v12 = vrot.slane %v4305_v28, 1  ;;  %v4559_v31 = vrot.slane %v4305_v28, 2  ;;  %v4703_v29 = vrot.slane %v4305_v28, 3  ;;  %v3977_v54 = vld [vmem:[#allocation2 + $0x100] sm:$0xf] }
 0x387   : > { %v4936_v27 = vmax.f32 %v4792_v17, %v4844_v39  ;;  %v4416_v52 = vrot.slane %v4306_v46, 1  ;;  %v4560_v15 = vrot.slane %v4306_v46, 2  ;;  %v4704_v6 = vrot.slane %v4306_v46, 3  ;;  %v3926_v39 = vld [vmem:[#allocation2 + $0xd0] sm:$0xf] }
 0x388   : > { %v4793_v51 = vmax.f32 %v4649_v56, %v4702_v18  ;;  %v4847_v2 = vrot.slane %v4305_v28, 4  ;;  %v4848_v44 = vrot.slane %v4306_v46, 4  ;;  %v4307_v40 = vmax.f32 %v4211_v49, %v4259_v23  ;;  %v3929_v23 = vld [vmem:[#allocation2 + $0xe8] sm:$0xf] }
 0x389   : > { %6265 = vmatprep.mubr.f32.mxu1 %v4936_v27  ;;  %v4417_v5 = vsel %vm1461_vm0, %v4415_v12, %v4416_v52  ;;  %v4561_v62 = vsel %vm1606_vm1, %v4559_v31, %v4560_v15  ;;  %v4705_v24 = vsel %vm1751_vm2, %v4703_v29, %v4704_v6  ;;  %v4021_v37 = vmax.f32 %v9057_v4, %v9092_v32 }
 0x38a   : > { %v4937_v0 = vmax.f32 %v4793_v51, %v4846_v61  ;;  %v4506_v9 = vmax.f32 %v4305_v28, %v4417_v5  ;;  %v4418_v58 = vrot.slane %v4307_v40, 1  ;;  %v4849_v41 = vsel %vm1896_vm3, %v4847_v2, %v4848_v44  ;;  %v4166_v28 = vld [vmem:[#allocation2 + $0x118] sm:$0xf] }
 0x38b   : > { %v4562_v45 = vrot.slane %v4307_v40, 2  ;;  %v4706_v33 = vrot.slane %v4307_v40, 3  ;;  %v4850_v59 = vrot.slane %v4307_v40, 4  ;;  %v4116_v3 = vmax.f32 %v4020_v34, %v9116_v25  ;;  %v4073_v2 = vld [vmem:[#allocation2 + $0x118] sm:$0xf] }
 0x38c   : > { %6266 = vmatmul.mubr.f32.gmra.mrb[28].mxu1 %v4937_v0  ;;  %v4650_v42 = vmax.f32 %v4506_v9, %v4561_v62  ;;  %v4419_v57 = vsel %vm1461_vm0, %v4416_v52, %v4418_v58  ;;  %v4117_v20 = vmax.f32 %v4021_v37, %v9121_v19  ;;  %v4022_v38 = vmax.f32 %v3926_v39, %v3974_v53  ;;  %v9183_v37 = vld [vmem:[#allocation2 + $0x138] sm:$0xff]  ;;  %v9185_v53 = vld [vmem:[#allocation2 + $0x140] sm:$0xff] }
 0x38d   : > { %v4507_v10 = vmax.f32 %v4306_v46, %v4419_v57  ;;  %v4563_v14 = vsel %vm1606_vm1, %v4560_v15, %v4562_v45  ;;  %v4707_v4 = vsel %vm1751_vm2, %v4704_v6, %v4706_v33  ;;  %v4851_v7 = vsel %vm1896_vm3, %v4848_v44, %v4850_v59  ;;  %v4262_v15 = vld [vmem:[#allocation2 + $0x130] sm:$0xf] }
 0x38e   : > { %v4794_v1 = vmax.f32 %v4650_v42, %v4705_v24  ;;  %v4212_v63 = vmax.f32 %v4116_v3, %v9137_v30  ;;  %v4213_v18 = vmax.f32 %v4117_v20, %v9143_v13  ;;  %v4118_v61 = vmax.f32 %v4022_v38, %v4070_v8  ;;  %v4169_v8 = vld [vmem:[#allocation2 + $0x130] sm:$0xf] }
 0x38f   : > { %v4651_v17 = vmax.f32 %v4507_v10, %v4563_v14  ;;  %v4023_v46 = vmax.f32 %v9090_v50, %v9116_v25  ;;  %v4024_v49 = vmax.f32 %v9092_v32, %v9121_v19  ;;  %v4025_v29 = vmax.f32 %v3929_v23, %v3977_v54  ;;  %v4265_v23 = vld [vmem:[#allocation2 + $0x148] sm:$0xf] }
 0x390   : > { %v4938_v56 = vmax.f32 %v4794_v1, %v4849_v41  ;;  %v4308_v12 = vmax.f32 %v4212_v63, %v9167_v36  ;;  %v4309_v31 = vmax.f32 %v4213_v18, %v9169_v35  ;;  %v4214_v52 = vmax.f32 %v4118_v61, %v4166_v28 }
 0x391   : > { %v4795_v27 = vmax.f32 %v4651_v17, %v4707_v4  ;;  %v4119_v6 = vmax.f32 %v4023_v46, %v9137_v30  ;;  %v4120_v51 = vmax.f32 %v4024_v49, %v9143_v13  ;;  %v4121_v41 = vmax.f32 %v4025_v29, %v4073_v2 }
 0x392   : > { %6268 = vmatprep.mubr.f32.mxu1 %v4938_v56  ;;  %v4420_v50 = vrot.slane %v4308_v12, 1  ;;  %v4421_v44 = vrot.slane %v4309_v31, 1  ;;  %v4564_v40 = vrot.slane %v4308_v12, 2  ;;  %v4565_v32 = vrot.slane %v4309_v31, 2 }
 0x393   : > { %v4939_v5 = vmax.f32 %v4795_v27, %v4851_v7  ;;  %v4708_v62 = vrot.slane %v4308_v12, 3  ;;  %v4709_v24 = vrot.slane %v4309_v31, 3  ;;  %v4852_v34 = vrot.slane %v4308_v12, 4 }
 0x394   : > { %v4422_v0 = vsel %vm1461_vm0, %v4420_v50, %v4421_v44  ;;  %v4853_v9 = vrot.slane %v4309_v31, 4  ;;  %v4310_v58 = vmax.f32 %v4214_v52, %v4262_v15  ;;  %v4566_v33 = vsel %vm1606_vm1, %v4564_v40, %v4565_v32 }
 0x395   : > { %6269 = vmatmul.mubr.f32.gmra.mrb[30].mxu1 %v4939_v5  ;;  %v4508_v45 = vmax.f32 %v4308_v12, %v4422_v0  ;;  %v4215_v59 = vmax.f32 %v4119_v6, %v9167_v36  ;;  %v4216_v42 = vmax.f32 %v4120_v51, %v9169_v35  ;;  %v4710_v57 = vsel %vm1751_vm2, %v4708_v62, %v4709_v24 }
 0x396   : > { %v4423_v3 = vrot.slane %v4310_v58, 1  ;;  %v4567_v20 = vrot.slane %v4310_v58, 2  ;;  %v4711_v39 = vrot.slane %v4310_v58, 3  ;;  %v4854_v14 = vsel %vm1896_vm3, %v4852_v34, %v4853_v9 }
 0x397   : > { %v4652_v10 = vmax.f32 %v4508_v45, %v4566_v33  ;;  %v4311_v4 = vmax.f32 %v4215_v59, %v9183_v37  ;;  %v9194_v38 = vmax.f32 %v4216_v42, %v9185_v53  ;;  %v9196_v54 = vpop.f32.mrb[58].mxu0  ;;  %v4855_v18 = vrot.slane %v4310_v58, 4  ;;  %v3980_v59 = vld [vmem:[#allocation2 + $0x118] sm:$0xf] }
 0x398   : > { %v4424_v1 = vsel %vm1461_vm0, %v4421_v44, %v4423_v3  ;;  %v4568_v7 = vsel %vm1606_vm1, %v4565_v32, %v4567_v20  ;;  %v4712_v63 = vsel %vm1751_vm2, %v4709_v24, %v4711_v39  ;;  %v9201_v28 = vpop.f32.mrb[59].mxu0  ;;  %v4217_v49 = vmax.f32 %v4121_v41, %v4169_v8  ;;  %v3983_v39 = vld [vmem:[#allocation2 + $0x130] sm:$0xf] }
 0x399   : > { %v4796_v17 = vmax.f32 %v4652_v10, %v4710_v57  ;;  %v4509_v61 = vmax.f32 %v4309_v31, %v4424_v1  ;;  %v4425_v46 = vrot.slane %v4311_v4, 1  ;;  %v4426_v56 = vrot.slane %v9194_v38, 1  ;;  %v3935_v1 = vld [vmem:[#allocation2 + $0x118] sm:$0xf] }
 0x39a   : > { %v4569_v12 = vrot.slane %v4311_v4, 2  ;;  %v4570_v29 = vrot.slane %v9194_v38, 2  ;;  %v4713_v27 = vrot.slane %v4311_v4, 3  ;;  %v4714_v6 = vrot.slane %v9194_v38, 3 }
 0x39b   : > { %v4940_v52 = vmax.f32 %v4796_v17, %v4854_v14  ;;  %v4653_v15 = vmax.f32 %v4509_v61, %v4568_v7  ;;  %v4857_v51 = vrot.slane %v4311_v4, 4  ;;  %v4856_v2 = vsel %vm1896_vm3, %v4853_v9, %v4855_v18  ;;  %v4076_v17 = vld [vmem:[#allocation2 + $0x130] sm:$0xf] }
 0x39c   : > { %v4427_v50 = vsel %vm1461_vm0, %v4425_v46, %v4426_v56  ;;  %v4858_v31 = vrot.slane %v9194_v38, 4  ;;  %v4313_v44 = vmax.f32 %v4217_v49, %v4265_v23  ;;  %v4571_v5 = vsel %vm1606_vm1, %v4569_v12, %v4570_v29  ;;  %v4079_v46 = vld [vmem:[#allocation2 + $0x148] sm:$0xf] }
 0x39d   : > { %6271 = vmatprep.mubr.f32.mxu1 %v4940_v52  ;;  %v4797_v40 = vmax.f32 %v4653_v15, %v4712_v63  ;;  %v4510_v32 = vmax.f32 %v4311_v4, %v4427_v50  ;;  %v4715_v62 = vsel %vm1751_vm2, %v4713_v27, %v4714_v6  ;;  %v4026_v58 = vmax.f32 %v9116_v25, %v9137_v30  ;;  %v9222_v4 = vld [vmem:[#allocation2 + $0x150] sm:$0xff]  ;;  %v9225_v63 = vld [vmem:[#allocation2 + $0x158] sm:$0xff] }
 0x39e   : > { %v4428_v24 = vrot.slane %v4313_v44, 1  ;;  %v4572_v34 = vrot.slane %v4313_v44, 2  ;;  %v4716_v0 = vrot.slane %v4313_v44, 3  ;;  %v4859_v45 = vsel %vm1896_vm3, %v4857_v51, %v4858_v31  ;;  %v4172_v51 = vld [vmem:[#allocation2 + $0x148] sm:$0xf] }
 0x39f   : > { %v4941_v41 = vmax.f32 %v4797_v40, %v4856_v2  ;;  %v4654_v9 = vmax.f32 %v4510_v32, %v4571_v5  ;;  %v4027_v33 = vmax.f32 %v9121_v19, %v9143_v13  ;;  %v4860_v3 = vrot.slane %v4313_v44, 4  ;;  %v3932_v19 = vld [vmem:[#allocation2 + $0x100] sm:$0xf] }
 0x3a0   : > { %v4429_v42 = vsel %vm1461_vm0, %v4426_v56, %v4428_v24  ;;  %v4573_v57 = vsel %vm1606_vm1, %v4570_v29, %v4572_v34  ;;  %v4122_v20 = vmax.f32 %v4026_v58, %v9167_v36  ;;  %v4717_v10 = vsel %vm1751_vm2, %v4714_v6, %v4716_v0  ;;  %v4175_v5 = vld [vmem:[#allocation2 + $0x160] sm:$0xf]  ;;  %v9242_v58 = vld [vmem:[#allocation2 + $0x168] sm:$0xff] }
 0x3a1   : > { %6272 = vmatmul.mubr.f32.gmra.mrb[0].mxu1 %v4941_v41  ;;  %v4798_v8 = vmax.f32 %v4654_v9, %v4715_v62  ;;  %v4511_v25 = vmax.f32 %v9194_v38, %v4429_v42  ;;  %v4123_v14 = vmax.f32 %v4027_v33, %v9169_v35  ;;  %v4028_v18 = vmax.f32 %v3932_v19, %v3980_v59  ;;  %v4268_v0 = vld [vmem:[#allocation2 + $0x160] sm:$0xf]  ;;  %v9247_v59 = vld [vmem:[#allocation2 + $0x170] sm:$0xff]  ;;  %v4271_v42 = vld [vmem:[#allocation2 + $0x178] sm:$0xf] }
 0x3a2   : > { %v4218_v7 = vmax.f32 %v4122_v20, %v9183_v37  ;;  %v4029_v61 = vmax.f32 %v9137_v30, %v9167_v36  ;;  %v4030_v38 = vmax.f32 %v9143_v13, %v9169_v35  ;;  %v4031_v12 = vmax.f32 %v3935_v1, %v3983_v39 }
 0x3a3   : > { %v4942_v49 = vmax.f32 %v4798_v8, %v4859_v45  ;;  %v4655_v23 = vmax.f32 %v4511_v25, %v4573_v57  ;;  %v4219_v56 = vmax.f32 %v4123_v14, %v9185_v53  ;;  %v4861_v29 = vsel %vm1896_vm3, %v4858_v31, %v4860_v3 }
 0x3a4   : > { %v4314_v27 = vmax.f32 %v4218_v7, %v9222_v4  ;;  %v4125_v52 = vmax.f32 %v4029_v61, %v9183_v37  ;;  %v4126_v15 = vmax.f32 %v4030_v38, %v9185_v53  ;;  %v4124_v13 = vmax.f32 %v4028_v18, %v4076_v17 }
 0x3a5   : > { %6274 = vmatprep.mubr.f32.mxu1 %v4942_v49  ;;  %v4799_v6 = vmax.f32 %v4655_v23, %v4717_v10  ;;  %v9237_v30 = vmax.f32 %v4219_v56, %v9225_v63  ;;  %v4127_v2 = vmax.f32 %v4031_v12, %v4079_v46  ;;  %v4032_v39 = vmax.f32 %v9167_v36, %v9183_v37 }
 0x3a6   : > { %v4430_v50 = vrot.slane %v4314_v27, 1  ;;  %v4574_v44 = vrot.slane %v4314_v27, 2  ;;  %v4718_v40 = vrot.slane %v4314_v27, 3  ;;  %v4862_v32 = vrot.slane %v4314_v27, 4 }
 0x3a7   : > { %v4943_v31 = vmax.f32 %v4799_v6, %v4861_v29  ;;  %v4431_v62 = vrot.slane %v9237_v30, 1  ;;  %v4575_v24 = vrot.slane %v9237_v30, 2  ;;  %v4719_v34 = vrot.slane %v9237_v30, 3 }
 0x3a8   : > { %v4863_v41 = vrot.slane %v9237_v30, 4  ;;  %v4220_v9 = vmax.f32 %v4124_v13, %v4172_v51  ;;  %v4221_v45 = vmax.f32 %v4125_v52, %v9222_v4  ;;  %v4222_v33 = vmax.f32 %v4126_v15, %v9225_v63 }
 0x3a9   : > { %6275 = vmatmul.mubr.f32.gmra.mrb[2].mxu1 %v4943_v31  ;;  %v4432_v57 = vsel %vm1461_vm0, %v4430_v50, %v4431_v62  ;;  %v4576_v3 = vsel %vm1606_vm1, %v4574_v44, %v4575_v24  ;;  %v4223_v20 = vmax.f32 %v4127_v2, %v4175_v5  ;;  %v9253_v8 = vpop.f32.mrb[60].mxu0  ;;  %v4720_v10 = vsel %vm1751_vm2, %v4718_v40, %v4719_v34 }
 0x3aa   : > { %v4512_v25 = vmax.f32 %v4314_v27, %v4432_v57  ;;  %v4316_v14 = vmax.f32 %v4220_v9, %v4268_v0  ;;  %v4317_v19 = vmax.f32 %v4221_v45, %v9242_v58  ;;  %v9257_v1 = vpop.f32.mrb[61].mxu0  ;;  %v4864_v7 = vsel %vm1896_vm3, %v4862_v32, %v4863_v41 }
 0x3ab   : > { %v9261_v18 = vmax.f32 %v4222_v33, %v9247_v59  ;;  %v9263_v17 = vmax.f32 %v4223_v20, %v4271_v42  ;;  %v4033_v36 = vmax.f32 %v9169_v35, %v9185_v53  ;;  %v4128_v29 = vmax.f32 %v4032_v39, %v9222_v4 }
 0x3ac   : > { %v4656_v61 = vmax.f32 %v4512_v25, %v4576_v3  ;;  %v4433_v38 = vrot.slane %v4316_v14, 1  ;;  %v4577_v46 = vrot.slane %v4316_v14, 2  ;;  %v4721_v49 = vrot.slane %v4316_v14, 3  ;;  %v3986_v3 = vld [vmem:[#allocation2 + $0x148] sm:$0xf] }
 0x3ad   : > { %v4435_v23 = vrot.slane %v4317_v19, 1  ;;  %v4436_v56 = vrot.slane %v9261_v18, 1  ;;  %v4579_v12 = vrot.slane %v4317_v19, 2  ;;  %v4865_v6 = vrot.slane %v4316_v14, 4  ;;  %v3989_v14 = vld [vmem:[#allocation2 + $0x160] sm:$0xf] }
 0x3ae   : > { %v4800_v27 = vmax.f32 %v4656_v61, %v4720_v10  ;;  %v4434_v52 = vsel %vm1461_vm0, %v4431_v62, %v4433_v38  ;;  %v4578_v15 = vsel %vm1606_vm1, %v4575_v24, %v4577_v46  ;;  %v4722_v35 = vsel %vm1751_vm2, %v4719_v34, %v4721_v49  ;;  %v3938_v10 = vld [vmem:[#allocation2 + $0x130] sm:$0xf]  ;;  %v9290_v46 = vld [vmem:[#allocation2 + $0x180] sm:$0xff]  ;;  %v9292_v49 = vld [vmem:[#allocation2 + $0x188] sm:$0xff] }
 0x3af   : > { %v4513_v13 = vmax.f32 %v9237_v30, %v4434_v52  ;;  %v4437_v51 = vsel %vm1461_vm0, %v4435_v23, %v4436_v56  ;;  %v4580_v2 = vrot.slane %v9261_v18, 2  ;;  %v4723_v40 = vrot.slane %v4317_v19, 3  ;;  %v4082_v23 = vld [vmem:[#allocation2 + $0x160] sm:$0xf]  ;;  %v4085_v52 = vld [vmem:[#allocation2 + $0x178] sm:$0xf] }
 0x3b0   : > { %v4944_v50 = vmax.f32 %v4800_v27, %v4864_v7  ;;  %v4514_v44 = vmax.f32 %v4317_v19, %v4437_v51  ;;  %v4724_v32 = vrot.slane %v9261_v18, 3  ;;  %v4867_v62 = vrot.slane %v4317_v19, 4  ;;  %v3941_v27 = vld [vmem:[#allocation2 + $0x148] sm:$0xf] }
 0x3b1   : > { %v4657_v5 = vmax.f32 %v4513_v13, %v4578_v15  ;;  %v4581_v31 = vsel %vm1606_vm1, %v4579_v12, %v4580_v2  ;;  %v4868_v24 = vrot.slane %v9261_v18, 4  ;;  %v4866_v30 = vsel %vm1896_vm3, %v4863_v41, %v4865_v6 }
 0x3b2   : > { %6277 = vmatprep.mubr.f32.mxu1 %v4944_v50  ;;  %v4658_v0 = vmax.f32 %v4514_v44, %v4581_v31  ;;  %v4438_v34 = vrot.slane %v9263_v17, 1  ;;  %v4582_v9 = vrot.slane %v9263_v17, 2  ;;  %v4725_v33 = vsel %vm1751_vm2, %v4723_v40, %v4724_v32  ;;  %v4178_v44 = vld [vmem:[#allocation2 + $0x178] sm:$0xf] }
 0x3b3   : > { %v4801_v45 = vmax.f32 %v4657_v5, %v4722_v35  ;;  %v4869_v42 = vsel %vm1896_vm3, %v4867_v62, %v4868_v24  ;;  %v4726_v57 = vrot.slane %v9263_v17, 3  ;;  %v4870_v25 = vrot.slane %v9263_v17, 4 }
 0x3b4   : > { %v4802_v20 = vmax.f32 %v4658_v0, %v4725_v33  ;;  %v4439_v39 = vsel %vm1461_vm0, %v4436_v56, %v4438_v34  ;;  %v4129_v41 = vmax.f32 %v4033_v36, %v9225_v63  ;;  %v4583_v61 = vsel %vm1606_vm1, %v4580_v2, %v4582_v9 }
 0x3b5   : > { %v4945_v19 = vmax.f32 %v4801_v45, %v4866_v30  ;;  %v4515_v7 = vmax.f32 %v9261_v18, %v4439_v39  ;;  %v4727_v38 = vsel %vm1751_vm2, %v4724_v32, %v4726_v57  ;;  %v4224_v56 = vmax.f32 %v4128_v29, %v9242_v58  ;;  %v4181_v45 = vld [vmem:[#allocation2 + $0x190] sm:$0xf] }
 0x3b6   : > { %v4946_v12 = vmax.f32 %v4802_v20, %v4869_v42  ;;  %v4225_v17 = vmax.f32 %v4129_v41, %v9247_v59  ;;  %v4034_v36 = vmax.f32 %v3938_v10, %v3986_v3  ;;  %v4035_v18 = vmax.f32 %v9183_v37, %v9222_v4  ;;  %v9312_v3 = vld [vmem:[#allocation2 + $0x198] sm:$0xff]  ;;  %v9314_v20 = vld [vmem:[#allocation2 + $0x1a0] sm:$0xff] }
 0x3b7   : > { %6278 = vmatmul.mubr.f32.gmra.mrb[4].mxu1 %v4945_v19  ;;  %v4659_v15 = vmax.f32 %v4515_v7, %v4583_v61  ;;  %v4036_v6 = vmax.f32 %v9185_v53, %v9225_v63  ;;  %v4037_v13 = vmax.f32 %v3941_v27, %v3989_v14  ;;  %v4871_v35 = vsel %vm1896_vm3, %v4868_v24, %v4870_v25  ;;  %v4274_v24 = vld [vmem:[#allocation2 + $0x190] sm:$0xf] }
 0x3b8   : > { %6280 = vmatprep.mubr.f32.mxu1 %v4946_v12  ;;  %v4320_v51 = vmax.f32 %v4224_v56, %v9290_v46  ;;  %v9303_v29 = vmax.f32 %v4225_v17, %v9292_v49  ;;  %v4130_v2 = vmax.f32 %v4034_v36, %v4082_v23  ;;  %v4131_v40 = vmax.f32 %v4035_v18, %v9242_v58 }
 0x3b9   : > { %v4803_v50 = vmax.f32 %v4659_v15, %v4727_v38  ;;  %v4132_v32 = vmax.f32 %v4036_v6, %v9247_v59  ;;  %v4133_v37 = vmax.f32 %v4037_v13, %v4085_v52  ;;  %v4038_v39 = vmax.f32 %v9222_v4, %v9242_v58 }
 0x3ba   : > { %v4440_v5 = vrot.slane %v4320_v51, 1  ;;  %v4441_v53 = vrot.slane %v9303_v29, 1  ;;  %v4584_v31 = vrot.slane %v4320_v51, 2  ;;  %v4585_v62 = vrot.slane %v9303_v29, 2 }
 0x3bb   : > { %v4947_v30 = vmax.f32 %v4803_v50, %v4871_v35  ;;  %v4728_v0 = vrot.slane %v4320_v51, 3  ;;  %v4729_v34 = vrot.slane %v9303_v29, 3  ;;  %v4872_v9 = vrot.slane %v4320_v51, 4 }
 0x3bc   : > { %v4442_v33 = vsel %vm1461_vm0, %v4440_v5, %v4441_v53  ;;  %v4873_v42 = vrot.slane %v9303_v29, 4  ;;  %v4226_v57 = vmax.f32 %v4130_v2, %v4178_v44  ;;  %v4586_v41 = vsel %vm1606_vm1, %v4584_v31, %v4585_v62 }
 0x3bd   : > { %6281 = vmatmul.mubr.f32.gmra.mrb[6].mxu1 %v4947_v30  ;;  %v4516_v25 = vmax.f32 %v4320_v51, %v4442_v33  ;;  %v4227_v10 = vmax.f32 %v4131_v40, %v9290_v46  ;;  %v4228_v14 = vmax.f32 %v4132_v32, %v9292_v49  ;;  %v4730_v19 = vsel %vm1751_vm2, %v4728_v0, %v4729_v34 }
 0x3be   : > { %v4874_v7 = vsel %vm1896_vm3, %v4872_v9, %v4873_v42  ;;  %v4322_v61 = vmax.f32 %v4226_v57, %v4274_v24  ;;  %v4229_v38 = vmax.f32 %v4133_v37, %v4181_v45  ;;  %v4039_v17 = vmax.f32 %v9225_v63, %v9247_v59  ;;  %v4277_v63 = vld [vmem:[#allocation2 + $0x1a8] sm:$0xf] }
 0x3bf   : > { %v9323_v23 = vpop.f32.mrb[62].mxu0  ;;  %v4660_v12 = vmax.f32 %v4516_v25, %v4586_v41  ;;  %v4323_v56 = vmax.f32 %v4227_v10, %v9312_v3  ;;  %v9327_v4 = vmax.f32 %v4228_v14, %v9314_v20  ;;  %v4134_v18 = vmax.f32 %v4038_v39, %v9290_v46 }
 0x3c0   : > { %v9331_v36 = vpop.f32.mrb[63].mxu0  ;;  %v4443_v27 = vrot.slane %v4322_v61, 1  ;;  %v4587_v52 = vrot.slane %v4322_v61, 2  ;;  %v4731_v15 = vrot.slane %v4322_v61, 3  ;;  %v4875_v40 = vrot.slane %v4322_v61, 4 }
 0x3c1   : > { %v4804_v6 = vmax.f32 %v4660_v12, %v4730_v19  ;;  %v4445_v13 = vrot.slane %v4323_v56, 1  ;;  %v4446_v35 = vrot.slane %v9327_v4, 1  ;;  %v4589_v51 = vrot.slane %v4323_v56, 2 }
 0x3c2   : > { %v4444_v2 = vsel %vm1461_vm0, %v4441_v53, %v4443_v27  ;;  %v4588_v50 = vsel %vm1606_vm1, %v4585_v62, %v4587_v52  ;;  %v4732_v44 = vsel %vm1751_vm2, %v4729_v34, %v4731_v15  ;;  %v4590_v24 = vrot.slane %v9327_v4, 2 }
 0x3c3   : > { %v9338_v32 = vpop.f32.mrb[32].mxu0  ;;  %v4948_v37 = vmax.f32 %v4804_v6, %v4874_v7  ;;  %v4517_v5 = vmax.f32 %v9303_v29, %v4444_v2  ;;  %v4447_v31 = vsel %vm1461_vm0, %v4445_v13, %v4446_v35  ;;  %v4733_v9 = vrot.slane %v4323_v56, 3  ;;  %v3992_v13 = vld [vmem:[#allocation2 + $0x178] sm:$0xf] }
 0x3c4   : > { %v9343_v30 = vpop.f32.mrb[33].mxu0  ;;  %v4518_v0 = vmax.f32 %v4323_v56, %v4447_v31  ;;  %v4734_v53 = vrot.slane %v9327_v4, 3  ;;  %v4877_v62 = vrot.slane %v4323_v56, 4  ;;  %v4591_v45 = vsel %vm1606_vm1, %v4589_v51, %v4590_v24 }
 0x3c5   : > { %6283 = vmatprep.mubr.f32.mxu1 %v4948_v37  ;;  %v4661_v34 = vmax.f32 %v4517_v5, %v4588_v50  ;;  %v4878_v33 = vrot.slane %v9327_v4, 4  ;;  %v4325_v57 = vmax.f32 %v4229_v38, %v4277_v63  ;;  %v4876_v29 = vsel %vm1896_vm3, %v4873_v42, %v4875_v40  ;;  %v3944_v37 = vld [vmem:[#allocation2 + $0x160] sm:$0xf]  ;;  %v4088_v5 = vld [vmem:[#allocation2 + $0x190] sm:$0xf] }
 0x3c6   : > { %v4662_v39 = vmax.f32 %v4518_v0, %v4591_v45  ;;  %v4135_v25 = vmax.f32 %v4039_v17, %v9292_v49  ;;  %v4230_v41 = vmax.f32 %v4134_v18, %v9312_v3  ;;  %v4735_v19 = vsel %vm1751_vm2, %v4733_v9, %v4734_v53  ;;  %v6929_v18 = vld [vmem:[#allocation2] sm:$0xff] }
 0x3c7   : > { %v9351_v10 = vpop.f32.mrb[34].mxu0  ;;  %v4805_v14 = vmax.f32 %v4661_v34, %v4732_v44  ;;  %v4448_v7 = vrot.slane %v4325_v57, 1  ;;  %v4592_v61 = vrot.slane %v4325_v57, 2  ;;  %v4879_v27 = vsel %vm1896_vm3, %v4877_v62, %v4878_v33 }
 0x3c8   : > { %v9354_v12 = vpop.f32.mrb[35].mxu0  ;;  %v4806_v56 = vmax.f32 %v4662_v39, %v4735_v19  ;;  %v4736_v38 = vrot.slane %v4325_v57, 3  ;;  %v4231_v42 = vmax.f32 %v4135_v25, %v9314_v20  ;;  %v4880_v15 = vrot.slane %v4325_v57, 4  ;;  %v4184_v57 = vld [vmem:[#allocation2 + $0x1a8] sm:$0xf] }
 0x3c9   : > { %v4949_v52 = vmax.f32 %v4805_v14, %v4876_v29  ;;  %v4449_v17 = vsel %vm1461_vm0, %v4446_v35, %v4448_v7  ;;  %v4326_v6 = vmax.f32 %v4230_v41, %v6929_v18  ;;  %v4593_v44 = vsel %vm1606_vm1, %v4590_v24, %v4592_v61  ;;  %v4280_v7 = vld [vmem:[#allocation2 + $0x1c0] sm:$0xf] }
 0x3ca   : > { %v4950_v51 = vmax.f32 %v4806_v56, %v4879_v27  ;;  %v4519_v2 = vmax.f32 %v9327_v4, %v4449_v17  ;;  %v9363_v40 = vmax.f32 %v4231_v42, %v6929_v18  ;;  %v4737_v0 = vsel %vm1751_vm2, %v4734_v53, %v4736_v38  ;;  %v3995_v53 = vld [vmem:[#allocation2 + $0x190] sm:$0xf] }
 0x3cb   : > { %v9360_v50 = vpop.f32.mrb[36].mxu0  ;;  %6284 = vmatmul.mubr.f32.gmra.mrb[8].mxu1 %v4949_v52  ;;  %v4450_v63 = vrot.slane %v4326_v6, 1  ;;  %v4040_v9 = vmax.f32 %v3944_v37, %v3992_v13  ;;  %v4041_v4 = vmax.f32 %v9242_v58, %v9290_v46  ;;  %v4881_v62 = vsel %vm1896_vm3, %v4878_v33, %v4880_v15 }
 0x3cc   : > { %v9365_v31 = vpop.f32.mrb[37].mxu0  ;;  %6286 = vmatprep.mubr.f32.mxu1 %v4950_v51  ;;  %v4663_v35 = vmax.f32 %v4519_v2, %v4593_v44  ;;  %v4451_v34 = vrot.slane %v9363_v40, 1  ;;  %v4594_v24 = vrot.slane %v4326_v6, 2  ;;  %v4595_v45 = vrot.slane %v9363_v40, 2  ;;  %v4091_v2 = vld [vmem:[#allocation2 + $0x1a8] sm:$0xf] }
 0x3cd   : > { %v4136_v39 = vmax.f32 %v4040_v9, %v4088_v5  ;;  %v4042_v25 = vmax.f32 %v9247_v59, %v9292_v49  ;;  %v4137_v41 = vmax.f32 %v4041_v4, %v9312_v3  ;;  %v4738_v46 = vrot.slane %v4326_v6, 3  ;;  %v3947_v59 = vld [vmem:[#allocation2 + $0x178] sm:$0xf] }
 0x3ce   : > { %v4807_v29 = vmax.f32 %v4663_v35, %v4737_v0  ;;  %v4452_v58 = vsel %vm1461_vm0, %v4450_v63, %v4451_v34  ;;  %v4739_v33 = vrot.slane %v9363_v40, 3  ;;  %v4882_v19 = vrot.slane %v4326_v6, 4 }
 0x3cf   : > { %v9376_v14 = vpop.f32.mrb[38].mxu0  ;;  %v4520_v27 = vmax.f32 %v4326_v6, %v4452_v58  ;;  %v4232_v38 = vmax.f32 %v4136_v39, %v4184_v57  ;;  %v4138_v42 = vmax.f32 %v4042_v25, %v9314_v20  ;;  %v4596_v49 = vsel %vm1606_vm1, %v4594_v24, %v4595_v45  ;;  %v4187_v39 = vld [vmem:[#allocation2 + $0x1c0] sm:$0xf] }
 0x3d0   : > { %v9380_v61 = vpop.f32.mrb[39].mxu0  ;;  %v4951_v56 = vmax.f32 %v4807_v29, %v4881_v62  ;;  %v4883_v3 = vrot.slane %v9363_v40, 4  ;;  %v4233_v52 = vmax.f32 %v4137_v41, %v6929_v18  ;;  %v4043_v17 = vmax.f32 %v3947_v59, %v3995_v53 }
 0x3d1   : > { %v4664_v15 = vmax.f32 %v4520_v27, %v4596_v49  ;;  %v4328_v13 = vmax.f32 %v4232_v38, %v4280_v7  ;;  %v4234_v51 = vmax.f32 %v4138_v42, %v6929_v18  ;;  %v4740_v44 = vsel %vm1751_vm2, %v4738_v46, %v4739_v33  ;;  %v4283_v27 = vld [vmem:[#allocation2 + $0x1d8] sm:$0xf] }
 0x3d2   : > { %6287 = vmatmul.mubr.f32.gmra.mrb[10].mxu1 %v4951_v56  ;;  %v4329_v63 = vmax.f32 %v4233_v52, %v6929_v18  ;;  %v4884_v0 = vsel %vm1896_vm3, %v4882_v19, %v4883_v3  ;;  %v4139_v62 = vmax.f32 %v4043_v17, %v4091_v2 }
 0x3d3   : > { %v9386_v37 = vpop.f32.mrb[40].mxu0  ;;  %v4808_v6 = vmax.f32 %v4664_v15, %v4740_v44  ;;  %v4453_v5 = vrot.slane %v4328_v13, 1  ;;  %v4597_v20 = vrot.slane %v4328_v13, 2  ;;  %v4330_v9 = vmax.f32 %v4234_v51, %v6929_v18 }
 0x3d4   : > { %v9388_v35 = vpop.f32.mrb[41].mxu0  ;;  %v4455_v4 = vrot.slane %v4329_v63, 1  ;;  %v4741_v29 = vrot.slane %v4328_v13, 3  ;;  %v4599_v53 = vrot.slane %v4329_v63, 2  ;;  %v4885_v7 = vrot.slane %v4328_v13, 4 }
 0x3d5   : > { %v4952_v24 = vmax.f32 %v4808_v6, %v4884_v0  ;;  %v4454_v57 = vsel %vm1461_vm0, %v4451_v34, %v4453_v5  ;;  %v4456_v41 = vrot.slane %v4330_v9, 1  ;;  %v4600_v58 = vrot.slane %v4330_v9, 2 }
 0x3d6   : > { %v4521_v25 = vmax.f32 %v9363_v40, %v4454_v57  ;;  %v4598_v46 = vsel %vm1606_vm1, %v4595_v45, %v4597_v20  ;;  %v4743_v56 = vrot.slane %v4329_v63, 3  ;;  %v4744_v42 = vrot.slane %v4330_v9, 3 }
 0x3d7   : > { %6289 = vmatprep.mubr.f32.mxu1 %v4952_v24  ;;  %v9394_v19 = vpop.f32.mrb[42].mxu0  ;;  %v4457_v38 = vsel %vm1461_vm0, %v4455_v4, %v4456_v41  ;;  %v4235_v34 = vmax.f32 %v4139_v62, %v4187_v39  ;;  %v4742_v40 = vsel %vm1751_vm2, %v4739_v33, %v4741_v29  ;;  %v4887_v52 = vrot.slane %v4329_v63, 4 }
 0x3d8   : > { %v4665_v18 = vmax.f32 %v4521_v25, %v4598_v46  ;;  %v9397_v59 = vpop.f32.mrb[43].mxu0  ;;  %v4522_v49 = vmax.f32 %v4329_v63, %v4457_v38  ;;  %v4601_v15 = vsel %vm1606_vm1, %v4599_v53, %v4600_v58  ;;  %v4888_v45 = vrot.slane %v4330_v9, 4 }
 0x3d9   : > { %v4331_v13 = vmax.f32 %v4235_v34, %v4283_v27  ;;  %v4886_v51 = vsel %vm1896_vm3, %v4883_v3, %v4885_v7  ;;  %v4745_v5 = vsel %vm1751_vm2, %v4743_v56, %v4744_v42 }
 0x3da   : > { %v4809_v17 = vmax.f32 %v4665_v18, %v4742_v40  ;;  %v4666_v2 = vmax.f32 %v4522_v49, %v4601_v15  ;;  %v4889_v63 = vsel %vm1896_vm3, %v4887_v52, %v4888_v45 }
 0x3db   : > { %v9402_v44 = vpop.f32.mrb[44].mxu0  ;;  %v4458_v20 = vrot.slane %v4331_v13, 1  ;;  %v4602_v0 = vrot.slane %v4331_v13, 2  ;;  %v4746_v24 = vrot.slane %v4331_v13, 3  ;;  %v4890_v25 = vrot.slane %v4331_v13, 4 }
 0x3dc   : > { %v4953_v6 = vmax.f32 %v4809_v17, %v4886_v51  ;;  %v9405_v4 = vpop.f32.mrb[45].mxu0  ;;  %v4810_v33 = vmax.f32 %v4666_v2, %v4745_v5 }
 0x3dd   : > { %v4459_v62 = vsel %vm1461_vm0, %v4456_v41, %v4458_v20  ;;  %v4603_v39 = vsel %vm1606_vm1, %v4600_v58, %v4602_v0  ;;  %v4747_v7 = vsel %vm1751_vm2, %v4744_v42, %v4746_v24  ;;  %v4891_v27 = vsel %vm1896_vm3, %v4888_v45, %v4890_v25 }
 0x3de   : > { %6290 = vmatmul.mubr.f32.gmra.mrb[12].mxu1 %v4953_v6  ;;  %v4954_v57 = vmax.f32 %v4810_v33, %v4889_v63  ;;  %v4523_v29 = vmax.f32 %v4330_v9, %v4459_v62  ;;  %v9419_v9 = vld [vmem:[%s9679_s7] ss:$0 sm:$0xff] }
 0x3e0   : > { %6292 = vmatprep.mubr.f32.mxu1 %v4954_v57  ;;  %v4667_v46 = vmax.f32 %v4523_v29, %v4603_v39 }
 0x3e1   : > { %v9409_v3 = vpop.f32.mrb[46].mxu0 }
 0x3e2   : > { %v9412_v53 = vpop.f32.mrb[47].mxu0  ;;  %v4811_v56 = vmax.f32 %v4667_v46, %v4747_v7 }
 0x3e4   : > { %v4955_v18 = vmax.f32 %v4811_v56, %v4891_v27 }
 0x3e6   : > { %6293 = vmatmul.mubr.f32.gmra.mrb[14].mxu1 %v4955_v18 }
 0x424   : > { %v6249_v41 = vpop.f32.mrb[16].mxu1 }
 0x425   : > { %v6471_v58 = vadd.f32 %v6249_v41, %v9338_v32  ;;  %v5038_v38 = vpop.f32.mrb[17].mxu1 }
 0x426   : > { %v6472_v34 = vadd.f32 %v5038_v38, %v9343_v30 }
 0x427   : > { %v5237_v40 = vadd.f32 %v6471_v58, %v9419_v9 }
 0x428   : > { %v5236_v42 = vadd.f32 %v6472_v34, %v9419_v9 }
 0x429   : > { %v5269_v49 = vsub.f32 0.0, %v5237_v40 }
 0x42a   : > { %v5268_v52 = vsub.f32 0.0, %v5236_v42 }
 0x42b   : > { %v5302_v17 = vmul.f32 1.442695, %v5269_v49 }
 0x42c   : > { %v5300_v15 = vmul.f32 1.442695, %v5268_v52 }
 0x42d   : > { %6797 = vpow2.f32 %v5302_v17 }
 0x42e   : > { %6799 = vpow2.f32 %v5300_v15 }
 0x430   : > { %v6252_v45 = vpop.f32.mrb[18].mxu1 }
 0x431   : > { %v6473_v13 = vadd.f32 %v6252_v45, %v9351_v10  ;;  %v5048_v51 = vpop.f32.mrb[19].mxu1 }
 0x432   : > { %v6474_v2 = vadd.f32 %v5048_v51, %v9354_v12 }
 0x433   : > { %v9428_v32 = vadd.f32 %v6473_v13, %v9419_v9 }
 0x434   : > { %v9431_v30 = vadd.f32 %v6474_v2, %v9419_v9 }
 0x435   : > { %v5271_v6 = vsub.f32 0.0, %v9428_v32 }
 0x436   : > { %v5270_v20 = vsub.f32 0.0, %v9431_v30 }
 0x437   : > { %v6798_v5 = vpop.eup %6797  ;;  %v5306_v63 = vmul.f32 1.442695, %v5271_v6 }
 0x438   : > { %v6800_v0 = vpop.eup %6799  ;;  %v5365_v33 = vadd.f32 1.0, %v6798_v5  ;;  %v5304_v24 = vmul.f32 1.442695, %v5270_v20  ;;  %v6255_v10 = vpop.f32.mrb[20].mxu1 }
 0x439   : > { %v5364_v62 = vadd.f32 1.0, %v6800_v0  ;;  %v6475_v12 = vadd.f32 %v6255_v10, %v9360_v50  ;;  %v5058_v57 = vpop.f32.mrb[21].mxu1 }
 0x43a   : > { %6801 = vrcp.f32 %v5365_v33  ;;  %v6476_v29 = vadd.f32 %v5058_v57, %v9365_v31 }
 0x43b   : > { %6803 = vrcp.f32 %v5364_v62  ;;  %v9438_v39 = vadd.f32 %v6475_v12, %v9419_v9 }
 0x43c   : > { %6805 = vpow2.f32 %v5306_v63  ;;  %v9441_v25 = vadd.f32 %v6476_v29, %v9419_v9 }
 0x43d   : > { %6807 = vpow2.f32 %v5304_v24  ;;  %v5273_v46 = vsub.f32 0.0, %v9438_v39 }
 0x43e   : > { %v5272_v7 = vsub.f32 0.0, %v9441_v25 }
 0x43f   : > { %v5310_v56 = vmul.f32 1.442695, %v5273_v46 }
 0x440   : > { %v5308_v27 = vmul.f32 1.442695, %v5272_v7 }
 0x441   : > { %6809 = vpow2.f32 %v5310_v56 }
 0x442   : > { %6811 = vpow2.f32 %v5308_v27  ;;  %v6258_v50 = vpop.f32.mrb[22].mxu1 }
 0x443   : > { %v6477_v31 = vadd.f32 %v6258_v50, %v9376_v14  ;;  %v5068_v41 = vpop.f32.mrb[23].mxu1 }
 0x444   : > { %v6802_v18 = vpop.eup %6801  ;;  %v6478_v34 = vadd.f32 %v5068_v41, %v9380_v61 }
 0x445   : > { %v6804_v58 = vpop.eup %6803  ;;  %v5429_v38 = vmul.f32 %v6802_v18, %v5237_v40  ;;  %v9448_v17 = vadd.f32 %v6477_v31, %v9419_v9 }
 0x446   : > { %v6806_v49 = vpop.eup %6805  ;;  %v5428_v52 = vmul.f32 %v6804_v58, %v5236_v42  ;;  %v9456_v14 = vadd.f32 %v6478_v34, %v9419_v9 }
 0x447   : > { %v6808_v15 = vpop.eup %6807  ;;  %5461 = vst [vmem:[%s9452_s1 + $0x8] sm:$0xff] %v5429_v38  ;;  %v5367_v45 = vadd.f32 1.0, %v6806_v49  ;;  %v5275_v61 = vsub.f32 0.0, %v9448_v17 }
 0x448   : > { %5460 = vst [vmem:[%s9452_s1] sm:$0xff] %v5428_v52  ;;  %v5366_v40 = vadd.f32 1.0, %v6808_v15  ;;  %v5274_v42 = vsub.f32 0.0, %v9456_v14 }
 0x449   : > { %6813 = vrcp.f32 %v5367_v45  ;;  %v5314_v13 = vmul.f32 1.442695, %v5275_v61 }
 0x44a   : > { %6815 = vrcp.f32 %v5366_v40  ;;  %v5312_v51 = vmul.f32 1.442695, %v5274_v42 }
 0x44b   : > { %v6810_v2 = vpop.eup %6809  ;;  %6817 = vpow2.f32 %v5314_v13  ;;  %v6261_v6 = vpop.f32.mrb[24].mxu1 }
 0x44c   : > { %v6812_v5 = vpop.eup %6811  ;;  %v5369_v20 = vadd.f32 1.0, %v6810_v2  ;;  %6819 = vpow2.f32 %v5312_v51  ;;  %v6479_v0 = vadd.f32 %v6261_v6, %v9386_v37  ;;  %v5078_v33 = vpop.f32.mrb[25].mxu1 }
 0x44d   : > { %v5368_v63 = vadd.f32 1.0, %v6812_v5  ;;  %v6480_v62 = vadd.f32 %v5078_v33, %v9388_v35 }
 0x44e   : > { %6821 = vrcp.f32 %v5369_v20  ;;  %v9464_v24 = vadd.f32 %v6479_v0, %v9419_v9 }
 0x44f   : > { %6823 = vrcp.f32 %v5368_v63  ;;  %v9467_v10 = vadd.f32 %v6480_v62, %v9419_v9 }
 0x450   : > { %v5277_v12 = vsub.f32 0.0, %v9464_v24 }
 0x451   : > { %v5276_v57 = vsub.f32 0.0, %v9467_v10 }
 0x452   : > { %v5318_v37 = vmul.f32 1.442695, %v5277_v12 }
 0x453   : > { %v6814_v29 = vpop.eup %6813  ;;  %v5316_v56 = vmul.f32 1.442695, %v5276_v57 }
 0x454   : > { %v6816_v46 = vpop.eup %6815  ;;  %v5431_v7 = vmul.f32 %v6814_v29, %v9428_v32  ;;  %6825 = vpow2.f32 %v5318_v37 }
 0x455   : > { %v5430_v35 = vmul.f32 %v6816_v46, %v9431_v30  ;;  %v6818_v27 = vpop.eup %6817  ;;  %6827 = vpow2.f32 %v5316_v56  ;;  %v6264_v50 = vpop.f32.mrb[26].mxu1 }
 0x456   : > { %5463 = vst [vmem:[%s9452_s1 + $0x18] sm:$0xff] %v5431_v7  ;;  %v6820_v18 = vpop.eup %6819  ;;  %v5371_v31 = vadd.f32 1.0, %v6818_v27  ;;  %v6481_v41 = vadd.f32 %v6264_v50, %v9394_v19  ;;  %v5088_v58 = vpop.f32.mrb[27].mxu1 }
 0x457   : > { %5462 = vst [vmem:[%s9452_s1 + $0x10] sm:$0xff] %v5430_v35  ;;  %v5370_v38 = vadd.f32 1.0, %v6820_v18  ;;  %v6482_v34 = vadd.f32 %v5088_v58, %v9397_v59 }
 0x458   : > { %v6822_v32 = vpop.eup %6821  ;;  %6829 = vrcp.f32 %v5371_v31  ;;  %v9478_v30 = vadd.f32 %v6481_v41, %v9419_v9 }
 0x459   : > { %v6824_v49 = vpop.eup %6823  ;;  %v5433_v52 = vmul.f32 %v6822_v32, %v9438_v39  ;;  %6831 = vrcp.f32 %v5370_v38  ;;  %v9482_v15 = vadd.f32 %v6482_v34, %v9419_v9 }
 0x45a   : > { %v5432_v45 = vmul.f32 %v6824_v49, %v9441_v25  ;;  %v5279_v19 = vsub.f32 0.0, %v9478_v30 }
 0x45b   : > { %5465 = vst [vmem:[%s9452_s1 + $0x28] sm:$0xff] %v5433_v52  ;;  %v5278_v40 = vsub.f32 0.0, %v9482_v15 }
 0x45c   : > { %5464 = vst [vmem:[%s9452_s1 + $0x20] sm:$0xff] %v5432_v45  ;;  %v5322_v59 = vmul.f32 1.442695, %v5279_v19 }
 0x45d   : > { %v5320_v61 = vmul.f32 1.442695, %v5278_v40 }
 0x45e   : > { %v6826_v42 = vpop.eup %6825  ;;  %6833 = vpow2.f32 %v5322_v59 }
 0x45f   : > { %v6828_v13 = vpop.eup %6827  ;;  %v5373_v51 = vadd.f32 1.0, %v6826_v42  ;;  %6835 = vpow2.f32 %v5320_v61  ;;  %v6267_v39 = vpop.f32.mrb[28].mxu1 }
 0x460   : > { %v5372_v2 = vadd.f32 1.0, %v6828_v13  ;;  %v6483_v6 = vadd.f32 %v6267_v39, %v9402_v44  ;;  %v5098_v25 = vpop.f32.mrb[29].mxu1 }
 0x461   : > { %6837 = vrcp.f32 %v5373_v51  ;;  %v6484_v5 = vadd.f32 %v5098_v25, %v9405_v4 }
 0x462   : > { %v6830_v20 = vpop.eup %6829  ;;  %6839 = vrcp.f32 %v5372_v2  ;;  %v9492_v0 = vadd.f32 %v6483_v6, %v9419_v9 }
 0x463   : > { %v6832_v33 = vpop.eup %6831  ;;  %v5435_v63 = vmul.f32 %v6830_v20, %v9448_v17  ;;  %v9496_v62 = vadd.f32 %v6484_v5, %v9419_v9 }
 0x464   : > { %v5434_v12 = vmul.f32 %v6832_v33, %v9456_v14  ;;  %v5281_v57 = vsub.f32 0.0, %v9492_v0 }
 0x465   : > { %5467 = vst [vmem:[%s9452_s1 + $0x38] sm:$0xff] %v5435_v63  ;;  %v5280_v44 = vsub.f32 0.0, %v9496_v62 }
 0x466   : > { %5466 = vst [vmem:[%s9452_s1 + $0x30] sm:$0xff] %v5434_v12  ;;  %v5326_v4 = vmul.f32 1.442695, %v5281_v57 }
 0x467   : > { %v5324_v29 = vmul.f32 1.442695, %v5280_v44 }
 0x468   : > { %v6834_v37 = vpop.eup %6833  ;;  %6841 = vpow2.f32 %v5326_v4  ;;  %v6270_v46 = vpop.f32.mrb[30].mxu1 }
 0x469   : > { %v6836_v7 = vpop.eup %6835  ;;  %v5375_v56 = vadd.f32 1.0, %v6834_v37  ;;  %6843 = vpow2.f32 %v5324_v29  ;;  %v6485_v17 = vadd.f32 %v6270_v46, %v9409_v3  ;;  %v5108_v35 = vpop.f32.mrb[31].mxu1 }
 0x46a   : > { %v5374_v14 = vadd.f32 1.0, %v6836_v7  ;;  %v6486_v27 = vadd.f32 %v5108_v35, %v9412_v53 }
 0x46b   : > { %v6838_v50 = vpop.eup %6837  ;;  %6845 = vrcp.f32 %v5375_v56  ;;  %v9506_v18 = vadd.f32 %v6485_v17, %v9419_v9 }
 0x46c   : > { %v6840_v31 = vpop.eup %6839  ;;  %v5437_v41 = vmul.f32 %v6838_v50, %v9464_v24  ;;  %6847 = vrcp.f32 %v5374_v14  ;;  %v9510_v58 = vadd.f32 %v6486_v27, %v9419_v9 }
 0x46d   : > { %v5436_v38 = vmul.f32 %v6840_v31, %v9467_v10  ;;  %v5283_v3 = vsub.f32 0.0, %v9506_v18 }
 0x46e   : > { %5469 = vst [vmem:[%s9452_s1 + $0x48] sm:$0xff] %v5437_v41  ;;  %v5282_v34 = vsub.f32 0.0, %v9510_v58 }
 0x46f   : > { %5468 = vst [vmem:[%s9452_s1 + $0x40] sm:$0xff] %v5436_v38  ;;  %v5330_v53 = vmul.f32 1.442695, %v5283_v3 }
 0x470   : > { %v5328_v32 = vmul.f32 1.442695, %v5282_v34 }
 0x471   : > { %6849 = vpow2.f32 %v5330_v53 }
 0x472   : > { %v6842_v49 = vpop.eup %6841  ;;  %6851 = vpow2.f32 %v5328_v32 }
 0x473   : > { %v6844_v52 = vpop.eup %6843  ;;  %v5377_v24 = vadd.f32 1.0, %v6842_v49 }
 0x474   : > { %v5376_v45 = vadd.f32 1.0, %v6844_v52  ;;  %v6273_v19 = vpop.f32.mrb[0].mxu1 }
 0x475   : > { %v6846_v40 = vpop.eup %6845  ;;  %6853 = vrcp.f32 %v5377_v24  ;;  %v6487_v10 = vadd.f32 %v6273_v19, %v9073_v43  ;;  %v5118_v59 = vpop.f32.mrb[1].mxu1 }
 0x476   : > { %v6848_v61 = vpop.eup %6847  ;;  %v5439_v42 = vmul.f32 %v6846_v40, %v9478_v30  ;;  %6855 = vrcp.f32 %v5376_v45  ;;  %v6488_v13 = vadd.f32 %v5118_v59, %v9075_v47 }
 0x477   : > { %v5438_v51 = vmul.f32 %v6848_v61, %v9482_v15  ;;  %v9522_v39 = vadd.f32 %v6487_v10, %v9419_v9 }
 0x478   : > { %5471 = vst [vmem:[%s9452_s1 + $0x58] sm:$0xff] %v5439_v42  ;;  %v9526_v2 = vadd.f32 %v6488_v13, %v9419_v9 }
 0x479   : > { %5470 = vst [vmem:[%s9452_s1 + $0x50] sm:$0xff] %v5438_v51  ;;  %v5285_v6 = vsub.f32 0.0, %v9522_v39 }
 0x47a   : > { %v5284_v43 = vsub.f32 0.0, %v9526_v2 }
 0x47b   : > { %v6850_v25 = vpop.eup %6849  ;;  %v5334_v5 = vmul.f32 1.442695, %v5285_v6 }
 0x47c   : > { %v6852_v30 = vpop.eup %6851  ;;  %v5379_v20 = vadd.f32 1.0, %v6850_v25  ;;  %v5332_v33 = vmul.f32 1.442695, %v5284_v43  ;;  %v6276_v47 = vpop.f32.mrb[2].mxu1 }
 0x47d   : > { %v5378_v15 = vadd.f32 1.0, %v6852_v30  ;;  %6857 = vpow2.f32 %v5334_v5  ;;  %v6489_v63 = vadd.f32 %v6276_v47, %v9077_v21  ;;  %v5128_v12 = vpop.f32.mrb[3].mxu1 }
 0x47e   : > { %6859 = vrcp.f32 %v5379_v20  ;;  %v6490_v57 = vadd.f32 %v5128_v12, %v9080_v26 }
 0x47f   : > { %v6854_v44 = vpop.eup %6853  ;;  %6861 = vrcp.f32 %v5378_v15  ;;  %v9534_v4 = vadd.f32 %v6489_v63, %v9419_v9 }
 0x480   : > { %v6856_v29 = vpop.eup %6855  ;;  %v5441_v37 = vmul.f32 %v6854_v44, %v9492_v0  ;;  %6863 = vpow2.f32 %v5332_v33  ;;  %v5254_v46 = vadd.f32 %v6490_v57, %v9419_v9 }
 0x481   : > { %v5440_v7 = vmul.f32 %v6856_v29, %v9496_v62  ;;  %v5287_v56 = vsub.f32 0.0, %v9534_v4 }
 0x482   : > { %5473 = vst [vmem:[%s9452_s1 + $0x68] sm:$0xff] %v5441_v37  ;;  %v5286_v21 = vsub.f32 0.0, %v5254_v46 }
 0x483   : > { %5472 = vst [vmem:[%s9452_s1 + $0x60] sm:$0xff] %v5440_v7  ;;  %v5338_v26 = vmul.f32 1.442695, %v5287_v56 }
 0x484   : > { %v5336_v17 = vmul.f32 1.442695, %v5286_v21 }
 0x485   : > { %6865 = vpow2.f32 %v5338_v26 }
 0x486   : > { %6867 = vpow2.f32 %v5336_v17 }
 0x487   : > { %v6858_v35 = vpop.eup %6857 }
 0x488   : > { %v6860_v14 = vpop.eup %6859  ;;  %v5381_v27 = vadd.f32 1.0, %v6858_v35 }
 0x489   : > { %v6862_v0 = vpop.eup %6861  ;;  %v5443_v50 = vmul.f32 %v6860_v14, %v9506_v18 }
 0x48a   : > { %v6864_v31 = vpop.eup %6863  ;;  %v5442_v62 = vmul.f32 %v6862_v0, %v9510_v58  ;;  %6869 = vrcp.f32 %v5381_v27  ;;  %v6279_v41 = vpop.f32.mrb[4].mxu1 }
 0x48b   : > { %5475 = vst [vmem:[%s9452_s1 + $0x78] sm:$0xff] %v5443_v50  ;;  %v5380_v38 = vadd.f32 1.0, %v6864_v31  ;;  %v6491_v3 = vadd.f32 %v6279_v41, %v9084_v55  ;;  %v5138_v34 = vpop.f32.mrb[5].mxu1 }
 0x48c   : > { %5474 = vst [vmem:[%s9452_s1 + $0x70] sm:$0xff] %v5442_v62  ;;  %v6492_v53 = vadd.f32 %v5138_v34, %v9087_v48 }
 0x48d   : > { %6871 = vrcp.f32 %v5380_v38  ;;  %v9549_v32 = vadd.f32 %v6491_v3, %v9419_v9 }
 0x48e   : > { %v9552_v49 = vadd.f32 %v6492_v53, %v9419_v9 }
 0x48f   : > { %v6866_v18 = vpop.eup %6865  ;;  %v5289_v58 = vsub.f32 0.0, %v9549_v32 }
 0x490   : > { %v6868_v52 = vpop.eup %6867  ;;  %v5383_v24 = vadd.f32 1.0, %v6866_v18  ;;  %v5288_v45 = vsub.f32 0.0, %v9552_v49  ;;  %v6282_v19 = vpop.f32.mrb[6].mxu1 }
 0x491   : > { %v5382_v55 = vadd.f32 1.0, %v6868_v52  ;;  %v5342_v40 = vmul.f32 1.442695, %v5289_v58  ;;  %v6493_v48 = vadd.f32 %v6282_v19, %v9094_v16  ;;  %v5148_v10 = vpop.f32.mrb[7].mxu1 }
 0x492   : > { %6873 = vrcp.f32 %v5383_v24  ;;  %v5340_v59 = vmul.f32 1.442695, %v5288_v45  ;;  %v6494_v61 = vadd.f32 %v5148_v10, %v9099_v11 }
 0x493   : > { %6875 = vrcp.f32 %v5382_v55  ;;  %v9559_v42 = vadd.f32 %v6493_v48, %v9419_v9 }
 0x494   : > { %v6870_v13 = vpop.eup %6869  ;;  %6877 = vpow2.f32 %v5342_v40  ;;  %v9562_v51 = vadd.f32 %v6494_v61, %v9419_v9 }
 0x495   : > { %v5445_v6 = vmul.f32 %v6870_v13, %v9522_v39  ;;  %6879 = vpow2.f32 %v5340_v59  ;;  %v5291_v16 = vsub.f32 0.0, %v9559_v42 }
 0x496   : > { %v5290_v43 = vsub.f32 0.0, %v9562_v51 }
 0x497   : > { %v6872_v25 = vpop.eup %6871  ;;  %5477 = vst [vmem:[%s9452_s1 + $0x88] sm:$0xff] %v5445_v6  ;;  %v5346_v11 = vmul.f32 1.442695, %v5291_v16 }
 0x498   : > { %v5444_v5 = vmul.f32 %v6872_v25, %v9526_v2  ;;  %v5344_v30 = vmul.f32 1.442695, %v5290_v43 }
 0x499   : > { %6881 = vpow2.f32 %v5346_v11 }
 0x49a   : > { %5476 = vst [vmem:[%s9452_s1 + $0x80] sm:$0xff] %v5444_v5  ;;  %6883 = vpow2.f32 %v5344_v30 }
 0x49c   : > { %v6874_v20 = vpop.eup %6873 }
 0x49d   : > { %v6876_v33 = vpop.eup %6875  ;;  %v5447_v39 = vmul.f32 %v6874_v20, %v9534_v4 }
 0x49e   : > { %v6878_v47 = vpop.eup %6877  ;;  %v5446_v15 = vmul.f32 %v6876_v33, %v5254_v46  ;;  %v6285_v63 = vpop.f32.mrb[8].mxu1 }
 0x49f   : > { %v6880_v12 = vpop.eup %6879  ;;  %5479 = vst [vmem:[%s9452_s1 + $0x98] sm:$0xff] %v5447_v39  ;;  %v5385_v57 = vadd.f32 1.0, %v6878_v47  ;;  %v6495_v44 = vadd.f32 %v6285_v63, %v9139_v22  ;;  %v5158_v29 = vpop.f32.mrb[9].mxu1 }
 0x4a0   : > { %5478 = vst [vmem:[%s9452_s1 + $0x90] sm:$0xff] %v5446_v15  ;;  %v5384_v2 = vadd.f32 1.0, %v6880_v12  ;;  %v6496_v37 = vadd.f32 %v5158_v29, %v9145_v60 }
 0x4a1   : > { %6885 = vrcp.f32 %v5385_v57  ;;  %v9576_v7 = vadd.f32 %v6495_v44, %v9419_v9 }
 0x4a2   : > { %6887 = vrcp.f32 %v5384_v2  ;;  %v9579_v4 = vadd.f32 %v6496_v37, %v9419_v9 }
 0x4a3   : > { %v6882_v46 = vpop.eup %6881  ;;  %v5293_v56 = vsub.f32 0.0, %v9576_v7 }
 0x4a4   : > { %v6884_v21 = vpop.eup %6883  ;;  %v5387_v26 = vadd.f32 1.0, %v6882_v46  ;;  %v5292_v22 = vsub.f32 0.0, %v9579_v4 }
 0x4a5   : > { %v5386_v17 = vadd.f32 1.0, %v6884_v21  ;;  %v5350_v35 = vmul.f32 1.442695, %v5293_v56  ;;  %v6288_v14 = vpop.f32.mrb[10].mxu1 }
 0x4a6   : > { %6889 = vrcp.f32 %v5387_v26  ;;  %v5348_v60 = vmul.f32 1.442695, %v5292_v22  ;;  %v6497_v27 = vadd.f32 %v6288_v14, %v9196_v54  ;;  %v5168_v0 = vpop.f32.mrb[11].mxu1 }
 0x4a7   : > { %6891 = vrcp.f32 %v5386_v17  ;;  %v6498_v50 = vadd.f32 %v5168_v0, %v9201_v28 }
 0x4a8   : > { %6893 = vpow2.f32 %v5350_v35  ;;  %v9586_v31 = vadd.f32 %v6497_v27, %v9419_v9 }
 0x4a9   : > { %6895 = vpow2.f32 %v5348_v60  ;;  %v9589_v62 = vadd.f32 %v6498_v50, %v9419_v9 }
 0x4aa   : > { %v5295_v41 = vsub.f32 0.0, %v9586_v31 }
 0x4ab   : > { %v6886_v38 = vpop.eup %6885  ;;  %v5294_v3 = vsub.f32 0.0, %v9589_v62 }
 0x4ac   : > { %v6888_v54 = vpop.eup %6887  ;;  %v5449_v34 = vmul.f32 %v6886_v38, %v9549_v32  ;;  %v5354_v53 = vmul.f32 1.442695, %v5295_v41 }
 0x4ad   : > { %v5448_v28 = vmul.f32 %v6888_v54, %v9552_v49  ;;  %v5352_v18 = vmul.f32 1.442695, %v5294_v3 }
 0x4ae   : > { %5481 = vst [vmem:[%s9452_s1 + $0xa8] sm:$0xff] %v5449_v34  ;;  %6897 = vpow2.f32 %v5354_v53 }
 0x4af   : > { %5480 = vst [vmem:[%s9452_s1 + $0xa0] sm:$0xff] %v5448_v28  ;;  %6899 = vpow2.f32 %v5352_v18 }
 0x4b0   : > { %v6890_v58 = vpop.eup %6889 }
 0x4b1   : > { %v6892_v52 = vpop.eup %6891  ;;  %v5451_v24 = vmul.f32 %v6890_v58, %v9559_v42  ;;  %v6291_v55 = vpop.f32.mrb[12].mxu1 }
 0x4b2   : > { %v6894_v45 = vpop.eup %6893  ;;  %v5450_v19 = vmul.f32 %v6892_v52, %v9562_v51  ;;  %v6499_v48 = vadd.f32 %v6291_v55, %v9253_v8  ;;  %v5178_v49 = vpop.f32.mrb[13].mxu1 }
 0x4b3   : > { %v6896_v40 = vpop.eup %6895  ;;  %5483 = vst [vmem:[%s9452_s1 + $0xb8] sm:$0xff] %v5451_v24  ;;  %v5389_v32 = vadd.f32 1.0, %v6894_v45  ;;  %v6500_v59 = vadd.f32 %v5178_v49, %v9257_v1 }
 0x4b4   : > { %5482 = vst [vmem:[%s9452_s1 + $0xb0] sm:$0xff] %v5450_v19  ;;  %v5388_v10 = vadd.f32 1.0, %v6896_v40  ;;  %v5265_v61 = vadd.f32 %v6499_v48, %v9419_v9 }
 0x4b5   : > { %6901 = vrcp.f32 %v5389_v32  ;;  %v5264_v42 = vadd.f32 %v6500_v59, %v9419_v9 }
 0x4b6   : > { %6903 = vrcp.f32 %v5388_v10  ;;  %v5297_v13 = vsub.f32 0.0, %v5265_v61 }
 0x4b7   : > { %v5296_v51 = vsub.f32 0.0, %v5264_v42 }
 0x4b8   : > { %v6898_v6 = vpop.eup %6897  ;;  %v5358_v25 = vmul.f32 1.442695, %v5297_v13 }
 0x4b9   : > { %v6900_v16 = vpop.eup %6899  ;;  %v5391_v43 = vadd.f32 1.0, %v6898_v6  ;;  %v5356_v5 = vmul.f32 1.442695, %v5296_v51  ;;  %v6294_v8 = vpop.f32.mrb[14].mxu1 }
 0x4ba   : > { %v5390_v11 = vadd.f32 1.0, %v6900_v16  ;;  %v6501_v1 = vadd.f32 %v6294_v8, %v9323_v23  ;;  %v5188_v30 = vpop.f32.mrb[15].mxu1 }
 0x4bb   : > { %6905 = vrcp.f32 %v5391_v43  ;;  %v6502_v20 = vadd.f32 %v5188_v30, %v9331_v36 }
 0x4bc   : > { %6907 = vrcp.f32 %v5390_v11  ;;  %v5267_v33 = vadd.f32 %v6501_v1, %v9419_v9 }
 0x4bd   : > { %6909 = vpow2.f32 %v5358_v25  ;;  %v5266_v47 = vadd.f32 %v6502_v20, %v9419_v9 }
 0x4be   : > { %6911 = vpow2.f32 %v5356_v5  ;;  %v5299_v12 = vsub.f32 0.0, %v5267_v33 }
 0x4bf   : > { %v6902_v39 = vpop.eup %6901  ;;  %v5298_v44 = vsub.f32 0.0, %v5266_v47 }
 0x4c0   : > { %v6904_v15 = vpop.eup %6903  ;;  %v5453_v63 = vmul.f32 %v6902_v39, %v9576_v7  ;;  %v5362_v23 = vmul.f32 1.442695, %v5299_v12 }
 0x4c1   : > { %v5452_v57 = vmul.f32 %v6904_v15, %v9579_v4  ;;  %v5360_v29 = vmul.f32 1.442695, %v5298_v44 }
 0x4c2   : > { %5485 = vst [vmem:[%s9452_s1 + $0xc8] sm:$0xff] %v5453_v63  ;;  %6913 = vpow2.f32 %v5362_v23 }
 0x4c3   : > { %5484 = vst [vmem:[%s9452_s1 + $0xc0] sm:$0xff] %v5452_v57  ;;  %6915 = vpow2.f32 %v5360_v29 }
 0x4c5   : > { %v6906_v36 = vpop.eup %6905 }
 0x4c6   : > { %v6908_v2 = vpop.eup %6907  ;;  %v5455_v37 = vmul.f32 %v6906_v36, %v9586_v31 }
 0x4c7   : > { %v6910_v9 = vpop.eup %6909  ;;  %v5454_v46 = vmul.f32 %v6908_v2, %v9589_v62 }
 0x4c8   : > { %v6912_v7 = vpop.eup %6911  ;;  %5487 = vst [vmem:[%s9452_s1 + $0xd8] sm:$0xff] %v5455_v37  ;;  %v5393_v56 = vadd.f32 1.0, %v6910_v9 }
 0x4c9   : > { %5486 = vst [vmem:[%s9452_s1 + $0xd0] sm:$0xff] %v5454_v46  ;;  %v5392_v4 = vadd.f32 1.0, %v6912_v7 }
 0x4ca   : > { %6917 = vrcp.f32 %v5393_v56 }
 0x4cb   : > { %6919 = vrcp.f32 %v5392_v4 }
 0x4cc   : > { %v6914_v21 = vpop.eup %6913 }
 0x4cd   : > { %v6916_v26 = vpop.eup %6915  ;;  %v5395_v22 = vadd.f32 1.0, %v6914_v21 }
 0x4ce   : > { %v5394_v17 = vadd.f32 1.0, %v6916_v26 }
 0x4cf   : > { %6921 = vrcp.f32 %v5395_v22 }
 0x4d0   : > { %6923 = vrcp.f32 %v5394_v17 }
 0x4d4   : > { %v6918_v35 = vpop.eup %6917 }
 0x4d5   : > { %v6920_v14 = vpop.eup %6919  ;;  %v5457_v60 = vmul.f32 %v6918_v35, %v5265_v61 }
 0x4d6   : > { %v5456_v27 = vmul.f32 %v6920_v14, %v5264_v42 }
 0x4d7   : > { %5489 = vst [vmem:[%s9452_s1 + $0xe8] sm:$0xff] %v5457_v60 }
 0x4d8   : > { %5488 = vst [vmem:[%s9452_s1 + $0xe0] sm:$0xff] %v5456_v27 }
 0x4d9   : > { %v6922_v0 = vpop.eup %6921 }
 0x4da   : > { %v6924_v50 = vpop.eup %6923  ;;  %v5459_v31 = vmul.f32 %v6922_v0, %v5267_v33 }
 0x4db   : > { %v5458_v62 = vmul.f32 %v6924_v50, %v5266_v47 }
 0x4dc   : > { %5491 = vst [vmem:[%s9452_s1 + $0xf8] sm:$0xff] %v5459_v31 }
 0x4dd   : > { %5490 = vst [vmem:[%s9452_s1 + $0xf0] sm:$0xff] %v5458_v62 }
 0x4de   : > { %7113 = shalt.err (!%p7110_p8)
}
 0x4df   : > { %s7114_s13 = scalar_lea.hbm %s9624_s9, 4096  ;;  %s7118_s1 = scalar_lea.hbm %s9680_s8, 8192 }
 0x4e0   : > { %p7115_p6 = scmp.ne.s32.totalorder %s9624_s9, %s7114_s13  ;;  %p7119_p3 = scmp.lt.u32.totalorder %s9624_s9, %s9680_s8 }
 0x4e1   : > { %p7120_p5 = scmp.lt.u32.totalorder %s7118_s1, %s7114_s13  ;;  %p7122_p7 = scmp.lt.u32.totalorder %s7114_s13, %s9624_s9 }
 0x4e2   : > { %p7116_p10 = pnand %p7115_p6, %p9770_p4 }
 0x4e3   : > { %p7121_p9 = por %p7120_p5, %p7119_p3 }
 0x4e4   : > { %p7117_p11 = pneg %p7116_p10 }
 0x4e5   : > { %p7123_p12 = por %p7122_p7, %p7121_p9 }
 0x4e7   : > { %p7124_p1 = pnand %p7123_p12, %p7117_p11 }
 0x4e9   : > { %7127 = shalt.err (!%p7124_p1)
}
 0x4ea   : > { %s7190_s10 = smov 128   ;;  %s7191_s22 = smov 8  }
 0x4eb   : > { %6589 = dma.vmem_to_hbm [thread:$0]  (%p9770_p4), %s9626_s25, 4096, %s9624_s9, %s5493_s17, %s7190_s10, %s7190_s10, %s7191_s22  }
 0x4ec PF: > { %s5521_s11 = sand.u32 1, %s7166_s27   ;;  %p9771_p13 = scmp.ne.s32.totalorder %s9716_s24, 0 }
 0x4ed   : > { %p9772_p0 = scmp.ge.s32.totalorder %s7178_s30, 2  ;;  %s5522_s15 = scalar_lea.sflag [#allocation5], %s5521_s11 }
 0x4ef   : > { %p6612_p2 = pnand %p9772_p0, %p9771_p13 }
 0x4f1   : > { %7161 = dma.done.wait (!%p6612_p2), %s5522_s15, 4096  }
 0x4f2   : > { %7163 = vsyncadd (!%p6612_p2), %s5522_s15, 4294963200  ;;  %p24_p8 = scmp.ge.s32.totalorder %s7410_s23, 4   ;;  %s9773_s27 = smov %s7170_s28 }
 0x4f3   : > { %s9774_s28 = smov %s7174_s29  ;;  %s9775_s29 = smov %s7422_s18 }
 0x4f4   : > { %s9776_s30 = smov %s7410_s23  ;;  %26 = sbr.rel (!%p24_p8) target bundleno = 10 (0xa), region = 121 }
 0x4fb   :  { %5527 = vsyncpa [#allocation4], 1 }
 0x4fc   :  { %5529 = vsyncpa [#allocation4 + $0x1], 1 }
 0x4fd   :  { %5530 = vsyncpa [#allocation7], 1 }
 0x4fe   :  { %5531 = vsyncpa [#allocation10], 1 }
 0x4ff   :  { %5532 = vsyncpa [#allocation13], 1 }
 0x500   :  { %5533 = vsyncpa [#allocation5], 1 }
 0x501   :  { %5535 = vsyncpa [#allocation5 + $0x1], 1 }

</bundles_post_ra>
